<compile_context>
chip_gen: v7x
topology: tpu7x:2x2x1
jax: 0.10.0
libtpu: 0.0.40
codegen_flags: <defaults>
</compile_context>

<pallas_src>
import functools

import jax
import jax.numpy as jnp
from jax import lax
from jax.experimental import pallas as pl
from jax.experimental.pallas import tpu as pltpu

EPS = 1e-5  # PyTorch InstanceNorm2d default


def _residual_block_kernel(x_ref, w1_ref, g1_ref, be1_ref, w2_ref, g2_ref,
                           be2_ref, o_ref, pad_ref, col_ref, *, H, W, C):
    """One batch element: conv+IN+ReLU, conv+IN, +residual, ReLU — all in VMEM."""
    inv_n = jnp.float32(1.0 / (H * W))

    def conv_instnorm(v, w_flat_ref, g_ref, b_ref):
        # ---- reflect pad (1-pixel halo) into the VMEM scratch ----
        pad_ref[1:H + 1, 1:W + 1, :] = v                       # interior
        pad_ref[0:1, 1:W + 1, :] = v[1:2]                      # top row  <- row 1
        pad_ref[H + 1:H + 2, 1:W + 1, :] = v[H - 2:H - 1]      # bottom   <- row H-2
        pad_ref[:, 0:1, :] = pad_ref[:, 2:3, :]                # left col (corners ok)
        pad_ref[:, W + 1:W + 2, :] = pad_ref[:, W - 1:W, :]    # right col
        # ---- im2col: pack 9 shifted taps, one K=9C MXU matmul ----
        for kh in range(3):
            for kw in range(3):
                t = kh * 3 + kw
                col_ref[:, t * C:(t + 1) * C] = (
                    pad_ref[kh:kh + H, kw:kw + W, :].reshape(H * W, C))
        y = jnp.dot(col_ref[...], w_flat_ref[...],
                    preferred_element_type=jnp.float32)        # (H*W, C) f32
        # ---- InstanceNorm2d (affine, biased var), single reduction pass ----
        s = jnp.sum(y, axis=0, keepdims=True)
        ss = jnp.sum(y * y, axis=0, keepdims=True)
        mean = s * inv_n
        var = jnp.maximum(ss * inv_n - mean * mean, 0.0)
        # Fold gamma/rsqrt/mean/beta into one per-channel scale + shift
        # (2 VPU ops per element instead of 4).
        scale = g_ref[...] * lax.rsqrt(var + EPS)              # (1, C) f32
        shift = b_ref[...] - mean * scale                      # (1, C) f32
        return y, scale, shift

    x = x_ref[0]                                               # (H, W, C) native dtype
    # conv1 -> IN -> ReLU   (conv bias omitted: cancelled exactly by IN mean-sub)
    y, sc, sh = conv_instnorm(x, w1_ref, g1_ref, be1_ref)
    y = jnp.maximum(y * sc + sh, 0.0)
    # conv2 -> IN
    y, sc, sh = conv_instnorm(y.reshape(H, W, C).astype(pad_ref.dtype),
                              w2_ref, g2_ref, be2_ref)
    # IN affine + residual + ReLU fused in one elementwise expression
    y = jnp.maximum(y * sc + sh + x.reshape(H * W, C).astype(jnp.float32), 0.0)
    o_ref[...] = y.reshape(1, H, W, C).astype(o_ref.dtype)


def _vmem_limit_bytes(H, W, C, itemsize):
    blk = H * W * C * itemsize                    # one activation tile
    pad = (H + 2) * (W + 2) * C * itemsize        # padded scratch
    col = H * W * 9 * C * itemsize                # im2col scratch
    wts = 2 * 9 * C * C * itemsize + 4 * C * 4    # weights + affine params
    acc = 3 * H * W * C * 4                       # f32 value intermediates
    est = 2 * (2 * blk) + pad + col + wts + acc   # in/out blocks double-buffered
    return int(min(max(2 * est, 8 << 20), 48 << 20))


def residual_block_nhwc(x_nhwc, params):
    """Fused ResidualBlock, NHWC activations, HWIO weights."""
    (w1, _b1, g1, be1), (w2, _b2, g2, be2) = params  # conv biases are no-ops under IN
    B, H, W, C = x_nhwc.shape
    assert H >= 2 and W >= 2, "reflect padding needs spatial dims >= 2"
    dt = x_nhwc.dtype
    w1f = w1.reshape(9 * C, C).astype(dt)            # feed MXU in native dtype
    w2f = w2.reshape(9 * C, C).astype(dt)
    r = lambda v: v.reshape(1, C).astype(jnp.float32)

    blk = pl.BlockSpec((1, H, W, C), lambda b: (b, 0, 0, 0))
    wsp = pl.BlockSpec((9 * C, C), lambda b: (0, 0))
    vec = pl.BlockSpec((1, C), lambda b: (0, 0))

    return pl.pallas_call(
        functools.partial(_residual_block_kernel, H=H, W=W, C=C),
        out_shape=jax.ShapeDtypeStruct((B, H, W, C), dt),
        grid_spec=pltpu.PrefetchScalarGridSpec(
            num_scalar_prefetch=0,
            grid=(B,),
            in_specs=[blk, wsp, vec, vec, wsp, vec, vec],
            out_specs=blk,
            scratch_shapes=[
                pltpu.VMEM((H + 2, W + 2, C), dt),   # reflect-padded tile
                pltpu.VMEM((H * W, 9 * C), dt),      # im2col buffer
            ]),
        compiler_params=pltpu.CompilerParams(
            dimension_semantics=("parallel",),
            vmem_limit_bytes=_vmem_limit_bytes(H, W, C, jnp.dtype(dt).itemsize)),
    )(x_nhwc, w1f, r(g1), r(be1), w2f, r(g2), r(be2))


def residual_block(x_nchw, params):
    """PyTorch-interface wrapper (NCHW in / NCHW out).

    Use residual_block_nhwc directly in an NHWC network to avoid the two
    transpose HBM passes at the boundary.
    """
    x = jnp.transpose(x_nchw, (0, 2, 3, 1))          # NCHW -> NHWC
    y = residual_block_nhwc(x, params)
    return jnp.transpose(y, (0, 3, 1, 2))            # NHWC -> NCHW


# ---------------- pure-JAX reference (for correctness check) ----------------
def _ref_conv_layer(x_nhwc, w_hwio, b, g, be):
    xp = jnp.pad(x_nhwc, ((0, 0), (1, 1), (1, 1), (0, 0)), mode="reflect")
    y = lax.conv_general_dilated(
        xp, w_hwio, window_strides=(1, 1), padding="VALID",
        dimension_numbers=("NHWC", "HWIO", "NHWC"))
    y = y + b[None, None, None, :]
    mean = jnp.mean(y, axis=(1, 2), keepdims=True)
    var = jnp.mean((y - mean) ** 2, axis=(1, 2), keepdims=True)
    y = (y - mean) * lax.rsqrt(var + EPS)
    return y * g[None, None, None, :] + be[None, None, None, :]


def _ref_residual_block(x_nchw, params):
    (w1, b1, g1, be1), (w2, b2, g2, be2) = params
    x = jnp.transpose(x_nchw, (0, 2, 3, 1))
    y = jnp.maximum(_ref_conv_layer(x, w1, b1, g1, be1), 0.0)
    y = _ref_conv_layer(y, w2, b2, g2, be2)
    y = jnp.maximum(y + x, 0.0)
    return jnp.transpose(y, (0, 3, 1, 2))


if __name__ == "__main__":
    B, C, H, W = 2, 4, 16, 16
    key = jax.random.PRNGKey(0)
    kx, kw1, kb1, kw2, kb2 = jax.random.split(key, 5)

    x = jax.random.normal(kx, (B, C, H, W), jnp.float32)

    # Conv weights/bias random (HWIO); InstanceNorm affine at PyTorch init
    # (gamma=1, beta=0).  Biases are kept in the reference to verify that
    # dropping them in the kernel is exact (IN cancels them).
    w1 = jax.random.normal(kw1, (3, 3, C, C), jnp.float32) * 0.1
    b1 = jax.random.normal(kb1, (C,), jnp.float32) * 0.1
    g1, be1 = jnp.ones((C,), jnp.float32), jnp.zeros((C,), jnp.float32)
    w2 = jax.random.normal(kw2, (3, 3, C, C), jnp.float32) * 0.1
    b2 = jax.random.normal(kb2, (C,), jnp.float32) * 0.1
    g2, be2 = jnp.ones((C,), jnp.float32), jnp.zeros((C,), jnp.float32)

    params = ((w1, b1, g1, be1), (w2, b2, g2, be2))

    out = residual_block(x, params)
    out = jax.block_until_ready(out)

    ref = _ref_residual_block(x, params)
    assert out.shape == (B, C, H, W)
    assert jnp.max(jnp.abs(out - ref)) < 2e-4, "mismatch vs reference"

    print("KERNEL_OK")
</pallas_src>

<mosaic_0001>
module attributes {stable_mosaic.version = 11 : i64} {
  func.func @_residual_block_kernel(%arg0: i32, %arg1: memref<1x16x16x4xf32, #tpu.memory_space<vmem>>, %arg2: memref<36x4xf32, #tpu.memory_space<vmem>>, %arg3: memref<1x4xf32, #tpu.memory_space<vmem>>, %arg4: memref<1x4xf32, #tpu.memory_space<vmem>>, %arg5: memref<36x4xf32, #tpu.memory_space<vmem>>, %arg6: memref<1x4xf32, #tpu.memory_space<vmem>>, %arg7: memref<1x4xf32, #tpu.memory_space<vmem>>, %arg8: memref<1x16x16x4xf32, #tpu.memory_space<vmem>>, %arg9: memref<18x18x4xf32, #tpu.memory_space<vmem>>, %arg10: memref<256x36xf32, #tpu.memory_space<vmem>>) attributes {dimension_semantics = [#tpu.dimension_semantics<parallel>], iteration_bounds = array<i64: 2>, scalar_prefetch = 0 : i64, scratch_operands = 2 : i64, tpu.core_type = #tpu.core_type<tc>, window_params = [{transform_indices = @transform_0, window_bounds = array<i64: 1, 16, 16, 4>}, {pipeline_mode = #tpu.pipeline_mode<synchronous>, transform_indices = @transform_1, window_bounds = array<i64: 36, 4>}, {pipeline_mode = #tpu.pipeline_mode<synchronous>, transform_indices = @transform_2, window_bounds = array<i64: 1, 4>}, {pipeline_mode = #tpu.pipeline_mode<synchronous>, transform_indices = @transform_3, window_bounds = array<i64: 1, 4>}, {pipeline_mode = #tpu.pipeline_mode<synchronous>, transform_indices = @transform_4, window_bounds = array<i64: 36, 4>}, {pipeline_mode = #tpu.pipeline_mode<synchronous>, transform_indices = @transform_5, window_bounds = array<i64: 1, 4>}, {pipeline_mode = #tpu.pipeline_mode<synchronous>, transform_indices = @transform_6, window_bounds = array<i64: 1, 4>}, {transform_indices = @transform_7, window_bounds = array<i64: 1, 16, 16, 4>}]} {
    %c0 = arith.constant 0 : index
    %c0_0 = arith.constant 0 : index
    %c0_1 = arith.constant 0 : index
    %c0_2 = arith.constant 0 : index
    %0 = vector.load %arg1[%c0, %c0_0, %c0_1, %c0_2] : memref<1x16x16x4xf32, #tpu.memory_space<vmem>>, vector<1x16x16x4xf32>
    %1 = vector.shape_cast %0 : vector<1x16x16x4xf32> to vector<16x16x4xf32>
    %c1 = arith.constant 1 : index
    %c1_3 = arith.constant 1 : index
    %c0_4 = arith.constant 0 : index
    %2 = vector.load %arg9[%c1, %c1_3, %c0_4] : memref<18x18x4xf32, #tpu.memory_space<vmem>>, vector<16x16x4xf32>
    tpu.vector_store %arg9[%c1, %c1_3, %c0_4], %1 {strides = array<i32>} : memref<18x18x4xf32, #tpu.memory_space<vmem>>, vector<16x16x4xf32>,
    %3 = vector.extract_strided_slice %1 {offsets = [1, 0, 0], sizes = [1, 16, 4], strides = [1, 1, 1]} : vector<16x16x4xf32> to vector<1x16x4xf32>
    %c0_5 = arith.constant 0 : index
    %c1_6 = arith.constant 1 : index
    %c0_7 = arith.constant 0 : index
    %4 = vector.load %arg9[%c0_5, %c1_6, %c0_7] : memref<18x18x4xf32, #tpu.memory_space<vmem>>, vector<1x16x4xf32>
    tpu.vector_store %arg9[%c0_5, %c1_6, %c0_7], %3 {strides = array<i32>} : memref<18x18x4xf32, #tpu.memory_space<vmem>>, vector<1x16x4xf32>,
    %5 = vector.extract_strided_slice %1 {offsets = [14, 0, 0], sizes = [1, 16, 4], strides = [1, 1, 1]} : vector<16x16x4xf32> to vector<1x16x4xf32>
    %c17 = arith.constant 17 : index
    %c1_8 = arith.constant 1 : index
    %c0_9 = arith.constant 0 : index
    %6 = vector.load %arg9[%c17, %c1_8, %c0_9] : memref<18x18x4xf32, #tpu.memory_space<vmem>>, vector<1x16x4xf32>
    tpu.vector_store %arg9[%c17, %c1_8, %c0_9], %5 {strides = array<i32>} : memref<18x18x4xf32, #tpu.memory_space<vmem>>, vector<1x16x4xf32>,
    %c0_10 = arith.constant 0 : index
    %c2 = arith.constant 2 : index
    %c0_11 = arith.constant 0 : index
    %7 = vector.load %arg9[%c0_10, %c2, %c0_11] : memref<18x18x4xf32, #tpu.memory_space<vmem>>, vector<18x1x4xf32>
    %c0_12 = arith.constant 0 : index
    %c0_13 = arith.constant 0 : index
    %c0_14 = arith.constant 0 : index
    %8 = vector.load %arg9[%c0_12, %c0_13, %c0_14] : memref<18x18x4xf32, #tpu.memory_space<vmem>>, vector<18x1x4xf32>
    tpu.vector_store %arg9[%c0_12, %c0_13, %c0_14], %7 {strides = array<i32>} : memref<18x18x4xf32, #tpu.memory_space<vmem>>, vector<18x1x4xf32>,
    %c0_15 = arith.constant 0 : index
    %c15 = arith.constant 15 : index
    %c0_16 = arith.constant 0 : index
    %9 = vector.load %arg9[%c0_15, %c15, %c0_16] : memref<18x18x4xf32, #tpu.memory_space<vmem>>, vector<18x1x4xf32>
    %c0_17 = arith.constant 0 : index
    %c17_18 = arith.constant 17 : index
    %c0_19 = arith.constant 0 : index
    %10 = vector.load %arg9[%c0_17, %c17_18, %c0_19] : memref<18x18x4xf32, #tpu.memory_space<vmem>>, vector<18x1x4xf32>
    tpu.vector_store %arg9[%c0_17, %c17_18, %c0_19], %9 {strides = array<i32>} : memref<18x18x4xf32, #tpu.memory_space<vmem>>, vector<18x1x4xf32>,
    %c0_20 = arith.constant 0 : index
    %c0_21 = arith.constant 0 : index
    %c0_22 = arith.constant 0 : index
    %11 = vector.load %arg9[%c0_20, %c0_21, %c0_22] : memref<18x18x4xf32, #tpu.memory_space<vmem>>, vector<16x16x4xf32>
    %12 = vector.shape_cast %11 : vector<16x16x4xf32> to vector<256x4xf32>
    %c0_23 = arith.constant 0 : index
    %c0_24 = arith.constant 0 : index
    %13 = vector.load %arg10[%c0_23, %c0_24] : memref<256x36xf32, #tpu.memory_space<vmem>>, vector<256x4xf32>
    tpu.vector_store %arg10[%c0_23, %c0_24], %12 {strides = array<i32>} : memref<256x36xf32, #tpu.memory_space<vmem>>, vector<256x4xf32>,
    %c0_25 = arith.constant 0 : index
    %c1_26 = arith.constant 1 : index
    %c0_27 = arith.constant 0 : index
    %14 = vector.load %arg9[%c0_25, %c1_26, %c0_27] : memref<18x18x4xf32, #tpu.memory_space<vmem>>, vector<16x16x4xf32>
    %15 = vector.shape_cast %14 : vector<16x16x4xf32> to vector<256x4xf32>
    %c0_28 = arith.constant 0 : index
    %c4 = arith.constant 4 : index
    %16 = vector.load %arg10[%c0_28, %c4] : memref<256x36xf32, #tpu.memory_space<vmem>>, vector<256x4xf32>
    tpu.vector_store %arg10[%c0_28, %c4], %15 {strides = array<i32>} : memref<256x36xf32, #tpu.memory_space<vmem>>, vector<256x4xf32>,
    %c0_29 = arith.constant 0 : index
    %c2_30 = arith.constant 2 : index
    %c0_31 = arith.constant 0 : index
    %17 = vector.load %arg9[%c0_29, %c2_30, %c0_31] : memref<18x18x4xf32, #tpu.memory_space<vmem>>, vector<16x16x4xf32>
    %18 = vector.shape_cast %17 : vector<16x16x4xf32> to vector<256x4xf32>
    %c0_32 = arith.constant 0 : index
    %c8 = arith.constant 8 : index
    %19 = vector.load %arg10[%c0_32, %c8] : memref<256x36xf32, #tpu.memory_space<vmem>>, vector<256x4xf32>
    tpu.vector_store %arg10[%c0_32, %c8], %18 {strides = array<i32>} : memref<256x36xf32, #tpu.memory_space<vmem>>, vector<256x4xf32>,
    %c1_33 = arith.constant 1 : index
    %c0_34 = arith.constant 0 : index
    %c0_35 = arith.constant 0 : index
    %20 = vector.load %arg9[%c1_33, %c0_34, %c0_35] : memref<18x18x4xf32, #tpu.memory_space<vmem>>, vector<16x16x4xf32>
    %21 = vector.shape_cast %20 : vector<16x16x4xf32> to vector<256x4xf32>
    %c0_36 = arith.constant 0 : index
    %c12 = arith.constant 12 : index
    %22 = vector.load %arg10[%c0_36, %c12] : memref<256x36xf32, #tpu.memory_space<vmem>>, vector<256x4xf32>
    tpu.vector_store %arg10[%c0_36, %c12], %21 {strides = array<i32>} : memref<256x36xf32, #tpu.memory_space<vmem>>, vector<256x4xf32>,
    %c1_37 = arith.constant 1 : index
    %c1_38 = arith.constant 1 : index
    %c0_39 = arith.constant 0 : index
    %23 = vector.load %arg9[%c1_37, %c1_38, %c0_39] : memref<18x18x4xf32, #tpu.memory_space<vmem>>, vector<16x16x4xf32>
    %24 = vector.shape_cast %23 : vector<16x16x4xf32> to vector<256x4xf32>
    %c0_40 = arith.constant 0 : index
    %c16 = arith.constant 16 : index
    %25 = vector.load %arg10[%c0_40, %c16] : memref<256x36xf32, #tpu.memory_space<vmem>>, vector<256x4xf32>
    tpu.vector_store %arg10[%c0_40, %c16], %24 {strides = array<i32>} : memref<256x36xf32, #tpu.memory_space<vmem>>, vector<256x4xf32>,
    %c1_41 = arith.constant 1 : index
    %c2_42 = arith.constant 2 : index
    %c0_43 = arith.constant 0 : index
    %26 = vector.load %arg9[%c1_41, %c2_42, %c0_43] : memref<18x18x4xf32, #tpu.memory_space<vmem>>, vector<16x16x4xf32>
    %27 = vector.shape_cast %26 : vector<16x16x4xf32> to vector<256x4xf32>
    %c0_44 = arith.constant 0 : index
    %c20 = arith.constant 20 : index
    %28 = vector.load %arg10[%c0_44, %c20] : memref<256x36xf32, #tpu.memory_space<vmem>>, vector<256x4xf32>
    tpu.vector_store %arg10[%c0_44, %c20], %27 {strides = array<i32>} : memref<256x36xf32, #tpu.memory_space<vmem>>, vector<256x4xf32>,
    %c2_45 = arith.constant 2 : index
    %c0_46 = arith.constant 0 : index
    %c0_47 = arith.constant 0 : index
    %29 = vector.load %arg9[%c2_45, %c0_46, %c0_47] : memref<18x18x4xf32, #tpu.memory_space<vmem>>, vector<16x16x4xf32>
    %30 = vector.shape_cast %29 : vector<16x16x4xf32> to vector<256x4xf32>
    %c0_48 = arith.constant 0 : index
    %c24 = arith.constant 24 : index
    %31 = vector.load %arg10[%c0_48, %c24] : memref<256x36xf32, #tpu.memory_space<vmem>>, vector<256x4xf32>
    tpu.vector_store %arg10[%c0_48, %c24], %30 {strides = array<i32>} : memref<256x36xf32, #tpu.memory_space<vmem>>, vector<256x4xf32>,
    %c2_49 = arith.constant 2 : index
    %c1_50 = arith.constant 1 : index
    %c0_51 = arith.constant 0 : index
    %32 = vector.load %arg9[%c2_49, %c1_50, %c0_51] : memref<18x18x4xf32, #tpu.memory_space<vmem>>, vector<16x16x4xf32>
    %33 = vector.shape_cast %32 : vector<16x16x4xf32> to vector<256x4xf32>
    %c0_52 = arith.constant 0 : index
    %c28 = arith.constant 28 : index
    %34 = vector.load %arg10[%c0_52, %c28] : memref<256x36xf32, #tpu.memory_space<vmem>>, vector<256x4xf32>
    tpu.vector_store %arg10[%c0_52, %c28], %33 {strides = array<i32>} : memref<256x36xf32, #tpu.memory_space<vmem>>, vector<256x4xf32>,
    %c2_53 = arith.constant 2 : index
    %c2_54 = arith.constant 2 : index
    %c0_55 = arith.constant 0 : index
    %35 = vector.load %arg9[%c2_53, %c2_54, %c0_55] : memref<18x18x4xf32, #tpu.memory_space<vmem>>, vector<16x16x4xf32>
    %36 = vector.shape_cast %35 : vector<16x16x4xf32> to vector<256x4xf32>
    %c0_56 = arith.constant 0 : index
    %c32 = arith.constant 32 : index
    %37 = vector.load %arg10[%c0_56, %c32] : memref<256x36xf32, #tpu.memory_space<vmem>>, vector<256x4xf32>
    tpu.vector_store %arg10[%c0_56, %c32], %36 {strides = array<i32>} : memref<256x36xf32, #tpu.memory_space<vmem>>, vector<256x4xf32>,
    %c0_57 = arith.constant 0 : index
    %c0_58 = arith.constant 0 : index
    %38 = vector.load %arg10[%c0_57, %c0_58] : memref<256x36xf32, #tpu.memory_space<vmem>>, vector<256x36xf32>
    %c0_59 = arith.constant 0 : index
    %c0_60 = arith.constant 0 : index
    %39 = vector.load %arg2[%c0_59, %c0_60] : memref<36x4xf32, #tpu.memory_space<vmem>>, vector<36x4xf32>
    %cst = arith.constant dense<0.000000e+00> : vector<256x4xf32>
    %40 = tpu.matmul %38, %39, %cst {dimension_numbers = #tpu.dot_dimension_numbers<[1], [0], [0], [1], [0, 0, 1, 1], [], []>} : vector<256x36xf32>, vector<36x4xf32>, vector<256x4xf32> -> vector<256x4xf32>
    %cst_61 = arith.constant dense<0.000000e+00> : vector<4xf32>
    %41 = vector.multi_reduction <add>, %40, %cst_61 [0] : vector<256x4xf32> to vector<4xf32>
    %42 = vector.shape_cast %41 : vector<4xf32> to vector<1x4xf32>
    %43 = arith.mulf %40, %40 : vector<256x4xf32>
    %cst_62 = arith.constant dense<0.000000e+00> : vector<4xf32>
    %44 = vector.multi_reduction <add>, %43, %cst_62 [0] : vector<256x4xf32> to vector<4xf32>
    %45 = vector.shape_cast %44 : vector<4xf32> to vector<1x4xf32>
    %cst_63 = arith.constant 3.906250e-03 : f32
    %46 = vector.broadcast %cst_63 : f32 to vector<1x4xf32>
    %47 = arith.mulf %42, %46 : vector<1x4xf32>
    %cst_64 = arith.constant 3.906250e-03 : f32
    %48 = vector.broadcast %cst_64 : f32 to vector<1x4xf32>
    %49 = arith.mulf %45, %48 : vector<1x4xf32>
    %50 = arith.mulf %47, %47 : vector<1x4xf32>
    %51 = arith.subf %49, %50 : vector<1x4xf32>
    %cst_65 = arith.constant 0.000000e+00 : f32
    %52 = vector.broadcast %cst_65 : f32 to vector<1x4xf32>
    %53 = arith.maximumf %51, %52 : vector<1x4xf32>
    %c0_66 = arith.constant 0 : index
    %c0_67 = arith.constant 0 : index
    %54 = vector.load %arg3[%c0_66, %c0_67] : memref<1x4xf32, #tpu.memory_space<vmem>>, vector<1x4xf32>
    %cst_68 = arith.constant 9.99999974E-6 : f32
    %55 = vector.broadcast %cst_68 : f32 to vector<1x4xf32>
    %56 = arith.addf %53, %55 : vector<1x4xf32>
    %57 = math.rsqrt %56 : vector<1x4xf32>
    %58 = arith.mulf %54, %57 : vector<1x4xf32>
    %c0_69 = arith.constant 0 : index
    %c0_70 = arith.constant 0 : index
    %59 = vector.load %arg4[%c0_69, %c0_70] : memref<1x4xf32, #tpu.memory_space<vmem>>, vector<1x4xf32>
    %60 = arith.mulf %47, %58 : vector<1x4xf32>
    %61 = arith.subf %59, %60 : vector<1x4xf32>
    %62 = vector.broadcast %58 : vector<1x4xf32> to vector<256x4xf32>
    %63 = arith.mulf %40, %62 : vector<256x4xf32>
    %64 = vector.broadcast %61 : vector<1x4xf32> to vector<256x4xf32>
    %65 = arith.addf %63, %64 : vector<256x4xf32>
    %cst_71 = arith.constant 0.000000e+00 : f32
    %66 = vector.broadcast %cst_71 : f32 to vector<256x4xf32>
    %67 = arith.maximumf %65, %66 : vector<256x4xf32>
    %68 = vector.shape_cast %67 : vector<256x4xf32> to vector<16x16x4xf32>
    %c1_72 = arith.constant 1 : index
    %c1_73 = arith.constant 1 : index
    %c0_74 = arith.constant 0 : index
    %69 = vector.load %arg9[%c1_72, %c1_73, %c0_74] : memref<18x18x4xf32, #tpu.memory_space<vmem>>, vector<16x16x4xf32>
    tpu.vector_store %arg9[%c1_72, %c1_73, %c0_74], %68 {strides = array<i32>} : memref<18x18x4xf32, #tpu.memory_space<vmem>>, vector<16x16x4xf32>,
    %70 = vector.extract_strided_slice %68 {offsets = [1, 0, 0], sizes = [1, 16, 4], strides = [1, 1, 1]} : vector<16x16x4xf32> to vector<1x16x4xf32>
    %c0_75 = arith.constant 0 : index
    %c1_76 = arith.constant 1 : index
    %c0_77 = arith.constant 0 : index
    %71 = vector.load %arg9[%c0_75, %c1_76, %c0_77] : memref<18x18x4xf32, #tpu.memory_space<vmem>>, vector<1x16x4xf32>
    tpu.vector_store %arg9[%c0_75, %c1_76, %c0_77], %70 {strides = array<i32>} : memref<18x18x4xf32, #tpu.memory_space<vmem>>, vector<1x16x4xf32>,
    %72 = vector.extract_strided_slice %68 {offsets = [14, 0, 0], sizes = [1, 16, 4], strides = [1, 1, 1]} : vector<16x16x4xf32> to vector<1x16x4xf32>
    %c17_78 = arith.constant 17 : index
    %c1_79 = arith.constant 1 : index
    %c0_80 = arith.constant 0 : index
    %73 = vector.load %arg9[%c17_78, %c1_79, %c0_80] : memref<18x18x4xf32, #tpu.memory_space<vmem>>, vector<1x16x4xf32>
    tpu.vector_store %arg9[%c17_78, %c1_79, %c0_80], %72 {strides = array<i32>} : memref<18x18x4xf32, #tpu.memory_space<vmem>>, vector<1x16x4xf32>,
    %c0_81 = arith.constant 0 : index
    %c2_82 = arith.constant 2 : index
    %c0_83 = arith.constant 0 : index
    %74 = vector.load %arg9[%c0_81, %c2_82, %c0_83] : memref<18x18x4xf32, #tpu.memory_space<vmem>>, vector<18x1x4xf32>
    %c0_84 = arith.constant 0 : index
    %c0_85 = arith.constant 0 : index
    %c0_86 = arith.constant 0 : index
    %75 = vector.load %arg9[%c0_84, %c0_85, %c0_86] : memref<18x18x4xf32, #tpu.memory_space<vmem>>, vector<18x1x4xf32>
    tpu.vector_store %arg9[%c0_84, %c0_85, %c0_86], %74 {strides = array<i32>} : memref<18x18x4xf32, #tpu.memory_space<vmem>>, vector<18x1x4xf32>,
    %c0_87 = arith.constant 0 : index
    %c15_88 = arith.constant 15 : index
    %c0_89 = arith.constant 0 : index
    %76 = vector.load %arg9[%c0_87, %c15_88, %c0_89] : memref<18x18x4xf32, #tpu.memory_space<vmem>>, vector<18x1x4xf32>
    %c0_90 = arith.constant 0 : index
    %c17_91 = arith.constant 17 : index
    %c0_92 = arith.constant 0 : index
    %77 = vector.load %arg9[%c0_90, %c17_91, %c0_92] : memref<18x18x4xf32, #tpu.memory_space<vmem>>, vector<18x1x4xf32>
    tpu.vector_store %arg9[%c0_90, %c17_91, %c0_92], %76 {strides = array<i32>} : memref<18x18x4xf32, #tpu.memory_space<vmem>>, vector<18x1x4xf32>,
    %c0_93 = arith.constant 0 : index
    %c0_94 = arith.constant 0 : index
    %c0_95 = arith.constant 0 : index
    %78 = vector.load %arg9[%c0_93, %c0_94, %c0_95] : memref<18x18x4xf32, #tpu.memory_space<vmem>>, vector<16x16x4xf32>
    %79 = vector.shape_cast %78 : vector<16x16x4xf32> to vector<256x4xf32>
    %c0_96 = arith.constant 0 : index
    %c0_97 = arith.constant 0 : index
    %80 = vector.load %arg10[%c0_96, %c0_97] : memref<256x36xf32, #tpu.memory_space<vmem>>, vector<256x4xf32>
    tpu.vector_store %arg10[%c0_96, %c0_97], %79 {strides = array<i32>} : memref<256x36xf32, #tpu.memory_space<vmem>>, vector<256x4xf32>,
    %c0_98 = arith.constant 0 : index
    %c1_99 = arith.constant 1 : index
    %c0_100 = arith.constant 0 : index
    %81 = vector.load %arg9[%c0_98, %c1_99, %c0_100] : memref<18x18x4xf32, #tpu.memory_space<vmem>>, vector<16x16x4xf32>
    %82 = vector.shape_cast %81 : vector<16x16x4xf32> to vector<256x4xf32>
    %c0_101 = arith.constant 0 : index
    %c4_102 = arith.constant 4 : index
    %83 = vector.load %arg10[%c0_101, %c4_102] : memref<256x36xf32, #tpu.memory_space<vmem>>, vector<256x4xf32>
    tpu.vector_store %arg10[%c0_101, %c4_102], %82 {strides = array<i32>} : memref<256x36xf32, #tpu.memory_space<vmem>>, vector<256x4xf32>,
    %c0_103 = arith.constant 0 : index
    %c2_104 = arith.constant 2 : index
    %c0_105 = arith.constant 0 : index
    %84 = vector.load %arg9[%c0_103, %c2_104, %c0_105] : memref<18x18x4xf32, #tpu.memory_space<vmem>>, vector<16x16x4xf32>
    %85 = vector.shape_cast %84 : vector<16x16x4xf32> to vector<256x4xf32>
    %c0_106 = arith.constant 0 : index
    %c8_107 = arith.constant 8 : index
    %86 = vector.load %arg10[%c0_106, %c8_107] : memref<256x36xf32, #tpu.memory_space<vmem>>, vector<256x4xf32>
    tpu.vector_store %arg10[%c0_106, %c8_107], %85 {strides = array<i32>} : memref<256x36xf32, #tpu.memory_space<vmem>>, vector<256x4xf32>,
    %c1_108 = arith.constant 1 : index
    %c0_109 = arith.constant 0 : index
    %c0_110 = arith.constant 0 : index
    %87 = vector.load %arg9[%c1_108, %c0_109, %c0_110] : memref<18x18x4xf32, #tpu.memory_space<vmem>>, vector<16x16x4xf32>
    %88 = vector.shape_cast %87 : vector<16x16x4xf32> to vector<256x4xf32>
    %c0_111 = arith.constant 0 : index
    %c12_112 = arith.constant 12 : index
    %89 = vector.load %arg10[%c0_111, %c12_112] : memref<256x36xf32, #tpu.memory_space<vmem>>, vector<256x4xf32>
    tpu.vector_store %arg10[%c0_111, %c12_112], %88 {strides = array<i32>} : memref<256x36xf32, #tpu.memory_space<vmem>>, vector<256x4xf32>,
    %c1_113 = arith.constant 1 : index
    %c1_114 = arith.constant 1 : index
    %c0_115 = arith.constant 0 : index
    %90 = vector.load %arg9[%c1_113, %c1_114, %c0_115] : memref<18x18x4xf32, #tpu.memory_space<vmem>>, vector<16x16x4xf32>
    %91 = vector.shape_cast %90 : vector<16x16x4xf32> to vector<256x4xf32>
    %c0_116 = arith.constant 0 : index
    %c16_117 = arith.constant 16 : index
    %92 = vector.load %arg10[%c0_116, %c16_117] : memref<256x36xf32, #tpu.memory_space<vmem>>, vector<256x4xf32>
    tpu.vector_store %arg10[%c0_116, %c16_117], %91 {strides = array<i32>} : memref<256x36xf32, #tpu.memory_space<vmem>>, vector<256x4xf32>,
    %c1_118 = arith.constant 1 : index
    %c2_119 = arith.constant 2 : index
    %c0_120 = arith.constant 0 : index
    %93 = vector.load %arg9[%c1_118, %c2_119, %c0_120] : memref<18x18x4xf32, #tpu.memory_space<vmem>>, vector<16x16x4xf32>
    %94 = vector.shape_cast %93 : vector<16x16x4xf32> to vector<256x4xf32>
    %c0_121 = arith.constant 0 : index
    %c20_122 = arith.constant 20 : index
    %95 = vector.load %arg10[%c0_121, %c20_122] : memref<256x36xf32, #tpu.memory_space<vmem>>, vector<256x4xf32>
    tpu.vector_store %arg10[%c0_121, %c20_122], %94 {strides = array<i32>} : memref<256x36xf32, #tpu.memory_space<vmem>>, vector<256x4xf32>,
    %c2_123 = arith.constant 2 : index
    %c0_124 = arith.constant 0 : index
    %c0_125 = arith.constant 0 : index
    %96 = vector.load %arg9[%c2_123, %c0_124, %c0_125] : memref<18x18x4xf32, #tpu.memory_space<vmem>>, vector<16x16x4xf32>
    %97 = vector.shape_cast %96 : vector<16x16x4xf32> to vector<256x4xf32>
    %c0_126 = arith.constant 0 : index
    %c24_127 = arith.constant 24 : index
    %98 = vector.load %arg10[%c0_126, %c24_127] : memref<256x36xf32, #tpu.memory_space<vmem>>, vector<256x4xf32>
    tpu.vector_store %arg10[%c0_126, %c24_127], %97 {strides = array<i32>} : memref<256x36xf32, #tpu.memory_space<vmem>>, vector<256x4xf32>,
    %c2_128 = arith.constant 2 : index
    %c1_129 = arith.constant 1 : index
    %c0_130 = arith.constant 0 : index
    %99 = vector.load %arg9[%c2_128, %c1_129, %c0_130] : memref<18x18x4xf32, #tpu.memory_space<vmem>>, vector<16x16x4xf32>
    %100 = vector.shape_cast %99 : vector<16x16x4xf32> to vector<256x4xf32>
    %c0_131 = arith.constant 0 : index
    %c28_132 = arith.constant 28 : index
    %101 = vector.load %arg10[%c0_131, %c28_132] : memref<256x36xf32, #tpu.memory_space<vmem>>, vector<256x4xf32>
    tpu.vector_store %arg10[%c0_131, %c28_132], %100 {strides = array<i32>} : memref<256x36xf32, #tpu.memory_space<vmem>>, vector<256x4xf32>,
    %c2_133 = arith.constant 2 : index
    %c2_134 = arith.constant 2 : index
    %c0_135 = arith.constant 0 : index
    %102 = vector.load %arg9[%c2_133, %c2_134, %c0_135] : memref<18x18x4xf32, #tpu.memory_space<vmem>>, vector<16x16x4xf32>
    %103 = vector.shape_cast %102 : vector<16x16x4xf32> to vector<256x4xf32>
    %c0_136 = arith.constant 0 : index
    %c32_137 = arith.constant 32 : index
    %104 = vector.load %arg10[%c0_136, %c32_137] : memref<256x36xf32, #tpu.memory_space<vmem>>, vector<256x4xf32>
    tpu.vector_store %arg10[%c0_136, %c32_137], %103 {strides = array<i32>} : memref<256x36xf32, #tpu.memory_space<vmem>>, vector<256x4xf32>,
    %c0_138 = arith.constant 0 : index
    %c0_139 = arith.constant 0 : index
    %105 = vector.load %arg10[%c0_138, %c0_139] : memref<256x36xf32, #tpu.memory_space<vmem>>, vector<256x36xf32>
    %c0_140 = arith.constant 0 : index
    %c0_141 = arith.constant 0 : index
    %106 = vector.load %arg5[%c0_140, %c0_141] : memref<36x4xf32, #tpu.memory_space<vmem>>, vector<36x4xf32>
    %cst_142 = arith.constant dense<0.000000e+00> : vector<256x4xf32>
    %107 = tpu.matmul %105, %106, %cst_142 {dimension_numbers = #tpu.dot_dimension_numbers<[1], [0], [0], [1], [0, 0, 1, 1], [], []>} : vector<256x36xf32>, vector<36x4xf32>, vector<256x4xf32> -> vector<256x4xf32>
    %cst_143 = arith.constant dense<0.000000e+00> : vector<4xf32>
    %108 = vector.multi_reduction <add>, %107, %cst_143 [0] : vector<256x4xf32> to vector<4xf32>
    %109 = vector.shape_cast %108 : vector<4xf32> to vector<1x4xf32>
    %110 = arith.mulf %107, %107 : vector<256x4xf32>
    %cst_144 = arith.constant dense<0.000000e+00> : vector<4xf32>
    %111 = vector.multi_reduction <add>, %110, %cst_144 [0] : vector<256x4xf32> to vector<4xf32>
    %112 = vector.shape_cast %111 : vector<4xf32> to vector<1x4xf32>
    %cst_145 = arith.constant 3.906250e-03 : f32
    %113 = vector.broadcast %cst_145 : f32 to vector<1x4xf32>
    %114 = arith.mulf %109, %113 : vector<1x4xf32>
    %cst_146 = arith.constant 3.906250e-03 : f32
    %115 = vector.broadcast %cst_146 : f32 to vector<1x4xf32>
    %116 = arith.mulf %112, %115 : vector<1x4xf32>
    %117 = arith.mulf %114, %114 : vector<1x4xf32>
    %118 = arith.subf %116, %117 : vector<1x4xf32>
    %cst_147 = arith.constant 0.000000e+00 : f32
    %119 = vector.broadcast %cst_147 : f32 to vector<1x4xf32>
    %120 = arith.maximumf %118, %119 : vector<1x4xf32>
    %c0_148 = arith.constant 0 : index
    %c0_149 = arith.constant 0 : index
    %121 = vector.load %arg6[%c0_148, %c0_149] : memref<1x4xf32, #tpu.memory_space<vmem>>, vector<1x4xf32>
    %cst_150 = arith.constant 9.99999974E-6 : f32
    %122 = vector.broadcast %cst_150 : f32 to vector<1x4xf32>
    %123 = arith.addf %120, %122 : vector<1x4xf32>
    %124 = math.rsqrt %123 : vector<1x4xf32>
    %125 = arith.mulf %121, %124 : vector<1x4xf32>
    %c0_151 = arith.constant 0 : index
    %c0_152 = arith.constant 0 : index
    %126 = vector.load %arg7[%c0_151, %c0_152] : memref<1x4xf32, #tpu.memory_space<vmem>>, vector<1x4xf32>
    %127 = arith.mulf %114, %125 : vector<1x4xf32>
    %128 = arith.subf %126, %127 : vector<1x4xf32>
    %129 = vector.broadcast %125 : vector<1x4xf32> to vector<256x4xf32>
    %130 = arith.mulf %107, %129 : vector<256x4xf32>
    %131 = vector.broadcast %128 : vector<1x4xf32> to vector<256x4xf32>
    %132 = arith.addf %130, %131 : vector<256x4xf32>
    %133 = vector.shape_cast %1 : vector<16x16x4xf32> to vector<256x4xf32>
    %134 = arith.addf %132, %133 : vector<256x4xf32>
    %cst_153 = arith.constant 0.000000e+00 : f32
    %135 = vector.broadcast %cst_153 : f32 to vector<256x4xf32>
    %136 = arith.maximumf %134, %135 : vector<256x4xf32>
    %137 = vector.shape_cast %136 : vector<256x4xf32> to vector<1x16x16x4xf32>
    %c0_154 = arith.constant 0 : index
    %c0_155 = arith.constant 0 : index
    %c0_156 = arith.constant 0 : index
    %c0_157 = arith.constant 0 : index
    %138 = vector.load %arg8[%c0_154, %c0_155, %c0_156, %c0_157] : memref<1x16x16x4xf32, #tpu.memory_space<vmem>>, vector<1x16x16x4xf32>
    tpu.vector_store %arg8[%c0_154, %c0_155, %c0_156, %c0_157], %137 {strides = array<i32>} : memref<1x16x16x4xf32, #tpu.memory_space<vmem>>, vector<1x16x16x4xf32>,
    return
  }
  func.func @transform_0(%arg0: i32) -> (i32, i32, i32, i32) {
    %c0_i32 = arith.constant 0 : i32
    %c0_i32_0 = arith.constant 0 : i32
    %c0_i32_1 = arith.constant 0 : i32
    %c0_i32_2 = arith.constant 0 : i32
    return %arg0, %c0_i32, %c0_i32_0, %c0_i32_1 : i32, i32, i32, i32
  }
  func.func @transform_1(%arg0: i32) -> (i32, i32) {
    %c0_i32 = arith.constant 0 : i32
    %c0_i32_0 = arith.constant 0 : i32
    %c0_i32_1 = arith.constant 0 : i32
    return %c0_i32, %c0_i32_0 : i32, i32
  }
  func.func @transform_2(%arg0: i32) -> (i32, i32) {
    %c0_i32 = arith.constant 0 : i32
    %c0_i32_0 = arith.constant 0 : i32
    %c0_i32_1 = arith.constant 0 : i32
    return %c0_i32, %c0_i32_0 : i32, i32
  }
  func.func @transform_3(%arg0: i32) -> (i32, i32) {
    %c0_i32 = arith.constant 0 : i32
    %c0_i32_0 = arith.constant 0 : i32
    %c0_i32_1 = arith.constant 0 : i32
    return %c0_i32, %c0_i32_0 : i32, i32
  }
  func.func @transform_4(%arg0: i32) -> (i32, i32) {
    %c0_i32 = arith.constant 0 : i32
    %c0_i32_0 = arith.constant 0 : i32
    %c0_i32_1 = arith.constant 0 : i32
    return %c0_i32, %c0_i32_0 : i32, i32
  }
  func.func @transform_5(%arg0: i32) -> (i32, i32) {
    %c0_i32 = arith.constant 0 : i32
    %c0_i32_0 = arith.constant 0 : i32
    %c0_i32_1 = arith.constant 0 : i32
    return %c0_i32, %c0_i32_0 : i32, i32
  }
  func.func @transform_6(%arg0: i32) -> (i32, i32) {
    %c0_i32 = arith.constant 0 : i32
    %c0_i32_0 = arith.constant 0 : i32
    %c0_i32_1 = arith.constant 0 : i32
    return %c0_i32, %c0_i32_0 : i32, i32
  }
  func.func @transform_7(%arg0: i32) -> (i32, i32, i32, i32) {
    %c0_i32 = arith.constant 0 : i32
    %c0_i32_0 = arith.constant 0 : i32
    %c0_i32_1 = arith.constant 0 : i32
    %c0_i32_2 = arith.constant 0 : i32
    return %arg0, %c0_i32, %c0_i32_0, %c0_i32_1 : i32, i32, i32, i32
  }
}

</mosaic_0001>

<bundles_post_ra>
// kernel: tpu_custom_call.1
= control target key start
LH: loop header
LB: loop body
LE: loop exit
PB: predicated region body
PF: predicated region fallthrough
CT: control target
= control target key end

     0   :  { %s5524_s24 = smov 0   ;;  %s8255_s0 = inlined_call_operand.vmem [shape: f32[2,16,16,4], index: 0, kind: input, shape index: {}]   ;;  %s8256_s1 = inlined_call_operand.vmem [shape: f32[36,4], index: 1, kind: input, shape index: {}]   ;;  %s8257_s2 = inlined_call_operand.vmem [shape: f32[1,4], index: 2, kind: input, shape index: {}]   ;;  %s8258_s3 = inlined_call_operand.vmem [shape: f32[1,4], index: 3, kind: input, shape index: {}]   ;;  %s8259_s4 = inlined_call_operand.vmem [shape: f32[36,4], index: 4, kind: input, shape index: {}]   ;;  %s8260_s5 = inlined_call_operand.vmem [shape: f32[1,4], index: 5, kind: input, shape index: {}]   ;;  %s8261_s6 = inlined_call_operand.vmem [shape: f32[1,4], index: 6, kind: input, shape index: {}]   ;;  %s8262_s7 = inlined_call_operand.vmem [shape: f32[2,16,16,4], index: 7, kind: output, shape index: {}]  }
   0x1 LB: > { %s5163_s25 = sadd.s32 4294967295, %s5474_s24   ;;  %p5167_p0 = scmp.ge.s32.totalorder %s5474_s24, 1  ;;  %s5474_s24 = sphi %s5524_s24, %s17_s24  }
   0x2   : > { %p237_p1 = scmp.lt.s32.totalorder %s5474_s24, 3 }
   0x4   : > { %p238_p2 = pnand %p5167_p0, %p237_p1 }
   0x6   : > { %241 = sbr.rel (%p238_p2) target bundleno = 1877 (0x755), region = 48 }
   0xd   : > { %p269_p3 = scmp.lt.s32.totalorder %s5163_s25, 1  ;;  %vm312_vm0 = vcmask 31744   ;;  %s5476_s30 = smov 4   ;;  %vm368_vm1 = vcmask 24576   ;;  %vm647_vm2 = vcmask 64544   ;;  %vm840_vm3 = vcmask 97344  }
   0xe   : > { %s5477_s8 = smov 8   ;;  %s5478_s9 = smov 12   ;;  %vm2166_vm4 = vcmask 1043456   ;;  %vm1033_vm5 = vcmask 130144   ;;  %vm1226_vm6 = vcmask 162944   ;;  %vm1419_vm7 = vcmask 195744  }
   0xf   : > { %s8360_s25 = smov (!%p269_p3, %s5163_s25), 1  ;;  %s5479_s10 = smov 16   ;;  %vm1613_vm8 = vcmask 228544   ;;  %vm1806_vm9 = vcmask 261344   ;;  %vm1999_vm10 = vcmask 294144   ;;  %vm2069_vm11 = vcmask 293888  }
  0x10   : > { %s5240_s26 = sshll.u32 %s8360_s25, 8  ;;  %s5480_s15 = smov 20  }
  0x11   : > { %s5540_s29 = scalar_lea.vmem %s8255_s0, %s5240_s26  ;;  %s5481_s20 = smov 24  }
  0x12   : > { %v5543_v0 = vld [vmem:[%s5540_s29 + $0x10] sm:$0xff]  ;;  %v5546_v1 = vld [vmem:[%s5540_s29] sm:$0xff]  ;;  %v5549_v2 = vld [vmem:[%s5540_s29 + $0x18] sm:$0xff]  ;;  %s5482_s21 = smov 28   ;;  %s5483_s27 = smov 32  }
  0x13   : > { %8295 = vst [vmem:[#allocation4_spill] sm:$0xff] %v5543_v0  ;;  %8296 = vst [vmem:[#allocation5_spill] sm:$0xff] %v5546_v1  ;;  %v5562_v3 = vld [vmem:[%s5540_s29 + $0x8] sm:$0xff]  ;;  %v5565_v4 = vld [vmem:[%s5540_s29 + $0x20] sm:$0xff] }
  0x14   : > { %8297 = vst [vmem:[#allocation6_spill] sm:$0xff] %v5549_v2  ;;  %345 = vst.msk [vmem:[#allocation2 + $0x1] sm:$0xff] %vm312_vm0, %v5543_v0  ;;  %v5568_v5 = vld [vmem:[%s5540_s29 + $0x28] sm:$0xff]  ;;  %v5577_v6 = vld [vmem:[%s5540_s29 + $0x30] sm:$0xff] }
  0x15   : > { %315 = vst.msk [vmem:[#allocation2 + $0x31] sm:$0xff] %vm312_vm0, %v5543_v0  ;;  %313 = vst.msk [vmem:[#allocation2 + $0x19] sm:$0xff] %vm312_vm0, %v5546_v1  ;;  %v5580_v7 = vld [vmem:[%s5540_s29 + $0x38] sm:$0xff]  ;;  %v5583_v8 = vld [vmem:[%s5540_s29 + $0x40] sm:$0xff] }
  0x16   : > { %346 = vst.msk [vmem:[#allocation2 + $0x9] sm:$0xff] %vm312_vm0, %v5549_v2  ;;  %316 = vst.msk [vmem:[#allocation2 + $0x39] sm:$0xff] %vm312_vm0, %v5549_v2  ;;  %v5592_v9 = vld [vmem:[%s5540_s29 + $0x48] sm:$0xff]  ;;  %v5595_v10 = vld [vmem:[%s5540_s29 + $0x50] sm:$0xff] }
  0x17   : > { %8298 = vst [vmem:[#allocation7_spill] sm:$0xff] %v5562_v3  ;;  %8299 = vst [vmem:[#allocation8_spill] sm:$0xff] %v5565_v4  ;;  %v5598_v11 = vld [vmem:[%s5540_s29 + $0x58] sm:$0xff]  ;;  %v5607_v12 = vld [vmem:[%s5540_s29 + $0x60] sm:$0xff] }
  0x18   : > { %8300 = vst [vmem:[#allocation9_spill] sm:$0xff] %v5568_v5  ;;  %314 = vst.msk [vmem:[#allocation2 + $0x21] sm:$0xff] %vm312_vm0, %v5562_v3  ;;  %v5610_v13 = vld [vmem:[%s5540_s29 + $0x68] sm:$0xff]  ;;  %v5613_v14 = vld [vmem:[%s5540_s29 + $0x70] sm:$0xff] }
  0x19   : > { %317 = vst.msk [vmem:[#allocation2 + $0x49] sm:$0xff] %vm312_vm0, %v5565_v4  ;;  %318 = vst.msk [vmem:[#allocation2 + $0x51] sm:$0xff] %vm312_vm0, %v5568_v5  ;;  %v5622_v15 = vld [vmem:[%s5540_s29 + $0x78] sm:$0xff]  ;;  %v5625_v16 = vld [vmem:[%s5540_s29 + $0x80] sm:$0xff] }
  0x1a   : > { %8301 = vst [vmem:[#allocation10_spill] sm:$0xff] %v5577_v6  ;;  %8302 = vst [vmem:[#allocation11_spill] sm:$0xff] %v5580_v7  ;;  %v5628_v17 = vld [vmem:[%s5540_s29 + $0x88] sm:$0xff]  ;;  %v5637_v18 = vld [vmem:[%s5540_s29 + $0x90] sm:$0xff] }
  0x1b   : > { %8303 = vst [vmem:[#allocation12_spill] sm:$0xff] %v5583_v8  ;;  %319 = vst.msk [vmem:[#allocation2 + $0x61] sm:$0xff] %vm312_vm0, %v5577_v6  ;;  %v5640_v19 = vld [vmem:[%s5540_s29 + $0x98] sm:$0xff]  ;;  %v5643_v20 = vld [vmem:[%s5540_s29 + $0xa0] sm:$0xff] }
  0x1c   : > { %320 = vst.msk [vmem:[#allocation2 + $0x69] sm:$0xff] %vm312_vm0, %v5580_v7  ;;  %321 = vst.msk [vmem:[#allocation2 + $0x79] sm:$0xff] %vm312_vm0, %v5583_v8  ;;  %v5652_v21 = vld [vmem:[%s5540_s29 + $0xa8] sm:$0xff]  ;;  %v5655_v22 = vld [vmem:[%s5540_s29 + $0xb0] sm:$0xff] }
  0x1d   : > { %8304 = vst [vmem:[#allocation13_spill] sm:$0xff] %v5592_v9  ;;  %8305 = vst [vmem:[#allocation14_spill] sm:$0xff] %v5595_v10  ;;  %v5658_v23 = vld [vmem:[%s5540_s29 + $0xb8] sm:$0xff]  ;;  %v487_v24 = vld [vmem:[#allocation2 + $0x1] sm:$0xff] }
  0x1e   : > { %8306 = vst [vmem:[#allocation15_spill] sm:$0xff] %v5598_v11  ;;  %322 = vst.msk [vmem:[#allocation2 + $0x81] sm:$0xff] %vm312_vm0, %v5592_v9  ;;  %v5660_v25 = vld [vmem:[#allocation2 + $0x19] sm:$0xff]  ;;  %551 = vrot.lane.b32.xlu0 %v487_v24, %s5476_s30  ;;  %v488_v26 = vld [vmem:[#allocation2 + $0x9] sm:$0xff] }
  0x1f   : > { %323 = vst.msk [vmem:[#allocation2 + $0x91] sm:$0xff] %vm312_vm0, %v5595_v10  ;;  %324 = vst.msk [vmem:[#allocation2 + $0x99] sm:$0xff] %vm312_vm0, %v5598_v11  ;;  %555 = vrot.lane.b32.xlu1 %v5660_v25, %s5476_s30  ;;  %v5671_v27 = vld [vmem:[#allocation2 + $0x21] sm:$0xff]  ;;  %v5676_v28 = vld [vmem:[#allocation2 + $0x31] sm:$0xff] }
  0x20   : > { %8307 = vst [vmem:[#allocation16_spill] sm:$0xff] %v5607_v12  ;;  %8308 = vst [vmem:[#allocation17_spill] sm:$0xff] %v5610_v13  ;;  %v5678_v29 = vld [vmem:[#allocation2 + $0x39] sm:$0xff]  ;;  %v5680_v30 = vld [vmem:[#allocation2 + $0x49] sm:$0xff] }
  0x21   : > { %8309 = vst [vmem:[#allocation18_spill] sm:$0xff] %v5613_v14  ;;  %325 = vst.msk [vmem:[#allocation2 + $0xa9] sm:$0xff] %vm312_vm0, %v5607_v12  ;;  %v5683_v31 = vld [vmem:[%s5540_s29 + $0xc0] sm:$0xff]  ;;  %v5689_v32 = vld [vmem:[#allocation2 + $0x51] sm:$0xff] }
  0x22   : > { %326 = vst.msk [vmem:[#allocation2 + $0xb1] sm:$0xff] %vm312_vm0, %v5610_v13  ;;  %327 = vst.msk [vmem:[#allocation2 + $0xc1] sm:$0xff] %vm312_vm0, %v5613_v14  ;;  %553 = vrot.lane.b32.xlu0 %v488_v26, %s5476_s30  ;;  %v5694_v33 = vld [vmem:[%s5540_s29 + $0xc8] sm:$0xff]  ;;  %v5697_v34 = vld [vmem:[%s5540_s29 + $0xd0] sm:$0xff] }
  0x23   : > { %8310 = vst [vmem:[#allocation19_spill] sm:$0xff] %v5622_v15  ;;  %8311 = vst [vmem:[#allocation20_spill] sm:$0xff] %v5625_v16  ;;  %557 = vrot.lane.b32.xlu1 %v5671_v27, %s5476_s30  ;;  %v5704_v35 = vld [vmem:[%s5540_s29 + $0xd8] sm:$0xff]  ;;  %v5707_v36 = vld [vmem:[%s5540_s29 + $0xe0] sm:$0xff] }
  0x24   : > { %8312 = vst [vmem:[#allocation21_spill] sm:$0xff] %v5628_v17  ;;  %328 = vst.msk [vmem:[#allocation2 + $0xc9] sm:$0xff] %vm312_vm0, %v5622_v15  ;;  %v5710_v37 = vld [vmem:[%s5540_s29 + $0xe8] sm:$0xff]  ;;  %v388_v39 = vld [vmem:[#allocation2 + $0x27] sm:$0x1] }
  0x25   : > { %329 = vst.msk [vmem:[#allocation2 + $0xd9] sm:$0xff] %vm312_vm0, %v5625_v16  ;;  %330 = vst.msk [vmem:[#allocation2 + $0xe1] sm:$0xff] %vm312_vm0, %v5628_v17  ;;  %v387_v38 = vld [vmem:[#allocation2 + $0xf] sm:$0x1]  ;;  %v389_v40 = vld [vmem:[#allocation2 + $0x3f] sm:$0x1] }
  0x26   : > { %8313 = vst [vmem:[#allocation22_spill] sm:$0xff] %v5637_v18  ;;  %8314 = vst [vmem:[#allocation23_spill] sm:$0xff] %v5640_v19  ;;  %559 = vrot.lane.b32.xlu0 %v5676_v28, %s5476_s30  ;;  %v390_v41 = vld [vmem:[#allocation2 + $0x57] sm:$0x1]  ;;  %v391_v42 = vld [vmem:[#allocation2 + $0x6f] sm:$0x1] }
  0x27   : > { %8315 = vst [vmem:[#allocation24_spill] sm:$0xff] %v5643_v20  ;;  %331 = vst.msk [vmem:[#allocation2 + $0xf1] sm:$0xff] %vm312_vm0, %v5637_v18  ;;  %561 = vrot.lane.b32.xlu1 %v5678_v29, %s5476_s30  ;;  %v5729_v43 = vld [vmem:[#allocation2 + $0x61] sm:$0xff]  ;;  %v5731_v44 = vld [vmem:[#allocation2 + $0x69] sm:$0xff] }
  0x28   : > { %332 = vst.msk [vmem:[#allocation2 + $0xf9] sm:$0xff] %vm312_vm0, %v5640_v19  ;;  %333 = vst.msk [vmem:[#allocation2 + $0x109] sm:$0xff] %vm312_vm0, %v5643_v20  ;;  %v392_v45 = vld [vmem:[#allocation2 + $0x87] sm:$0x1]  ;;  %v393_v46 = vld [vmem:[#allocation2 + $0x9f] sm:$0x1] }
  0x29   : > { %8316 = vst [vmem:[#allocation25_spill] sm:$0xff] %v5652_v21  ;;  %8317 = vst [vmem:[#allocation26_spill] sm:$0xff] %v5655_v22  ;;  %v394_v47 = vld [vmem:[#allocation2 + $0xb7] sm:$0x1]  ;;  %v5743_v49 = vld [vmem:[#allocation2 + $0x79] sm:$0xff] }
  0x2a   : > { %8318 = vst [vmem:[#allocation27_spill] sm:$0xff] %v5658_v23  ;;  %334 = vst.msk [vmem:[#allocation2 + $0x111] sm:$0xff] %vm312_vm0, %v5652_v21  ;;  %563 = vrot.lane.b32.xlu0 %v5680_v30, %s5476_s30  ;;  %v5745_v50 = vld [vmem:[#allocation2 + $0x81] sm:$0xff]  ;;  %v5753_v53 = vld [vmem:[#allocation2 + $0x91] sm:$0xff] }
  0x2b   : > { %335 = vst.msk [vmem:[#allocation2 + $0x121] sm:$0xff] %vm312_vm0, %v5655_v22  ;;  %336 = vst.msk [vmem:[#allocation2 + $0x129] sm:$0xff] %vm312_vm0, %v5658_v23  ;;  %565 = vrot.lane.b32.xlu1 %v5689_v32, %s5476_s30  ;;  %v395_v48 = vld [vmem:[#allocation2 + $0xcf] sm:$0x1]  ;;  %v5755_v54 = vld [vmem:[#allocation2 + $0x99] sm:$0xff] }
  0x2c   : > { %8319 = vst [vmem:[#allocation28_spill] sm:$0xff] %v5683_v31  ;;  %337 = vst.msk [vmem:[#allocation2 + $0x139] sm:$0xff] %vm312_vm0, %v5683_v31  ;;  %v396_v51 = vld [vmem:[#allocation2 + $0xe7] sm:$0x1]  ;;  %v350_v57 = vld [vmem:[#allocation2 + $0x2] sm:$0x1] }
  0x2d   : > { %8320 = vst [vmem:[#allocation29_spill] sm:$0xff] %v5694_v33  ;;  %8321 = vst [vmem:[#allocation30_spill] sm:$0xff] %v5697_v34  ;;  %v351_v58 = vld [vmem:[#allocation2 + $0x1a] sm:$0x1]  ;;  %v5763_v59 = vld [vmem:[#allocation2 + $0xa9] sm:$0xff] }
  0x2e   : > { %338 = vst.msk [vmem:[#allocation2 + $0x141] sm:$0xff] %vm312_vm0, %v5694_v33  ;;  %339 = vst.msk [vmem:[#allocation2 + $0x151] sm:$0xff] %vm312_vm0, %v5697_v34  ;;  %567 = vrot.lane.b32.xlu0 %v5729_v43, %s5476_s30  ;;  %v424_v61 = vld [vmem:[#allocation2 + $0x8] sm:$0xff]  ;;  %v502_v62 = vld [vmem:[#allocation2 + $0xb1] sm:$0xff] }
  0x2f   : > { %8322 = vst [vmem:[#allocation31_spill] sm:$0xff] %v5704_v35  ;;  %8323 = vst [vmem:[#allocation32_spill] sm:$0xff] %v5707_v36  ;;  %569 = vrot.lane.b32.xlu1 %v5731_v44, %s5476_s30  ;;  %v397_v52 = vld [vmem:[#allocation2 + $0xff] sm:$0x1]  ;;  %v5769_v63 = vld [vmem:[#allocation2 + $0x20] sm:$0xff] }
  0x30   : > { %8324 = vst [vmem:[#allocation33_spill] sm:$0xff] %v5710_v37  ;;  %340 = vst.msk [vmem:[#allocation2 + $0x159] sm:$0xff] %vm312_vm0, %v5704_v35  ;;  %v352_v26 = vld [vmem:[#allocation2 + $0x32] sm:$0x1]  ;;  %v509_v33 = vld [vmem:[#allocation2 + $0x109] sm:$0xff] }
  0x31   : > { %341 = vst.msk [vmem:[#allocation2 + $0x169] sm:$0xff] %vm312_vm0, %v5707_v36  ;;  %348 = vst.msk [vmem:[#allocation2 + $0x199] sm:$0xff] %vm312_vm0, %v5707_v36  ;;  %v398_v55 = vld [vmem:[#allocation2 + $0x117] sm:$0x1]  ;;  %v5925_v16 = vld [vmem:[%s5540_s29 + $0xf8] sm:$0xff] }
  0x32   : > { %342 = vst.msk [vmem:[#allocation2 + $0x171] sm:$0xff] %vm312_vm0, %v5710_v37  ;;  %349 = vst.msk [vmem:[#allocation2 + $0x1a1] sm:$0xff] %vm312_vm0, %v5710_v37  ;;  %571 = vrot.lane.b32.xlu0 %v5743_v49, %s5476_s30  ;;  %v399_v56 = vld [vmem:[#allocation2 + $0x12f] sm:$0x1]  ;;  %v511_v22 = vld [vmem:[#allocation2 + $0x121] sm:$0xff] }
  0x33   : > { %405 = vst.msk [vmem:[#allocation2 + $0x11] sm:$0x1] %vm368_vm1, %v387_v38  ;;  %406 = vst.msk [vmem:[#allocation2 + $0x29] sm:$0x1] %vm368_vm1, %v388_v39  ;;  %573 = vrot.lane.b32.xlu1 %v5745_v50, %s5476_s30  ;;  %v5774_v38 = vld [vmem:[#allocation2 + $0x38] sm:$0xff]  ;;  %v503_v39 = vld [vmem:[#allocation2 + $0xc1] sm:$0xff] }
  0x34   : > { %407 = vst.msk [vmem:[#allocation2 + $0x41] sm:$0x1] %vm368_vm1, %v389_v40  ;;  %408 = vst.msk [vmem:[#allocation2 + $0x59] sm:$0x1] %vm368_vm1, %v390_v41  ;;  %v353_v41 = vld [vmem:[#allocation2 + $0x4a] sm:$0x1] }
  0x35   : > { %409 = vst.msk [vmem:[#allocation2 + $0x71] sm:$0x1] %vm368_vm1, %v391_v42  ;;  %410 = vst.msk [vmem:[#allocation2 + $0x89] sm:$0x1] %vm368_vm1, %v392_v45  ;;  %v400_v60 = vld [vmem:[#allocation2 + $0x147] sm:$0x1] }
  0x36   : > { %411 = vst.msk [vmem:[#allocation2 + $0xa1] sm:$0x1] %vm368_vm1, %v393_v46  ;;  %412 = vst.msk [vmem:[#allocation2 + $0xb9] sm:$0x1] %vm368_vm1, %v394_v47  ;;  %575 = vrot.lane.b32.xlu0 %v5753_v53, %s5476_s30  ;;  %v5783_v42 = vld [vmem:[#allocation2 + $0x50] sm:$0xff]  ;;  %v5789_v47 = vld [vmem:[#allocation2 + $0x68] sm:$0xff] }
  0x37   : > { %413 = vst.msk [vmem:[#allocation2 + $0xd1] sm:$0x1] %vm368_vm1, %v395_v48  ;;  %414 = vst.msk [vmem:[#allocation2 + $0xe9] sm:$0x1] %vm368_vm1, %v396_v51  ;;  %577 = vrot.lane.b32.xlu1 %v5755_v54, %s5476_s30  ;;  %v401_v24 = vld [vmem:[#allocation2 + $0x15f] sm:$0x1] }
  0x38   : > { %415 = vst.msk [vmem:[#allocation2 + $0x101] sm:$0x1] %vm368_vm1, %v397_v52  ;;  %416 = vst.msk [vmem:[#allocation2 + $0x119] sm:$0x1] %vm368_vm1, %v398_v55  ;;  %v354_v45 = vld [vmem:[#allocation2 + $0x62] sm:$0x1] }
  0x39   : > { %417 = vst.msk [vmem:[#allocation2 + $0x131] sm:$0x1] %vm368_vm1, %v399_v56  ;;  %369 = vst.msk [vmem:[#allocation2] sm:$0x1] %vm368_vm1, %v350_v57  ;;  %v402_v40 = vld [vmem:[#allocation2 + $0x177] sm:$0x1] }
  0x3a   : > { %370 = vst.msk [vmem:[#allocation2 + $0x18] sm:$0x1] %vm368_vm1, %v351_v58  ;;  %418 = vst.msk [vmem:[#allocation2 + $0x149] sm:$0x1] %vm368_vm1, %v400_v60  ;;  %579 = vrot.lane.b32.xlu0 %v5763_v59, %s5476_s30  ;;  %v504_v46 = vld [vmem:[#allocation2 + $0xc9] sm:$0xff]  ;;  %v5794_v51 = vld [vmem:[#allocation2 + $0x80] sm:$0xff] }
  0x3b   : > { %456 = vst.msk [vmem:[#allocation3 + $0x8] sm:$0xff] %vm312_vm0, %v424_v61  ;;  %458 = vst.msk [vmem:[#allocation3 + $0x18] sm:$0xff] %vm312_vm0, %v5769_v63  ;;  %581 = vrot.lane.b32.xlu1 %v502_v62, %s5476_s30  ;;  %v355_v48 = vld [vmem:[#allocation2 + $0x7a] sm:$0x1]  ;;  %v356_v52 = vld [vmem:[#allocation2 + $0x92] sm:$0x1] }
  0x3c   : > { %419 = vst.msk [vmem:[#allocation2 + $0x161] sm:$0x1] %vm368_vm1, %v401_v24  ;;  %371 = vst.msk [vmem:[#allocation2 + $0x30] sm:$0x1] %vm368_vm1, %v352_v26  ;;  %v5801_v57 = vld [vmem:[#allocation2 + $0x98] sm:$0xff]  ;;  %v5810_v61 = vld [vmem:[#allocation2 + $0xb0] sm:$0xff] }
  0x3d   : > { %460 = vst.msk [vmem:[#allocation3 + $0x28] sm:$0xff] %vm312_vm0, %v5774_v38  ;;  %462 = vst.msk [vmem:[#allocation3 + $0x38] sm:$0xff] %vm312_vm0, %v5783_v42  ;;  %v505_v58 = vld [vmem:[#allocation2 + $0xd9] sm:$0xff]  ;;  %v357_v60 = vld [vmem:[#allocation2 + $0xaa] sm:$0x1] }
  0x3e   : > { %420 = vst.msk [vmem:[#allocation2 + $0x179] sm:$0x1] %vm368_vm1, %v402_v40  ;;  %372 = vst.msk [vmem:[#allocation2 + $0x48] sm:$0x1] %vm368_vm1, %v353_v41  ;;  %583 = vrot.lane.b32.xlu0 %v503_v39, %s5476_s30  ;;  %v506_v62 = vld [vmem:[#allocation2 + $0xe1] sm:$0xff]  ;;  %v512_v21 = vld [vmem:[#allocation2 + $0x129] sm:$0xff] }
  0x3f   : > { %373 = vst.msk [vmem:[#allocation2 + $0x60] sm:$0x1] %vm368_vm1, %v354_v45  ;;  %374 = vst.msk [vmem:[#allocation2 + $0x78] sm:$0x1] %vm368_vm1, %v355_v48  ;;  %585 = vrot.lane.b32.xlu1 %v504_v46, %s5476_s30  ;;  %v358_v24 = vld [vmem:[#allocation2 + $0xc2] sm:$0x1] }
  0x40   : > { %464 = vst.msk [vmem:[#allocation3 + $0x48] sm:$0xff] %vm312_vm0, %v5789_v47  ;;  %v423_v55 = vld [vmem:[#allocation2] sm:$0xff]  ;;  %466 = vst.msk [vmem:[#allocation3 + $0x58] sm:$0xff] %vm312_vm0, %v5794_v51  ;;  %v5815_v26 = vld [vmem:[#allocation2 + $0xc8] sm:$0xff] }
  0x41   : > { %v5796_v56 = vld [vmem:[#allocation2 + $0x18] sm:$0xff]  ;;  %375 = vst.msk [vmem:[#allocation2 + $0x90] sm:$0x1] %vm368_vm1, %v356_v52  ;;  %376 = vst.msk [vmem:[#allocation2 + $0xa8] sm:$0x1] %vm368_vm1, %v357_v60  ;;  %v5822_v41 = vld [vmem:[#allocation2 + $0xe0] sm:$0xff] }
  0x42   : > { %455 = vst.msk [vmem:[#allocation3] sm:$0xff] %vm312_vm0, %v423_v55  ;;  %457 = vst.msk [vmem:[#allocation3 + $0x10] sm:$0xff] %vm312_vm0, %v5796_v56  ;;  %v359_v40 = vld [vmem:[#allocation2 + $0xda] sm:$0x1]  ;;  %v507_v45 = vld [vmem:[#allocation2 + $0xf1] sm:$0xff]  ;;  %587 = vrot.lane.b32.xlu0 %v505_v58, %s5476_s30 }
  0x43   : > { %468 = vst.msk [vmem:[#allocation3 + $0x68] sm:$0xff] %vm312_vm0, %v5801_v57  ;;  %470 = vst.msk [vmem:[#allocation3 + $0x78] sm:$0xff] %vm312_vm0, %v5810_v61  ;;  %v5817_v39 = vld [vmem:[#allocation2 + $0x30] sm:$0xff]  ;;  %v508_v46 = vld [vmem:[#allocation2 + $0xf9] sm:$0xff]  ;;  %589 = vrot.lane.b32.xlu1 %v506_v62, %s5476_s30 }
  0x44   : > { %377 = vst.msk [vmem:[#allocation2 + $0xc0] sm:$0x1] %vm368_vm1, %v358_v24  ;;  %378 = vst.msk [vmem:[#allocation2 + $0xd8] sm:$0x1] %vm368_vm1, %v359_v40  ;;  %v360_v48 = vld [vmem:[#allocation2 + $0xf2] sm:$0x1] }
  0x45   : > { %472 = vst.msk [vmem:[#allocation3 + $0x88] sm:$0xff] %vm312_vm0, %v5815_v26  ;;  %459 = vst.msk [vmem:[#allocation3 + $0x20] sm:$0xff] %vm312_vm0, %v5817_v39  ;;  %v5829_v52 = vld [vmem:[#allocation2 + $0xf8] sm:$0xff]  ;;  %v5833_v55 = vld [vmem:[#allocation2 + $0x48] sm:$0xff] }
  0x46   : > { %474 = vst.msk [vmem:[#allocation3 + $0x98] sm:$0xff] %vm312_vm0, %v5822_v41  ;;  %v5835_v60 = vld [vmem:[#allocation2 + $0x60] sm:$0xff]  ;;  %476 = vst.msk [vmem:[#allocation3 + $0xa8] sm:$0xff] %vm312_vm0, %v5829_v52  ;;  %v361_v24 = vld [vmem:[#allocation2 + $0x10a] sm:$0x1]  ;;  %591 = vrot.lane.b32.xlu0 %v507_v45, %s5476_s30 }
  0x47   : > { %379 = vst.msk [vmem:[#allocation2 + $0xf0] sm:$0x1] %vm368_vm1, %v360_v48  ;;  %v5844_v40 = vld [vmem:[#allocation2 + $0x78] sm:$0xff]  ;;  %380 = vst.msk [vmem:[#allocation2 + $0x108] sm:$0x1] %vm368_vm1, %v361_v24  ;;  %v5847_v58 = vld [vmem:[#allocation2 + $0x110] sm:$0xff]  ;;  %593 = vrot.lane.b32.xlu1 %v508_v46, %s5476_s30 }
  0x48   : > { %461 = vst.msk [vmem:[#allocation3 + $0x30] sm:$0xff] %vm312_vm0, %v5833_v55  ;;  %463 = vst.msk [vmem:[#allocation3 + $0x40] sm:$0xff] %vm312_vm0, %v5835_v60  ;;  %v362_v62 = vld [vmem:[#allocation2 + $0x122] sm:$0x1]  ;;  %v5851_v48 = vld [vmem:[#allocation2 + $0x90] sm:$0xff] }
  0x49   : > { %465 = vst.msk [vmem:[#allocation3 + $0x50] sm:$0xff] %vm312_vm0, %v5844_v40  ;;  %478 = vst.msk [vmem:[#allocation3 + $0xb8] sm:$0xff] %vm312_vm0, %v5847_v58  ;;  %v5856_v37 = vld [vmem:[#allocation2 + $0x128] sm:$0xff]  ;;  %v363_v36 = vld [vmem:[#allocation2 + $0x13a] sm:$0x1] }
  0x4a   : > { %381 = vst.msk [vmem:[#allocation2 + $0x120] sm:$0x1] %vm368_vm1, %v362_v62  ;;  %382 = vst.msk [vmem:[#allocation2 + $0x138] sm:$0x1] %vm368_vm1, %v363_v36  ;;  %v5863_v24 = vld [vmem:[#allocation2 + $0x140] sm:$0xff]  ;;  %v5867_v62 = vld [vmem:[#allocation2 + $0xa8] sm:$0xff]  ;;  %595 = vrot.lane.b32.xlu0 %v509_v33, %s5476_s30 }
  0x4b   : > { %467 = vst.msk [vmem:[#allocation3 + $0x60] sm:$0xff] %vm312_vm0, %v5851_v48  ;;  %480 = vst.msk [vmem:[#allocation3 + $0xc8] sm:$0xff] %vm312_vm0, %v5856_v37  ;;  %v364_v35 = vld [vmem:[#allocation2 + $0x152] sm:$0x1]  ;;  %v365_v34 = vld [vmem:[#allocation2 + $0x16a] sm:$0x1] }
  0x4c   : > { %482 = vst.msk [vmem:[#allocation3 + $0xd8] sm:$0xff] %vm312_vm0, %v5863_v24  ;;  %v510_v36 = vld [vmem:[#allocation2 + $0x111] sm:$0xff]  ;;  %469 = vst.msk [vmem:[#allocation3 + $0x70] sm:$0xff] %vm312_vm0, %v5867_v62  ;;  %v5875_v31 = vld [vmem:[#allocation2 + $0xc0] sm:$0xff] }
  0x4d   : > { %383 = vst.msk [vmem:[#allocation2 + $0x150] sm:$0x1] %vm368_vm1, %v364_v35  ;;  %384 = vst.msk [vmem:[#allocation2 + $0x168] sm:$0x1] %vm368_vm1, %v365_v34  ;;  %v5879_v45 = vld [vmem:[#allocation2 + $0xd8] sm:$0xff]  ;;  %v5890_v34 = vld [vmem:[%s5540_s29 + $0xf0] sm:$0xff]  ;;  %597 = vrot.lane.b32.xlu1 %v510_v36, %s5476_s30 }
  0x4e   : > { %471 = vst.msk [vmem:[#allocation3 + $0x80] sm:$0xff] %vm312_vm0, %v5875_v31  ;;  %v5881_v46 = vld [vmem:[#allocation2 + $0x158] sm:$0xff]  ;;  %473 = vst.msk [vmem:[#allocation3 + $0x90] sm:$0xff] %vm312_vm0, %v5879_v45  ;;  %v5885_v35 = vld [vmem:[#allocation2 + $0xf0] sm:$0xff]  ;;  %599 = vrot.lane.b32.xlu0 %v511_v22, %s5476_s30 }
  0x4f   : > { %484 = vst.msk [vmem:[#allocation3 + $0xe8] sm:$0xff] %vm312_vm0, %v5881_v46  ;;  %8325 = vst [vmem:[#allocation34_spill] sm:$0xff] %v5890_v34  ;;  %v5896_v23 = vld [vmem:[#allocation2 + $0x108] sm:$0xff]  ;;  %v5908_v36 = vld [vmem:[#allocation2 + $0x170] sm:$0xff] }
  0x50   : > { %475 = vst.msk [vmem:[#allocation3 + $0xa0] sm:$0xff] %vm312_vm0, %v5885_v35  ;;  %343 = vst.msk [vmem:[#allocation2 + $0x181] sm:$0xff] %vm312_vm0, %v5890_v34  ;;  %v513_v18 = vld [vmem:[#allocation2 + $0x139] sm:$0xff]  ;;  %v514_v17 = vld [vmem:[#allocation2 + $0x141] sm:$0xff] }
  0x51   : > { %477 = vst.msk [vmem:[#allocation3 + $0xb0] sm:$0xff] %vm312_vm0, %v5896_v23  ;;  %v5902_v20 = vld [vmem:[#allocation2 + $0x120] sm:$0xff]  ;;  %v5906_v33 = vld [vmem:[#allocation2 + $0x138] sm:$0xff]  ;;  %486 = vst.msk [vmem:[#allocation3 + $0xf8] sm:$0xff] %vm312_vm0, %v5908_v36  ;;  %601 = vrot.lane.b32.xlu1 %v512_v21, %s5476_s30 }
  0x52   : > { %479 = vst.msk [vmem:[#allocation3 + $0xc0] sm:$0xff] %vm312_vm0, %v5902_v20  ;;  %481 = vst.msk [vmem:[#allocation3 + $0xd0] sm:$0xff] %vm312_vm0, %v5906_v33  ;;  %603 = vrot.lane.b32.xlu0 %v513_v18, %s5476_s30  ;;  %v515_v21 = vld [vmem:[#allocation2 + $0x151] sm:$0xff]  ;;  %v516_v22 = vld [vmem:[#allocation2 + $0x159] sm:$0xff] }
  0x53   : > { %8326 = vst [vmem:[#allocation35_spill] sm:$0xff] %v5925_v16  ;;  %344 = vst.msk [vmem:[#allocation2 + $0x189] sm:$0xff] %vm312_vm0, %v5925_v16  ;;  %v517_v14 = vld [vmem:[#allocation2 + $0x169] sm:$0xff]  ;;  %v518_v13 = vld [vmem:[#allocation2 + $0x171] sm:$0xff] }
  0x54   : > { %v5912_v19 = vld [vmem:[#allocation2 + $0x150] sm:$0xff]  ;;  %v5914_v34 = vld [vmem:[#allocation2 + $0x168] sm:$0xff]  ;;  %v5970_v16 = vld [vmem:[#allocation2 + $0x7a] sm:$0xff] }
  0x55   : > { %483 = vst.msk [vmem:[#allocation3 + $0xe0] sm:$0xff] %vm312_vm0, %v5912_v19  ;;  %485 = vst.msk [vmem:[#allocation3 + $0xf0] sm:$0xff] %vm312_vm0, %v5914_v34  ;;  %605 = vrot.lane.b32.xlu1 %v514_v17, %s5476_s30  ;;  %v680_v18 = vld [vmem:[#allocation2 + $0x2] sm:$0xff]  ;;  %v681_v12 = vld [vmem:[#allocation2 + $0xa] sm:$0xff] }
  0x56   : > { %607 = vrot.lane.b32.xlu0 %v515_v21, %s5476_s30  ;;  %v5940_v17 = vld [vmem:[#allocation2 + $0x22] sm:$0xff]  ;;  %v5956_v21 = vld [vmem:[#allocation2 + $0x52] sm:$0xff]  ;;  %v693_v9 = vld [vmem:[#allocation2 + $0x9a] sm:$0xff] }
  0x57   : > { %v366_v15 = vld [vmem:[#allocation2 + $0x182] sm:$0x1]  ;;  %v692_v10 = vld [vmem:[#allocation2 + $0x92] sm:$0xff]  ;;  %v694_v8 = vld [vmem:[#allocation2 + $0xaa] sm:$0xff] }
  0x58   : > { %385 = vst.msk [vmem:[#allocation2 + $0x180] sm:$0x1] %vm368_vm1, %v366_v15  ;;  %v5938_v15 = vld [vmem:[#allocation2 + $0x1a] sm:$0xff]  ;;  %v5972_v11 = vld [vmem:[#allocation2 + $0x82] sm:$0xff]  ;;  %v695_v7 = vld [vmem:[#allocation2 + $0xb2] sm:$0xff] }
  0x59   : > { %609 = vrot.lane.b32.xlu1 %v516_v22, %s5476_s30  ;;  %v5962_v22 = vld [vmem:[#allocation2 + $0x62] sm:$0xff]  ;;  %v697_v5 = vld [vmem:[#allocation2 + $0xca] sm:$0xff]  ;;  %v698_v4 = vld [vmem:[#allocation2 + $0xda] sm:$0xff] }
  0x5a   : > { %611 = vrot.lane.b32.xlu0 %v517_v14, %s5476_s30  ;;  %v5946_v14 = vld [vmem:[#allocation2 + $0x32] sm:$0xff]  ;;  %v696_v6 = vld [vmem:[#allocation2 + $0xc2] sm:$0xff] }
  0x5b   : > { %v699_v2 = vld [vmem:[#allocation2 + $0xe2] sm:$0xff] }
  0x5d   : > { %613 = vrot.lane.b32.xlu1 %v518_v13, %s5476_s30  ;;  %v5948_v13 = vld [vmem:[#allocation2 + $0x3a] sm:$0xff] }
  0x5e   : > { %744 = vrot.lane.b32.xlu0 %v680_v18, %s5477_s8  ;;  %v5964_v18 = vld [vmem:[#allocation2 + $0x6a] sm:$0xff] }
  0x61   : > { %746 = vrot.lane.b32.xlu1 %v681_v12, %s5477_s8  ;;  %v5954_v12 = vld [vmem:[#allocation2 + $0x4a] sm:$0xff] }
  0x62   : > { %748 = vrot.lane.b32.xlu0 %v5938_v15, %s5477_s8 }
  0x65   : > { %750 = vrot.lane.b32.xlu1 %v5940_v17, %s5477_s8 }
  0x66   : > { %752 = vrot.lane.b32.xlu0 %v5946_v14, %s5477_s8 }
  0x69   : > { %754 = vrot.lane.b32.xlu1 %v5948_v13, %s5477_s8 }
  0x6a   : > { %756 = vrot.lane.b32.xlu0 %v5954_v12, %s5477_s8 }
  0x6d   : > { %758 = vrot.lane.b32.xlu1 %v5956_v21, %s5477_s8 }
  0x6e   : > { %760 = vrot.lane.b32.xlu0 %v5962_v22, %s5477_s8 }
  0x71   : > { %762 = vrot.lane.b32.xlu1 %v5964_v18, %s5477_s8 }
  0x72   : > { %764 = vrot.lane.b32.xlu0 %v5970_v16, %s5477_s8 }
  0x75   : > { %766 = vrot.lane.b32.xlu1 %v5972_v11, %s5477_s8 }
  0x76   : > { %768 = vrot.lane.b32.xlu0 %v692_v10, %s5477_s8  ;;  %v700_v10 = vld [vmem:[#allocation2 + $0xf2] sm:$0xff] }
  0x79   : > { %770 = vrot.lane.b32.xlu1 %v693_v9, %s5477_s8  ;;  %v701_v9 = vld [vmem:[#allocation2 + $0xfa] sm:$0xff] }
  0x7a   : > { %772 = vrot.lane.b32.xlu0 %v694_v8, %s5477_s8  ;;  %v702_v8 = vld [vmem:[#allocation2 + $0x10a] sm:$0xff] }
  0x7d   : > { %774 = vrot.lane.b32.xlu1 %v695_v7, %s5477_s8  ;;  %v703_v7 = vld [vmem:[#allocation2 + $0x112] sm:$0xff] }
  0x7e   : > { %776 = vrot.lane.b32.xlu0 %v696_v6, %s5477_s8  ;;  %v704_v6 = vld [vmem:[#allocation2 + $0x122] sm:$0xff] }
  0x81   : > { %778 = vrot.lane.b32.xlu1 %v697_v5, %s5477_s8  ;;  %v705_v5 = vld [vmem:[#allocation2 + $0x12a] sm:$0xff] }
  0x82   : > { %780 = vrot.lane.b32.xlu0 %v698_v4, %s5477_s8  ;;  %v707_v4 = vld [vmem:[#allocation2 + $0x142] sm:$0xff] }
  0x85   : > { %782 = vrot.lane.b32.xlu1 %v699_v2, %s5477_s8  ;;  %v706_v2 = vld [vmem:[#allocation2 + $0x13a] sm:$0xff] }
  0x86   : > { %784 = vrot.lane.b32.xlu0 %v700_v10, %s5477_s8  ;;  %v708_v10 = vld [vmem:[#allocation2 + $0x152] sm:$0xff] }
  0x89   : > { %786 = vrot.lane.b32.xlu1 %v701_v9, %s5477_s8  ;;  %v709_v9 = vld [vmem:[#allocation2 + $0x15a] sm:$0xff] }
  0x8a   : > { %788 = vrot.lane.b32.xlu0 %v702_v8, %s5477_s8 }
  0x8d   : > { %790 = vrot.lane.b32.xlu1 %v703_v7, %s5477_s8 }
  0x8e   : > { %792 = vrot.lane.b32.xlu0 %v704_v6, %s5477_s8  ;;  %v710_v6 = vld [vmem:[#allocation2 + $0x16a] sm:$0xff] }
  0x90   : > { %v552_v0 = vpop.permute.xlu0 %551 }
  0x91   : > { %794 = vrot.lane.b32.xlu1 %v705_v5, %s5477_s8  ;;  %v556_v3 = vpop.permute.xlu1 %555  ;;  %648 = vst.msk [vmem:[#allocation3] sm:$0xff] %vm647_vm2, %v552_v0  ;;  %v711_v0 = vld [vmem:[#allocation2 + $0x172] sm:$0xff] }
  0x92   : > { %650 = vst.msk [vmem:[#allocation3 + $0x10] sm:$0xff] %vm647_vm2, %v556_v3  ;;  %796 = vrot.lane.b32.xlu0 %v706_v2, %s5477_s8 }
  0x94   : > { %v554_v8 = vpop.permute.xlu0 %553 }
  0x95   : > { %798 = vrot.lane.b32.xlu1 %v707_v4, %s5477_s8  ;;  %v558_v7 = vpop.permute.xlu1 %557  ;;  %649 = vst.msk [vmem:[#allocation3 + $0x8] sm:$0xff] %vm647_vm2, %v554_v8 }
  0x96   : > { %651 = vst.msk [vmem:[#allocation3 + $0x18] sm:$0xff] %vm647_vm2, %v558_v7  ;;  %800 = vrot.lane.b32.xlu0 %v708_v10, %s5477_s8 }
  0x98   : > { %v560_v5 = vpop.permute.xlu0 %559 }
  0x99   : > { %802 = vrot.lane.b32.xlu1 %v709_v9, %s5477_s8  ;;  %v562_v3 = vpop.permute.xlu1 %561  ;;  %652 = vst.msk [vmem:[#allocation3 + $0x20] sm:$0xff] %vm647_vm2, %v560_v5 }
  0x9a   : > { %653 = vst.msk [vmem:[#allocation3 + $0x28] sm:$0xff] %vm647_vm2, %v562_v3  ;;  %804 = vrot.lane.b32.xlu0 %v710_v6, %s5477_s8 }
  0x9c   : > { %v564_v2 = vpop.permute.xlu0 %563 }
  0x9d   : > { %806 = vrot.lane.b32.xlu1 %v711_v0, %s5477_s8  ;;  %v566_v4 = vpop.permute.xlu1 %565  ;;  %654 = vst.msk [vmem:[#allocation3 + $0x30] sm:$0xff] %vm647_vm2, %v564_v2 }
  0x9e   : > { %655 = vst.msk [vmem:[#allocation3 + $0x38] sm:$0xff] %vm647_vm2, %v566_v4  ;;  %937 = vrot.lane.b32.xlu0 %v5796_v56, %s5478_s9 }
  0xa0   : > { %v568_v10 = vpop.permute.xlu0 %567 }
  0xa1   : > { %939 = vrot.lane.b32.xlu1 %v5769_v63, %s5478_s9  ;;  %v570_v9 = vpop.permute.xlu1 %569  ;;  %656 = vst.msk [vmem:[#allocation3 + $0x40] sm:$0xff] %vm647_vm2, %v568_v10 }
  0xa2   : > { %657 = vst.msk [vmem:[#allocation3 + $0x48] sm:$0xff] %vm647_vm2, %v570_v9  ;;  %941 = vrot.lane.b32.xlu0 %v5817_v39, %s5478_s9 }
  0xa4   : > { %v572_v8 = vpop.permute.xlu0 %571 }
  0xa5   : > { %943 = vrot.lane.b32.xlu1 %v5774_v38, %s5478_s9  ;;  %v574_v7 = vpop.permute.xlu1 %573  ;;  %658 = vst.msk [vmem:[#allocation3 + $0x50] sm:$0xff] %vm647_vm2, %v572_v8 }
  0xa6   : > { %659 = vst.msk [vmem:[#allocation3 + $0x58] sm:$0xff] %vm647_vm2, %v574_v7  ;;  %945 = vrot.lane.b32.xlu0 %v5833_v55, %s5478_s9 }
  0xa8   : > { %v576_v63 = vpop.permute.xlu0 %575 }
  0xa9   : > { %947 = vrot.lane.b32.xlu1 %v5783_v42, %s5478_s9  ;;  %v578_v56 = vpop.permute.xlu1 %577  ;;  %660 = vst.msk [vmem:[#allocation3 + $0x60] sm:$0xff] %vm647_vm2, %v576_v63 }
  0xaa   : > { %661 = vst.msk [vmem:[#allocation3 + $0x68] sm:$0xff] %vm647_vm2, %v578_v56  ;;  %949 = vrot.lane.b32.xlu0 %v5835_v60, %s5478_s9 }
  0xac   : > { %v580_v6 = vpop.permute.xlu0 %579 }
  0xad   : > { %951 = vrot.lane.b32.xlu1 %v5789_v47, %s5478_s9  ;;  %v582_v0 = vpop.permute.xlu1 %581  ;;  %662 = vst.msk [vmem:[#allocation3 + $0x70] sm:$0xff] %vm647_vm2, %v580_v6 }
  0xae   : > { %663 = vst.msk [vmem:[#allocation3 + $0x78] sm:$0xff] %vm647_vm2, %v582_v0  ;;  %953 = vrot.lane.b32.xlu0 %v5844_v40, %s5478_s9 }
  0xb0   : > { %v584_v5 = vpop.permute.xlu0 %583 }
  0xb1   : > { %955 = vrot.lane.b32.xlu1 %v5794_v51, %s5478_s9  ;;  %v586_v3 = vpop.permute.xlu1 %585  ;;  %664 = vst.msk [vmem:[#allocation3 + $0x80] sm:$0xff] %vm647_vm2, %v584_v5 }
  0xb2   : > { %665 = vst.msk [vmem:[#allocation3 + $0x88] sm:$0xff] %vm647_vm2, %v586_v3  ;;  %957 = vrot.lane.b32.xlu0 %v5851_v48, %s5478_s9 }
  0xb4   : > { %v588_v2 = vpop.permute.xlu0 %587 }
  0xb5   : > { %959 = vrot.lane.b32.xlu1 %v5801_v57, %s5478_s9  ;;  %v590_v4 = vpop.permute.xlu1 %589  ;;  %666 = vst.msk [vmem:[#allocation3 + $0x90] sm:$0xff] %vm647_vm2, %v588_v2 }
  0xb6   : > { %667 = vst.msk [vmem:[#allocation3 + $0x98] sm:$0xff] %vm647_vm2, %v590_v4  ;;  %961 = vrot.lane.b32.xlu0 %v5867_v62, %s5478_s9 }
  0xb8   : > { %v592_v10 = vpop.permute.xlu0 %591 }
  0xb9   : > { %963 = vrot.lane.b32.xlu1 %v5810_v61, %s5478_s9  ;;  %v594_v9 = vpop.permute.xlu1 %593  ;;  %668 = vst.msk [vmem:[#allocation3 + $0xa0] sm:$0xff] %vm647_vm2, %v592_v10 }
  0xba   : > { %669 = vst.msk [vmem:[#allocation3 + $0xa8] sm:$0xff] %vm647_vm2, %v594_v9  ;;  %965 = vrot.lane.b32.xlu0 %v5875_v31, %s5478_s9 }
  0xbc   : > { %v596_v8 = vpop.permute.xlu0 %595 }
  0xbd   : > { %967 = vrot.lane.b32.xlu1 %v5815_v26, %s5478_s9  ;;  %670 = vst.msk [vmem:[#allocation3 + $0xb0] sm:$0xff] %vm647_vm2, %v596_v8 }
  0xbe   : > { %969 = vrot.lane.b32.xlu0 %v5879_v45, %s5478_s9 }
  0xbf   : > { %v598_v7 = vpop.permute.xlu1 %597 }
  0xc0   : > { %671 = vst.msk [vmem:[#allocation3 + $0xb8] sm:$0xff] %vm647_vm2, %v598_v7  ;;  %v600_v63 = vpop.permute.xlu0 %599 }
  0xc1   : > { %971 = vrot.lane.b32.xlu1 %v5822_v41, %s5478_s9  ;;  %672 = vst.msk [vmem:[#allocation3 + $0xc0] sm:$0xff] %vm647_vm2, %v600_v63 }
  0xc2   : > { %973 = vrot.lane.b32.xlu0 %v5885_v35, %s5478_s9 }
  0xc3   : > { %v602_v56 = vpop.permute.xlu1 %601 }
  0xc4   : > { %673 = vst.msk [vmem:[#allocation3 + $0xc8] sm:$0xff] %vm647_vm2, %v602_v56  ;;  %v604_v6 = vpop.permute.xlu0 %603 }
  0xc5   : > { %975 = vrot.lane.b32.xlu1 %v5829_v52, %s5478_s9  ;;  %674 = vst.msk [vmem:[#allocation3 + $0xd0] sm:$0xff] %vm647_vm2, %v604_v6  ;;  %v2066_v6 = vld [vmem:[%s8256_s1 + $0x10] sm:$0xff] }
  0xc6   : > { %977 = vrot.lane.b32.xlu0 %v5896_v23, %s5478_s9 }
  0xc7   : > { %v606_v0 = vpop.permute.xlu1 %605 }
  0xc8   : > { %675 = vst.msk [vmem:[#allocation3 + $0xd8] sm:$0xff] %vm647_vm2, %v606_v0  ;;  %v608_v5 = vpop.permute.xlu0 %607  ;;  %v2067_v0 = vld [vmem:[%s8256_s1 + $0x18] sm:$0xff] }
  0xc9   : > { %979 = vrot.lane.b32.xlu1 %v5847_v58, %s5478_s9  ;;  %676 = vst.msk [vmem:[#allocation3 + $0xe0] sm:$0xff] %vm647_vm2, %v608_v5 }
  0xca   : > { %981 = vrot.lane.b32.xlu0 %v5902_v20, %s5478_s9 }
  0xcb   : > { %v610_v3 = vpop.permute.xlu1 %609 }
  0xcc   : > { %677 = vst.msk [vmem:[#allocation3 + $0xe8] sm:$0xff] %vm647_vm2, %v610_v3  ;;  %v612_v2 = vpop.permute.xlu0 %611 }
  0xcd   : > { %983 = vrot.lane.b32.xlu1 %v5856_v37, %s5478_s9  ;;  %678 = vst.msk [vmem:[#allocation3 + $0xf0] sm:$0xff] %vm647_vm2, %v612_v2 }
  0xce   : > { %985 = vrot.lane.b32.xlu0 %v5906_v33, %s5478_s9  ;;  %v903_v33 = vld [vmem:[#allocation2 + $0x180] sm:$0xff] }
  0xcf   : > { %v614_v4 = vpop.permute.xlu1 %613 }
  0xd0   : > { %679 = vst.msk [vmem:[#allocation3 + $0xf8] sm:$0xff] %vm647_vm2, %v614_v4  ;;  %v745_v23 = vpop.permute.xlu0 %744 }
  0xd1   : > { %987 = vrot.lane.b32.xlu1 %v5863_v24, %s5478_s9  ;;  %841 = vst.msk [vmem:[#allocation3] sm:$0xff] %vm840_vm3, %v745_v23  ;;  %v904_v24 = vld [vmem:[#allocation2 + $0x188] sm:$0xff] }
  0xd2   : > { %989 = vrot.lane.b32.xlu0 %v5912_v19, %s5478_s9 }
  0xd3   : > { %v747_v10 = vpop.permute.xlu1 %746 }
  0xd4   : > { %842 = vst.msk [vmem:[#allocation3 + $0x8] sm:$0xff] %vm840_vm3, %v747_v10  ;;  %v749_v20 = vpop.permute.xlu0 %748 }
  0xd5   : > { %991 = vrot.lane.b32.xlu1 %v5881_v46, %s5478_s9  ;;  %843 = vst.msk [vmem:[#allocation3 + $0x10] sm:$0xff] %vm840_vm3, %v749_v20 }
  0xd6   : > { %993 = vrot.lane.b32.xlu0 %v5914_v34, %s5478_s9 }
  0xd7   : > { %v751_v37 = vpop.permute.xlu1 %750 }
  0xd8   : > { %844 = vst.msk [vmem:[#allocation3 + $0x18] sm:$0xff] %vm840_vm3, %v751_v37  ;;  %v753_v9 = vpop.permute.xlu0 %752  ;;  %v1648_v37 = vld [vmem:[#allocation2 + $0x49] sm:$0xff] }
  0xd9   : > { %995 = vrot.lane.b32.xlu1 %v5908_v36, %s5478_s9  ;;  %845 = vst.msk [vmem:[#allocation3 + $0x20] sm:$0xff] %vm840_vm3, %v753_v9 }
  0xda   : > { %997 = vrot.lane.b32.xlu0 %v903_v33, %s5478_s9 }
  0xdb   : > { %v755_v8 = vpop.permute.xlu1 %754 }
  0xdc   : > { %846 = vst.msk [vmem:[#allocation3 + $0x28] sm:$0xff] %vm840_vm3, %v755_v8  ;;  %v757_v19 = vpop.permute.xlu0 %756 }
  0xdd   : > { %999 = vrot.lane.b32.xlu1 %v904_v24, %s5478_s9  ;;  %847 = vst.msk [vmem:[#allocation3 + $0x30] sm:$0xff] %vm840_vm3, %v757_v19 }
  0xde   : > { %1130 = vrot.lane.b32.xlu0 %v5660_v25, %s5479_s10 }
  0xdf   : > { %v759_v46 = vpop.permute.xlu1 %758 }
  0xe0   : > { %848 = vst.msk [vmem:[#allocation3 + $0x38] sm:$0xff] %vm840_vm3, %v759_v46  ;;  %v761_v34 = vpop.permute.xlu0 %760  ;;  %v1650_v46 = vld [vmem:[#allocation2 + $0x61] sm:$0xff] }
  0xe1   : > { %1132 = vrot.lane.b32.xlu1 %v5671_v27, %s5479_s10  ;;  %849 = vst.msk [vmem:[#allocation3 + $0x40] sm:$0xff] %vm840_vm3, %v761_v34 }
  0xe2   : > { %1134 = vrot.lane.b32.xlu0 %v5676_v28, %s5479_s10 }
  0xe3   : > { %v763_v36 = vpop.permute.xlu1 %762 }
  0xe4   : > { %850 = vst.msk [vmem:[#allocation3 + $0x48] sm:$0xff] %vm840_vm3, %v763_v36  ;;  %v765_v7 = vpop.permute.xlu0 %764 }
  0xe5   : > { %1136 = vrot.lane.b32.xlu1 %v5678_v29, %s5479_s10  ;;  %851 = vst.msk [vmem:[#allocation3 + $0x50] sm:$0xff] %vm840_vm3, %v765_v7 }
  0xe6   : > { %1138 = vrot.lane.b32.xlu0 %v5680_v30, %s5479_s10 }
  0xe7   : > { %v767_v63 = vpop.permute.xlu1 %766 }
  0xe8   : > { %852 = vst.msk [vmem:[#allocation3 + $0x58] sm:$0xff] %vm840_vm3, %v767_v63  ;;  %v769_v25 = vpop.permute.xlu0 %768 }
  0xe9   : > { %1140 = vrot.lane.b32.xlu1 %v5689_v32, %s5479_s10  ;;  %853 = vst.msk [vmem:[#allocation3 + $0x60] sm:$0xff] %vm840_vm3, %v769_v25 }
  0xea   : > { %1142 = vrot.lane.b32.xlu0 %v5729_v43, %s5479_s10 }
  0xeb   : > { %v771_v27 = vpop.permute.xlu1 %770 }
  0xec   : > { %854 = vst.msk [vmem:[#allocation3 + $0x68] sm:$0xff] %vm840_vm3, %v771_v27  ;;  %v773_v28 = vpop.permute.xlu0 %772  ;;  %v1652_v27 = vld [vmem:[#allocation2 + $0x79] sm:$0xff] }
  0xed   : > { %1144 = vrot.lane.b32.xlu1 %v5731_v44, %s5479_s10  ;;  %855 = vst.msk [vmem:[#allocation3 + $0x70] sm:$0xff] %vm840_vm3, %v773_v28 }
  0xee   : > { %1146 = vrot.lane.b32.xlu0 %v5743_v49, %s5479_s10  ;;  %v2065_v49 = vld [vmem:[%s8256_s1 + $0x8] sm:$0xff] }
  0xef   : > { %v775_v29 = vpop.permute.xlu1 %774 }
  0xf0   : > { %856 = vst.msk [vmem:[#allocation3 + $0x78] sm:$0xff] %vm840_vm3, %v775_v29  ;;  %v777_v30 = vpop.permute.xlu0 %776 }
  0xf1   : > { %1148 = vrot.lane.b32.xlu1 %v5745_v50, %s5479_s10  ;;  %857 = vst.msk [vmem:[#allocation3 + $0x80] sm:$0xff] %vm840_vm3, %v777_v30  ;;  %v2064_v50 = vld [vmem:[%s8256_s1] sm:$0xff] }
  0xf2   : > { %1150 = vrot.lane.b32.xlu0 %v5753_v53, %s5479_s10  ;;  %v5432_v56 = vpack.c.bf16 %v2065_v49, %v2064_v50 }
  0xf3   : > { %v779_v32 = vpop.permute.xlu1 %778 }
  0xf4   : > { %858 = vst.msk [vmem:[#allocation3 + $0x88] sm:$0xff] %vm840_vm3, %v779_v32  ;;  %v781_v43 = vpop.permute.xlu0 %780  ;;  %5433 = vmatprep.subr.bf16.mxu0 %v5432_v56 }
  0xf5   : > { %1152 = vrot.lane.b32.xlu1 %v5755_v54, %s5479_s10  ;;  %859 = vst.msk [vmem:[#allocation3 + $0x90] sm:$0xff] %vm840_vm3, %v781_v43  ;;  %5435 = vmatpush3.bf16.msra.mxu0 %v5432_v56  ;;  %v1655_v56 = vld [vmem:[#allocation2 + $0x99] sm:$0xff] }
  0xf6   : > { %1154 = vrot.lane.b32.xlu0 %v5763_v59, %s5479_s10  ;;  %v1646_v59 = vld [vmem:[#allocation2 + $0x31] sm:$0xff] }
  0xf7   : > { %v783_v44 = vpop.permute.xlu1 %782 }
  0xf8   : > { %860 = vst.msk [vmem:[#allocation3 + $0x98] sm:$0xff] %vm840_vm3, %v783_v44  ;;  %v785_v53 = vpop.permute.xlu0 %784  ;;  %v1654_v44 = vld [vmem:[#allocation2 + $0x91] sm:$0xff] }
  0xf9   : > { %1323 = vrot.lane.b32.xlu1 %v5938_v15, %s5480_s15  ;;  %861 = vst.msk [vmem:[#allocation3 + $0xa0] sm:$0xff] %vm840_vm3, %v785_v53  ;;  %v5436_v15 = vpack.c.bf16 %v2067_v0, %v2066_v6 }
  0xfa   : > { %1325 = vrot.lane.b32.xlu0 %v5940_v17, %s5480_s15  ;;  %v1647_v17 = vld [vmem:[#allocation2 + $0x39] sm:$0xff] }
  0xfb   : > { %v787_v54 = vpop.permute.xlu1 %786  ;;  %5437 = vmatprep.subr.bf16.mxu0 %v5436_v15 }
  0xfc   : > { %862 = vst.msk [vmem:[#allocation3 + $0xa8] sm:$0xff] %vm840_vm3, %v787_v54  ;;  %v789_v5 = vpop.permute.xlu0 %788  ;;  %5439 = vmatpush3.bf16.msra.mxu0 %v5436_v15  ;;  %v1656_v15 = vld [vmem:[#allocation2 + $0xa9] sm:$0xff] }
  0xfd   : > { %1517 = vrot.lane.b32.xlu1 %v5817_v39, %s5481_s20  ;;  %863 = vst.msk [vmem:[#allocation3 + $0xb0] sm:$0xff] %vm840_vm3, %v789_v5  ;;  %v2068_v39 = vld [vmem:[%s8256_s1 + $0x20] sm:$0xf] }
  0xfe   : > { %1519 = vrot.lane.b32.xlu0 %v5774_v38, %s5481_s20  ;;  %5324 = vmatprep.subr.msk.mxu0 %vm2166_vm4, %v2068_v39 }
  0xff   : > { %v791_v3 = vpop.permute.xlu1 %790 }
 0x100   : > { %864 = vst.msk [vmem:[#allocation3 + $0xb8] sm:$0xff] %vm840_vm3, %v791_v3  ;;  %v793_v2 = vpop.permute.xlu0 %792  ;;  %5325 = vmatpush3.msk.msra.mxu0 %vm2166_vm4, %v2068_v39  ;;  %v1657_v3 = vld [vmem:[#allocation2 + $0xb1] sm:$0xff] }
 0x101   : > { %1710 = vrot.lane.b32.xlu1 %v1646_v59, %s5482_s21  ;;  %865 = vst.msk [vmem:[#allocation3 + $0xc0] sm:$0xff] %vm840_vm3, %v793_v2  ;;  %v1849_v39 = vld [vmem:[#allocation2 + $0xaa] sm:$0xff] }
 0x102   : > { %1712 = vrot.lane.b32.xlu0 %v1647_v17, %s5482_s21 }
 0x103   : > { %v795_v4 = vpop.permute.xlu1 %794 }
 0x104   : > { %866 = vst.msk [vmem:[#allocation3 + $0xc8] sm:$0xff] %vm840_vm3, %v795_v4  ;;  %v797_v38 = vpop.permute.xlu0 %796 }
 0x105   : > { %1903 = vrot.lane.b32.xlu1 %v5946_v14, %s5483_s27  ;;  %867 = vst.msk [vmem:[#allocation3 + $0xd0] sm:$0xff] %vm840_vm3, %v797_v38 }
 0x106   : > { %1327 = vrot.lane.b32.xlu0 %v5946_v14, %s5480_s15  ;;  %v1649_v14 = vld [vmem:[#allocation2 + $0x51] sm:$0xff] }
 0x107   : > { %v799_v23 = vpop.permute.xlu1 %798 }
 0x108   : > { %868 = vst.msk [vmem:[#allocation3 + $0xd8] sm:$0xff] %vm840_vm3, %v799_v23  ;;  %v801_v10 = vpop.permute.xlu0 %800 }
 0x109   : > { %1905 = vrot.lane.b32.xlu1 %v5948_v13, %s5483_s27  ;;  %869 = vst.msk [vmem:[#allocation3 + $0xe0] sm:$0xff] %vm840_vm3, %v801_v10 }
 0x10a   : > { %1329 = vrot.lane.b32.xlu0 %v5948_v13, %s5480_s15 }
 0x10b   : > { %v803_v20 = vpop.permute.xlu1 %802 }
 0x10c   : > { %870 = vst.msk [vmem:[#allocation3 + $0xe8] sm:$0xff] %vm840_vm3, %v803_v20  ;;  %v805_v24 = vpop.permute.xlu0 %804 }
 0x10d   : > { %1521 = vrot.lane.b32.xlu1 %v5833_v55, %s5481_s20  ;;  %871 = vst.msk [vmem:[#allocation3 + $0xf0] sm:$0xff] %vm840_vm3, %v805_v24 }
 0x10e   : > { %1523 = vrot.lane.b32.xlu0 %v5783_v42, %s5481_s20 }
 0x10f   : > { %v807_v33 = vpop.permute.xlu1 %806 }
 0x110   : > { %872 = vst.msk [vmem:[#allocation3 + $0xf8] sm:$0xff] %vm840_vm3, %v807_v33  ;;  %v938_v8 = vpop.permute.xlu0 %937 }
 0x111   : > { %1714 = vrot.lane.b32.xlu1 %v1648_v37, %s5482_s21  ;;  %1034 = vst.msk [vmem:[#allocation3] sm:$0xff] %vm1033_vm5, %v938_v8  ;;  %v1658_v37 = vld [vmem:[#allocation2 + $0xc1] sm:$0xff] }
 0x112   : > { %1716 = vrot.lane.b32.xlu0 %v1649_v14, %s5482_s21  ;;  %v1659_v14 = vld [vmem:[#allocation2 + $0xc9] sm:$0xff] }
 0x113   : > { %v940_v9 = vpop.permute.xlu1 %939 }
 0x114   : > { %1035 = vst.msk [vmem:[#allocation3 + $0x8] sm:$0xff] %vm1033_vm5, %v940_v9  ;;  %v942_v13 = vpop.permute.xlu0 %941  ;;  %v1851_v9 = vld [vmem:[#allocation2 + $0xc2] sm:$0xff] }
 0x115   : > { %1907 = vrot.lane.b32.xlu1 %v5954_v12, %s5483_s27  ;;  %1036 = vst.msk [vmem:[#allocation3 + $0x10] sm:$0xff] %vm1033_vm5, %v942_v13  ;;  %v1852_v13 = vld [vmem:[#allocation2 + $0xca] sm:$0xff] }
 0x116   : > { %1331 = vrot.lane.b32.xlu0 %v5954_v12, %s5480_s15  ;;  %v1651_v12 = vld [vmem:[#allocation2 + $0x69] sm:$0xff] }
 0x117   : > { %v944_v55 = vpop.permute.xlu1 %943 }
 0x118   : > { %1037 = vst.msk [vmem:[#allocation3 + $0x18] sm:$0xff] %vm1033_vm5, %v944_v55  ;;  %v946_v19 = vpop.permute.xlu0 %945 }
 0x119   : > { %1909 = vrot.lane.b32.xlu1 %v5956_v21, %s5483_s27  ;;  %1038 = vst.msk [vmem:[#allocation3 + $0x20] sm:$0xff] %vm1033_vm5, %v946_v19 }
 0x11a   : > { %1333 = vrot.lane.b32.xlu0 %v5956_v21, %s5480_s15 }
 0x11b   : > { %v948_v42 = vpop.permute.xlu1 %947 }
 0x11c   : > { %1039 = vst.msk [vmem:[#allocation3 + $0x28] sm:$0xff] %vm1033_vm5, %v948_v42  ;;  %v950_v36 = vpop.permute.xlu0 %949 }
 0x11d   : > { %1525 = vrot.lane.b32.xlu1 %v5835_v60, %s5481_s20  ;;  %1040 = vst.msk [vmem:[#allocation3 + $0x30] sm:$0xff] %vm1033_vm5, %v950_v36  ;;  %v1660_v36 = vld [vmem:[#allocation2 + $0xd9] sm:$0xff] }
 0x11e   : > { %1527 = vrot.lane.b32.xlu0 %v5789_v47, %s5481_s20 }
 0x11f   : > { %v952_v34 = vpop.permute.xlu1 %951 }
 0x120   : > { %1041 = vst.msk [vmem:[#allocation3 + $0x38] sm:$0xff] %vm1033_vm5, %v952_v34  ;;  %v954_v63 = vpop.permute.xlu0 %953 }
 0x121   : > { %1718 = vrot.lane.b32.xlu1 %v1650_v46, %s5482_s21  ;;  %1042 = vst.msk [vmem:[#allocation3 + $0x40] sm:$0xff] %vm1033_vm5, %v954_v63  ;;  %v1661_v63 = vld [vmem:[#allocation2 + $0xe1] sm:$0xff] }
 0x122   : > { %1720 = vrot.lane.b32.xlu0 %v1651_v12, %s5482_s21 }
 0x123   : > { %v956_v7 = vpop.permute.xlu1 %955 }
 0x124   : > { %1043 = vst.msk [vmem:[#allocation3 + $0x48] sm:$0xff] %vm1033_vm5, %v956_v7  ;;  %v958_v21 = vpop.permute.xlu0 %957 }
 0x125   : > { %1911 = vrot.lane.b32.xlu1 %v5962_v22, %s5483_s27  ;;  %1044 = vst.msk [vmem:[#allocation3 + $0x50] sm:$0xff] %vm1033_vm5, %v958_v21 }
 0x126   : > { %1335 = vrot.lane.b32.xlu0 %v5962_v22, %s5480_s15  ;;  %v1653_v22 = vld [vmem:[#allocation2 + $0x81] sm:$0xff] }
 0x127   : > { %v960_v60 = vpop.permute.xlu1 %959 }
 0x128   : > { %1045 = vst.msk [vmem:[#allocation3 + $0x58] sm:$0xff] %vm1033_vm5, %v960_v60  ;;  %v962_v25 = vpop.permute.xlu0 %961  ;;  %v1853_v60 = vld [vmem:[#allocation2 + $0xda] sm:$0xff] }
 0x129   : > { %1913 = vrot.lane.b32.xlu1 %v5964_v18, %s5483_s27  ;;  %1046 = vst.msk [vmem:[#allocation3 + $0x60] sm:$0xff] %vm1033_vm5, %v962_v25 }
 0x12a   : > { %1337 = vrot.lane.b32.xlu0 %v5964_v18, %s5480_s15 }
 0x12b   : > { %v964_v47 = vpop.permute.xlu1 %963 }
 0x12c   : > { %1047 = vst.msk [vmem:[#allocation3 + $0x68] sm:$0xff] %vm1033_vm5, %v964_v47  ;;  %v966_v29 = vpop.permute.xlu0 %965 }
 0x12d   : > { %1529 = vrot.lane.b32.xlu1 %v5844_v40, %s5481_s20  ;;  %1048 = vst.msk [vmem:[#allocation3 + $0x70] sm:$0xff] %vm1033_vm5, %v966_v29 }
 0x12e   : > { %1531 = vrot.lane.b32.xlu0 %v5794_v51, %s5481_s20 }
 0x12f   : > { %v968_v28 = vpop.permute.xlu1 %967 }
 0x130   : > { %1049 = vst.msk [vmem:[#allocation3 + $0x78] sm:$0xff] %vm1033_vm5, %v968_v28  ;;  %v970_v32 = vpop.permute.xlu0 %969 }
 0x131   : > { %1722 = vrot.lane.b32.xlu1 %v1652_v27, %s5482_s21  ;;  %1050 = vst.msk [vmem:[#allocation3 + $0x80] sm:$0xff] %vm1033_vm5, %v970_v32  ;;  %v1854_v27 = vld [vmem:[#allocation2 + $0xe2] sm:$0xff] }
 0x132   : > { %1724 = vrot.lane.b32.xlu0 %v1653_v22, %s5482_s21 }
 0x133   : > { %v972_v30 = vpop.permute.xlu1 %971 }
 0x134   : > { %1051 = vst.msk [vmem:[#allocation3 + $0x88] sm:$0xff] %vm1033_vm5, %v972_v30  ;;  %v974_v18 = vpop.permute.xlu0 %973 }
 0x135   : > { %1915 = vrot.lane.b32.xlu1 %v5970_v16, %s5483_s27  ;;  %1052 = vst.msk [vmem:[#allocation3 + $0x90] sm:$0xff] %vm1033_vm5, %v974_v18  ;;  %v1662_v18 = vld [vmem:[#allocation2 + $0xf1] sm:$0xff] }
 0x136   : > { %1339 = vrot.lane.b32.xlu0 %v5970_v16, %s5480_s15  ;;  %v1847_v16 = vld [vmem:[#allocation2 + $0x92] sm:$0xff] }
 0x137   : > { %v976_v40 = vpop.permute.xlu1 %975 }
 0x138   : > { %1053 = vst.msk [vmem:[#allocation3 + $0x98] sm:$0xff] %vm1033_vm5, %v976_v40  ;;  %v978_v43 = vpop.permute.xlu0 %977  ;;  %v403_v40 = vld [vmem:[#allocation2 + $0x18f] sm:$0x1] }
 0x139   : > { %1917 = vrot.lane.b32.xlu1 %v5972_v11, %s5483_s27  ;;  %1054 = vst.msk [vmem:[#allocation3 + $0xa0] sm:$0xff] %vm1033_vm5, %v978_v43 }
 0x13a   : > { %1341 = vrot.lane.b32.xlu0 %v5972_v11, %s5480_s15  ;;  %v1848_v11 = vld [vmem:[#allocation2 + $0x9a] sm:$0xff]  ;;  %421 = vst.msk [vmem:[#allocation2 + $0x191] sm:$0x1] %vm368_vm1, %v403_v40 }
 0x13b   : > { %v980_v51 = vpop.permute.xlu1 %979 }
 0x13c   : > { %1055 = vst.msk [vmem:[#allocation3 + $0xa8] sm:$0xff] %vm1033_vm5, %v980_v51  ;;  %v982_v49 = vpop.permute.xlu0 %981 }
 0x13d   : > { %1533 = vrot.lane.b32.xlu1 %v5851_v48, %s5481_s20  ;;  %1056 = vst.msk [vmem:[#allocation3 + $0xb0] sm:$0xff] %vm1033_vm5, %v982_v49 }
 0x13e   : > { %1535 = vrot.lane.b32.xlu0 %v5801_v57, %s5481_s20 }
 0x13f   : > { %v984_v50 = vpop.permute.xlu1 %983 }
 0x140   : > { %1057 = vst.msk [vmem:[#allocation3 + $0xb8] sm:$0xff] %vm1033_vm5, %v984_v50  ;;  %v986_v54 = vpop.permute.xlu0 %985  ;;  %v1855_v50 = vld [vmem:[#allocation2 + $0xf2] sm:$0xff] }
 0x141   : > { %1726 = vrot.lane.b32.xlu1 %v1654_v44, %s5482_s21  ;;  %1058 = vst.msk [vmem:[#allocation3 + $0xc0] sm:$0xff] %vm1033_vm5, %v986_v54  ;;  %v367_v44 = vld [vmem:[#allocation2 + $0x19a] sm:$0x1] }
 0x142   : > { %1728 = vrot.lane.b32.xlu0 %v1655_v56, %s5482_s21  ;;  %386 = vst.msk [vmem:[#allocation2 + $0x198] sm:$0x1] %vm368_vm1, %v367_v44 }
 0x143   : > { %v988_v53 = vpop.permute.xlu1 %987 }
 0x144   : > { %1059 = vst.msk [vmem:[#allocation3 + $0xc8] sm:$0xff] %vm1033_vm5, %v988_v53  ;;  %v990_v6 = vpop.permute.xlu0 %989 }
 0x145   : > { %1919 = vrot.lane.b32.xlu1 %v1847_v16, %s5483_s27  ;;  %1060 = vst.msk [vmem:[#allocation3 + $0xd0] sm:$0xff] %vm1033_vm5, %v990_v6 }
 0x146   : > { %1343 = vrot.lane.b32.xlu0 %v1847_v16, %s5480_s15 }
 0x147   : > { %v992_v48 = vpop.permute.xlu1 %991 }
 0x148   : > { %1061 = vst.msk [vmem:[#allocation3 + $0xd8] sm:$0xff] %vm1033_vm5, %v992_v48  ;;  %v994_v0 = vpop.permute.xlu0 %993  ;;  %v1856_v48 = vld [vmem:[#allocation2 + $0xfa] sm:$0xff] }
 0x149   : > { %1921 = vrot.lane.b32.xlu1 %v1848_v11, %s5483_s27  ;;  %1062 = vst.msk [vmem:[#allocation3 + $0xe0] sm:$0xff] %vm1033_vm5, %v994_v0  ;;  %v1471_v0 = vld [vmem:[#allocation2 + $0x108] sm:$0xff] }
 0x14a   : > { %1345 = vrot.lane.b32.xlu0 %v1848_v11, %s5480_s15  ;;  %v404_v11 = vld [vmem:[#allocation2 + $0x1a7] sm:$0x1] }
 0x14b   : > { %v996_v57 = vpop.permute.xlu1 %995  ;;  %422 = vst.msk [vmem:[#allocation2 + $0x1a9] sm:$0x1] %vm368_vm1, %v404_v11  ;;  %v1670_v11 = vld [vmem:[#allocation2 + $0x151] sm:$0xff] }
 0x14c   : > { %1063 = vst.msk [vmem:[#allocation3 + $0xe8] sm:$0xff] %vm1033_vm5, %v996_v57  ;;  %v998_v5 = vpop.permute.xlu0 %997 }
 0x14d   : > { %1537 = vrot.lane.b32.xlu1 %v5867_v62, %s5481_s20  ;;  %1064 = vst.msk [vmem:[#allocation3 + $0xf0] sm:$0xff] %vm1033_vm5, %v998_v5  ;;  %v1664_v5 = vld [vmem:[#allocation2 + $0x109] sm:$0xff] }
 0x14e   : > { %1539 = vrot.lane.b32.xlu0 %v5810_v61, %s5481_s20  ;;  %v1850_v61 = vld [vmem:[#allocation2 + $0xb2] sm:$0xff] }
 0x14f   : > { %v1000_v59 = vpop.permute.xlu1 %999 }
 0x150   : > { %1065 = vst.msk [vmem:[#allocation3 + $0xf8] sm:$0xff] %vm1033_vm5, %v1000_v59  ;;  %v1131_v2 = vpop.permute.xlu0 %1130 }
 0x151   : > { %1730 = vrot.lane.b32.xlu1 %v1656_v15, %s5482_s21  ;;  %1227 = vst.msk [vmem:[#allocation3] sm:$0xff] %vm1226_vm6, %v1131_v2  ;;  %v1665_v2 = vld [vmem:[#allocation2 + $0x111] sm:$0xff] }
 0x152   : > { %1732 = vrot.lane.b32.xlu0 %v1657_v3, %s5482_s21 }
 0x153   : > { %v1133_v17 = vpop.permute.xlu1 %1132 }
 0x154   : > { %1228 = vst.msk [vmem:[#allocation3 + $0x8] sm:$0xff] %vm1226_vm6, %v1133_v17  ;;  %v1135_v4 = vpop.permute.xlu0 %1134 }
 0x155   : > { %1923 = vrot.lane.b32.xlu1 %v1849_v39, %s5483_s27  ;;  %1229 = vst.msk [vmem:[#allocation3 + $0x10] sm:$0xff] %vm1226_vm6, %v1135_v4 }
 0x156   : > { %1156 = vrot.lane.b32.xlu0 %v1657_v3, %s5479_s10 }
 0x157   : > { %v1137_v62 = vpop.permute.xlu1 %1136 }
 0x158   : > { %1230 = vst.msk [vmem:[#allocation3 + $0x18] sm:$0xff] %vm1226_vm6, %v1137_v62  ;;  %v1139_v23 = vpop.permute.xlu0 %1138  ;;  %v1857_v62 = vld [vmem:[#allocation2 + $0x10a] sm:$0xff] }
 0x159   : > { %1347 = vrot.lane.b32.xlu1 %v1849_v39, %s5480_s15  ;;  %1231 = vst.msk [vmem:[#allocation3 + $0x20] sm:$0xff] %vm1226_vm6, %v1139_v23 }
 0x15a   : > { %1925 = vrot.lane.b32.xlu0 %v1850_v61, %s5483_s27 }
 0x15b   : > { %v1141_v38 = vpop.permute.xlu1 %1140 }
 0x15c   : > { %1232 = vst.msk [vmem:[#allocation3 + $0x28] sm:$0xff] %vm1226_vm6, %v1141_v38  ;;  %v1143_v20 = vpop.permute.xlu0 %1142 }
 0x15d   : > { %1349 = vrot.lane.b32.xlu1 %v1850_v61, %s5480_s15  ;;  %1233 = vst.msk [vmem:[#allocation3 + $0x30] sm:$0xff] %vm1226_vm6, %v1143_v20 }
 0x15e   : > { %1541 = vrot.lane.b32.xlu0 %v5875_v31, %s5481_s20 }
 0x15f   : > { %v1145_v10 = vpop.permute.xlu1 %1144 }
 0x160   : > { %1234 = vst.msk [vmem:[#allocation3 + $0x38] sm:$0xff] %vm1226_vm6, %v1145_v10  ;;  %v1147_v33 = vpop.permute.xlu0 %1146  ;;  %v1858_v10 = vld [vmem:[#allocation2 + $0x112] sm:$0xff] }
 0x161   : > { %1543 = vrot.lane.b32.xlu1 %v5815_v26, %s5481_s20  ;;  %1235 = vst.msk [vmem:[#allocation3 + $0x40] sm:$0xff] %vm1226_vm6, %v1147_v33  ;;  %v1474_v33 = vld [vmem:[#allocation2 + $0x128] sm:$0xff] }
 0x162   : > { %1734 = vrot.lane.b32.xlu0 %v1658_v37, %s5482_s21 }
 0x163   : > { %v1149_v24 = vpop.permute.xlu1 %1148 }
 0x164   : > { %1236 = vst.msk [vmem:[#allocation3 + $0x48] sm:$0xff] %vm1226_vm6, %v1149_v24  ;;  %v1151_v55 = vpop.permute.xlu0 %1150  ;;  %v1473_v24 = vld [vmem:[#allocation2 + $0x120] sm:$0xff] }
 0x165   : > { %1158 = vrot.lane.b32.xlu1 %v1658_v37, %s5479_s10  ;;  %1237 = vst.msk [vmem:[#allocation3 + $0x50] sm:$0xff] %vm1226_vm6, %v1151_v55  ;;  %v1666_v55 = vld [vmem:[#allocation2 + $0x121] sm:$0xff] }
 0x166   : > { %1736 = vrot.lane.b32.xlu0 %v1659_v14, %s5482_s21 }
 0x167   : > { %v1153_v8 = vpop.permute.xlu1 %1152 }
 0x168   : > { %1238 = vst.msk [vmem:[#allocation3 + $0x58] sm:$0xff] %vm1226_vm6, %v1153_v8  ;;  %v1155_v26 = vpop.permute.xlu0 %1154 }
 0x169   : > { %1927 = vrot.lane.b32.xlu1 %v1851_v9, %s5483_s27  ;;  %1239 = vst.msk [vmem:[#allocation3 + $0x60] sm:$0xff] %vm1226_vm6, %v1155_v26 }
 0x16a   : > { %1160 = vrot.lane.b32.xlu0 %v1659_v14, %s5479_s10 }
 0x16b   : > { %v1324_v31 = vpop.permute.xlu1 %1323 }
 0x16c   : > { %1420 = vst.msk [vmem:[#allocation3] sm:$0xff] %vm1419_vm7, %v1324_v31  ;;  %v1326_v19 = vpop.permute.xlu0 %1325 }
 0x16d   : > { %1351 = vrot.lane.b32.xlu1 %v1851_v9, %s5480_s15  ;;  %1421 = vst.msk [vmem:[#allocation3 + $0x8] sm:$0xff] %vm1419_vm7, %v1326_v19  ;;  %v1859_v19 = vld [vmem:[#allocation2 + $0x122] sm:$0xff] }
 0x16e   : > { %1929 = vrot.lane.b32.xlu0 %v1852_v13, %s5483_s27 }
 0x16f   : > { %v1518_v42 = vpop.permute.xlu1 %1517 }
 0x170   : > { %1614 = vst.msk [vmem:[#allocation3] sm:$0xff] %vm1613_vm8, %v1518_v42  ;;  %v1520_v34 = vpop.permute.xlu0 %1519  ;;  %v1667_v42 = vld [vmem:[#allocation2 + $0x129] sm:$0xff] }
 0x171   : > { %1353 = vrot.lane.b32.xlu1 %v1852_v13, %s5480_s15  ;;  %1615 = vst.msk [vmem:[#allocation3 + $0x8] sm:$0xff] %vm1613_vm8, %v1520_v34 }
 0x172   : > { %1545 = vrot.lane.b32.xlu0 %v5879_v45, %s5481_s20 }
 0x173   : > { %v1711_v46 = vpop.permute.xlu1 %1710 }
 0x174   : > { %1807 = vst.msk [vmem:[#allocation3] sm:$0xff] %vm1806_vm9, %v1711_v46  ;;  %v1713_v7 = vpop.permute.xlu0 %1712 }
 0x175   : > { %1547 = vrot.lane.b32.xlu1 %v5822_v41, %s5481_s20  ;;  %1808 = vst.msk [vmem:[#allocation3 + $0x8] sm:$0xff] %vm1806_vm9, %v1713_v7  ;;  %v1860_v7 = vld [vmem:[#allocation2 + $0x12a] sm:$0xff] }
 0x176   : > { %1738 = vrot.lane.b32.xlu0 %v1660_v36, %s5482_s21 }
 0x177   : > { %v1904_v12 = vpop.permute.xlu1 %1903 }
 0x178   : > { %2000 = vst.msk [vmem:[#allocation3] sm:$0xff] %vm1999_vm10, %v1904_v12  ;;  %v1328_v47 = vpop.permute.xlu0 %1327 }
 0x179   : > { %1162 = vrot.lane.b32.xlu1 %v1660_v36, %s5479_s10  ;;  %1422 = vst.msk [vmem:[#allocation3 + $0x10] sm:$0xff] %vm1419_vm7, %v1328_v47  ;;  %v1475_v47 = vld [vmem:[#allocation2 + $0x138] sm:$0xff] }
 0x17a   : > { %1740 = vrot.lane.b32.xlu0 %v1661_v63, %s5482_s21 }
 0x17b   : > { %v1906_v21 = vpop.permute.xlu1 %1905 }
 0x17c   : > { %2001 = vst.msk [vmem:[#allocation3 + $0x8] sm:$0xff] %vm1999_vm10, %v1906_v21  ;;  %v1330_v45 = vpop.permute.xlu0 %1329 }
 0x17d   : > { %1931 = vrot.lane.b32.xlu1 %v1853_v60, %s5483_s27  ;;  %1423 = vst.msk [vmem:[#allocation3 + $0x18] sm:$0xff] %vm1419_vm7, %v1330_v45 }
 0x17e   : > { %1164 = vrot.lane.b32.xlu0 %v1661_v63, %s5479_s10 }
 0x17f   : > { %v1522_v41 = vpop.permute.xlu1 %1521  ;;  %v2032_v25 = vld [vmem:[#allocation3] sm:$0xff] }
 0x180   : > { %1616 = vst.msk [vmem:[#allocation3 + $0x10] sm:$0xff] %vm1613_vm8, %v1522_v41  ;;  %5326 = vmatprep.mubr.msk.f32.mxu0 %vm2069_vm11, %v2032_v25  ;;  %v1524_v29 = vpop.permute.xlu0 %1523  ;;  %v1476_v41 = vld [vmem:[#allocation2 + $0x140] sm:$0xff] }
 0x181   : > { %1355 = vrot.lane.b32.xlu1 %v1853_v60, %s5480_s15  ;;  %1617 = vst.msk [vmem:[#allocation3 + $0x18] sm:$0xff] %vm1613_vm8, %v1524_v29 }
 0x182   : > { %1933 = vrot.lane.b32.xlu0 %v1854_v27, %s5483_s27 }
 0x183   : > { %v1715_v28 = vpop.permute.xlu1 %1714  ;;  %v2033_v22 = vld [vmem:[#allocation3 + $0x8] sm:$0xff] }
 0x184   : > { %1809 = vst.msk [vmem:[#allocation3 + $0x10] sm:$0xff] %vm1806_vm9, %v1715_v28  ;;  %5327 = vmatmul.mubr.msk.f32.vlgmr.msra.gmra.mrb[0].mxu0 %vm2069_vm11, %v2033_v22  ;;  %v1717_v32 = vpop.permute.xlu0 %1716  ;;  %v1668_v28 = vld [vmem:[#allocation2 + $0x139] sm:$0xff] }
 0x185   : > { %1357 = vrot.lane.b32.xlu1 %v1854_v27, %s5480_s15  ;;  %1810 = vst.msk [vmem:[#allocation3 + $0x18] sm:$0xff] %vm1806_vm9, %v1717_v32  ;;  %v1861_v32 = vld [vmem:[#allocation2 + $0x13a] sm:$0xff] }
 0x186   : > { %1549 = vrot.lane.b32.xlu0 %v5885_v35, %s5481_s20  ;;  %v1663_v35 = vld [vmem:[#allocation2 + $0xf9] sm:$0xff] }
 0x187   : > { %v1908_v30 = vpop.permute.xlu1 %1907 }
 0x188   : > { %2002 = vst.msk [vmem:[#allocation3 + $0x10] sm:$0xff] %vm1999_vm10, %v1908_v30  ;;  %v1332_v43 = vpop.permute.xlu0 %1331  ;;  %v1669_v30 = vld [vmem:[#allocation2 + $0x141] sm:$0xff] }
 0x189   : > { %1551 = vrot.lane.b32.xlu1 %v5829_v52, %s5481_s20  ;;  %1424 = vst.msk [vmem:[#allocation3 + $0x20] sm:$0xff] %vm1419_vm7, %v1332_v43 }
 0x18a   : > { %1742 = vrot.lane.b32.xlu0 %v1662_v18, %s5482_s21 }
 0x18b   : > { %v1910_v51 = vpop.permute.xlu1 %1909 }
 0x18c   : > { %2003 = vst.msk [vmem:[#allocation3 + $0x18] sm:$0xff] %vm1999_vm10, %v1910_v51  ;;  %v1334_v52 = vpop.permute.xlu0 %1333 }
 0x18d   : > { %1166 = vrot.lane.b32.xlu1 %v1662_v18, %s5479_s10  ;;  %1425 = vst.msk [vmem:[#allocation3 + $0x28] sm:$0xff] %vm1419_vm7, %v1334_v52  ;;  %v1477_v52 = vld [vmem:[#allocation2 + $0x150] sm:$0xff] }
 0x18e   : > { %1744 = vrot.lane.b32.xlu0 %v1663_v35, %s5482_s21 }
 0x18f   : > { %v1526_v49 = vpop.permute.xlu1 %1525  ;;  %v2034_v16 = vld [vmem:[#allocation3 + $0x10] sm:$0xff] }
 0x190   : > { %1618 = vst.msk [vmem:[#allocation3 + $0x20] sm:$0xff] %vm1613_vm8, %v1526_v49  ;;  %5329 = vmatprep.mubr.msk.f32.mxu0 %vm2069_vm11, %v2034_v16  ;;  %v1528_v53 = vpop.permute.xlu0 %1527  ;;  %v1478_v16 = vld [vmem:[#allocation2 + $0x158] sm:$0xff] }
 0x191   : > { %1935 = vrot.lane.b32.xlu1 %v1855_v50, %s5483_s27  ;;  %1619 = vst.msk [vmem:[#allocation3 + $0x28] sm:$0xff] %vm1613_vm8, %v1528_v53 }
 0x192   : > { %1168 = vrot.lane.b32.xlu0 %v1663_v35, %s5479_s10  ;;  %v1862_v35 = vld [vmem:[#allocation2 + $0x142] sm:$0xff] }
 0x193   : > { %v1719_v56 = vpop.permute.xlu1 %1718  ;;  %v2035_v54 = vld [vmem:[#allocation3 + $0x18] sm:$0xff] }
 0x194   : > { %1811 = vst.msk [vmem:[#allocation3 + $0x20] sm:$0xff] %vm1806_vm9, %v1719_v56  ;;  %5330 = vmatmul.mubr.msk.f32.gmra.mrb[2].mxu0 %vm2069_vm11, %v2035_v54  ;;  %v1721_v57 = vpop.permute.xlu0 %1720 }
 0x195   : > { %1359 = vrot.lane.b32.xlu1 %v1855_v50, %s5480_s15  ;;  %1812 = vst.msk [vmem:[#allocation3 + $0x28] sm:$0xff] %vm1806_vm9, %v1721_v57  ;;  %v1671_v57 = vld [vmem:[#allocation2 + $0x159] sm:$0xff] }
 0x196   : > { %1937 = vrot.lane.b32.xlu0 %v1856_v48, %s5483_s27 }
 0x197   : > { %v1912_v6 = vpop.permute.xlu1 %1911 }
 0x198   : > { %2004 = vst.msk [vmem:[#allocation3 + $0x20] sm:$0xff] %vm1999_vm10, %v1912_v6  ;;  %v1336_v59 = vpop.permute.xlu0 %1335 }
 0x199   : > { %1361 = vrot.lane.b32.xlu1 %v1856_v48, %s5480_s15  ;;  %1426 = vst.msk [vmem:[#allocation3 + $0x30] sm:$0xff] %vm1419_vm7, %v1336_v59 }
 0x19a   : > { %1553 = vrot.lane.b32.xlu0 %v1471_v0, %s5481_s20  ;;  %v1863_v0 = vld [vmem:[#allocation2 + $0x152] sm:$0xff] }
 0x19b   : > { %v1914_v15 = vpop.permute.xlu1 %1913 }
 0x19c   : > { %2005 = vst.msk [vmem:[#allocation3 + $0x28] sm:$0xff] %vm1999_vm10, %v1914_v15  ;;  %v1338_v39 = vpop.permute.xlu0 %1337 }
 0x19d   : > { %1555 = vrot.lane.b32.xlu1 %v5847_v58, %s5481_s20  ;;  %1427 = vst.msk [vmem:[#allocation3 + $0x38] sm:$0xff] %vm1419_vm7, %v1338_v39 }
 0x19e   : > { %1746 = vrot.lane.b32.xlu0 %v1664_v5, %s5482_s21 }
 0x19f   : > { %v1530_v3 = vpop.permute.xlu1 %1529  ;;  %v2036_v17 = vld [vmem:[#allocation3 + $0x20] sm:$0xff] }
 0x1a0   : > { %1620 = vst.msk [vmem:[#allocation3 + $0x30] sm:$0xff] %vm1613_vm8, %v1530_v3  ;;  %5332 = vmatprep.mubr.msk.f32.mxu0 %vm2069_vm11, %v2036_v17  ;;  %v1532_v61 = vpop.permute.xlu0 %1531  ;;  %v1864_v17 = vld [vmem:[#allocation2 + $0x15a] sm:$0xff] }
 0x1a1   : > { %1170 = vrot.lane.b32.xlu1 %v1664_v5, %s5479_s10  ;;  %1621 = vst.msk [vmem:[#allocation3 + $0x38] sm:$0xff] %vm1613_vm8, %v1532_v61  ;;  %v1480_v61 = vld [vmem:[#allocation2 + $0x170] sm:$0xff] }
 0x1a2   : > { %1748 = vrot.lane.b32.xlu0 %v1665_v2, %s5482_s21 }
 0x1a3   : > { %v1723_v4 = vpop.permute.xlu1 %1722  ;;  %v2037_v38 = vld [vmem:[#allocation3 + $0x28] sm:$0xff] }
 0x1a4   : > { %1813 = vst.msk [vmem:[#allocation3 + $0x30] sm:$0xff] %vm1806_vm9, %v1723_v4  ;;  %5333 = vmatmul.mubr.msk.f32.gmra.mrb[4].mxu0 %vm2069_vm11, %v2037_v38  ;;  %v1725_v23 = vpop.permute.xlu0 %1724  ;;  %v1479_v4 = vld [vmem:[#allocation2 + $0x168] sm:$0xff] }
 0x1a5   : > { %1939 = vrot.lane.b32.xlu1 %v1857_v62, %s5483_s27  ;;  %1814 = vst.msk [vmem:[#allocation3 + $0x38] sm:$0xff] %vm1806_vm9, %v1725_v23 }
 0x1a6   : > { %1172 = vrot.lane.b32.xlu0 %v1665_v2, %s5479_s10 }
 0x1a7   : > { %v1916_v58 = vpop.permute.xlu1 %1915 }
 0x1a8   : > { %2006 = vst.msk [vmem:[#allocation3 + $0x30] sm:$0xff] %vm1999_vm10, %v1916_v58  ;;  %v1340_v37 = vpop.permute.xlu0 %1339 }
 0x1a9   : > { %1363 = vrot.lane.b32.xlu1 %v1857_v62, %s5480_s15  ;;  %1428 = vst.msk [vmem:[#allocation3 + $0x40] sm:$0xff] %vm1419_vm7, %v1340_v37 }
 0x1aa   : > { %1941 = vrot.lane.b32.xlu0 %v1858_v10, %s5483_s27 }
 0x1ab   : > { %v1918_v20 = vpop.permute.xlu1 %1917 }
 0x1ac   : > { %2007 = vst.msk [vmem:[#allocation3 + $0x38] sm:$0xff] %vm1999_vm10, %v1918_v20  ;;  %v1342_v9 = vpop.permute.xlu0 %1341 }
 0x1ad   : > { %1365 = vrot.lane.b32.xlu1 %v1858_v10, %s5480_s15  ;;  %1429 = vst.msk [vmem:[#allocation3 + $0x48] sm:$0xff] %vm1419_vm7, %v1342_v9  ;;  %v1672_v10 = vld [vmem:[#allocation2 + $0x169] sm:$0xff] }
 0x1ae   : > { %1557 = vrot.lane.b32.xlu0 %v1473_v24, %s5481_s20  ;;  %v1673_v24 = vld [vmem:[#allocation2 + $0x171] sm:$0xff] }
 0x1af   : > { %v1534_v14 = vpop.permute.xlu1 %1533  ;;  %v2038_v8 = vld [vmem:[#allocation3 + $0x30] sm:$0xff] }
 0x1b0   : > { %1622 = vst.msk [vmem:[#allocation3 + $0x40] sm:$0xff] %vm1613_vm8, %v1534_v14  ;;  %5335 = vmatprep.mubr.msk.f32.mxu0 %vm2069_vm11, %v2038_v8  ;;  %v1536_v26 = vpop.permute.xlu0 %1535 }
 0x1b1   : > { %1559 = vrot.lane.b32.xlu1 %v1474_v33, %s5481_s20  ;;  %1623 = vst.msk [vmem:[#allocation3 + $0x48] sm:$0xff] %vm1613_vm8, %v1536_v26  ;;  %v1865_v33 = vld [vmem:[#allocation2 + $0x16a] sm:$0xff]  ;;  %v1866_v26 = vld [vmem:[#allocation2 + $0x172] sm:$0xff] }
 0x1b2   : > { %1750 = vrot.lane.b32.xlu0 %v1666_v55, %s5482_s21 }
 0x1b3   : > { %v1727_v31 = vpop.permute.xlu1 %1726  ;;  %v2039_v13 = vld [vmem:[#allocation3 + $0x38] sm:$0xff] }
 0x1b4   : > { %1815 = vst.msk [vmem:[#allocation3 + $0x40] sm:$0xff] %vm1806_vm9, %v1727_v31  ;;  %5336 = vmatmul.mubr.msk.f32.gmra.mrb[6].mxu0 %vm2069_vm11, %v2039_v13  ;;  %v1729_v34 = vpop.permute.xlu0 %1728 }
 0x1b5   : > { %1174 = vrot.lane.b32.xlu1 %v1666_v55, %s5479_s10  ;;  %1816 = vst.msk [vmem:[#allocation3 + $0x48] sm:$0xff] %vm1806_vm9, %v1729_v34 }
 0x1b6   : > { %1752 = vrot.lane.b32.xlu0 %v1667_v42, %s5482_s21 }
 0x1b7   : > { %v1920_v46 = vpop.permute.xlu1 %1919 }
 0x1b8   : > { %2008 = vst.msk [vmem:[#allocation3 + $0x40] sm:$0xff] %vm1999_vm10, %v1920_v46  ;;  %v1344_v12 = vpop.permute.xlu0 %1343  ;;  %v1482_v46 = vld [vmem:[#allocation2 + $0x188] sm:$0xff] }
 0x1b9   : > { %1943 = vrot.lane.b32.xlu1 %v1859_v19, %s5483_s27  ;;  %1430 = vst.msk [vmem:[#allocation3 + $0x50] sm:$0xff] %vm1419_vm7, %v1344_v12 }
 0x1ba   : > { %1176 = vrot.lane.b32.xlu0 %v1667_v42, %s5479_s10 }
 0x1bb   : > { %v1922_v36 = vpop.permute.xlu1 %1921 }
 0x1bc   : > { %2009 = vst.msk [vmem:[#allocation3 + $0x48] sm:$0xff] %vm1999_vm10, %v1922_v36  ;;  %v1346_v63 = vpop.permute.xlu0 %1345 }
 0x1bd   : > { %1367 = vrot.lane.b32.xlu1 %v1859_v19, %s5480_s15  ;;  %1431 = vst.msk [vmem:[#allocation3 + $0x58] sm:$0xff] %vm1419_vm7, %v1346_v63  ;;  %v1481_v19 = vld [vmem:[#allocation2 + $0x180] sm:$0xff] }
 0x1be   : > { %1945 = vrot.lane.b32.xlu0 %v1860_v7, %s5483_s27 }
 0x1bf   : > { %v1538_v60 = vpop.permute.xlu1 %1537  ;;  %v2040_v21 = vld [vmem:[#allocation3 + $0x40] sm:$0xff] }
 0x1c0   : > { %1624 = vst.msk [vmem:[#allocation3 + $0x50] sm:$0xff] %vm1613_vm8, %v1538_v60  ;;  %5338 = vmatprep.mubr.msk.f32.mxu0 %vm2069_vm11, %v2040_v21  ;;  %v1540_v45 = vpop.permute.xlu0 %1539  ;;  %v1675_v21 = vld [vmem:[#allocation2 + $0x189] sm:$0xff] }
 0x1c1   : > { %1369 = vrot.lane.b32.xlu1 %v1860_v7, %s5480_s15  ;;  %1625 = vst.msk [vmem:[#allocation3 + $0x58] sm:$0xff] %vm1613_vm8, %v1540_v45  ;;  %v1674_v7 = vld [vmem:[#allocation2 + $0x181] sm:$0xff] }
 0x1c2   : > { %1561 = vrot.lane.b32.xlu0 %v1475_v47, %s5481_s20  ;;  %v1867_v47 = vld [vmem:[#allocation2 + $0x182] sm:$0xff] }
 0x1c3   : > { %v1731_v25 = vpop.permute.xlu1 %1730  ;;  %v2041_v27 = vld [vmem:[#allocation3 + $0x48] sm:$0xff] }
 0x1c4   : > { %1817 = vst.msk [vmem:[#allocation3 + $0x50] sm:$0xff] %vm1806_vm9, %v1731_v25  ;;  %5339 = vmatmul.mubr.msk.f32.gmra.mrb[8].mxu0 %vm2069_vm11, %v2041_v27  ;;  %v1733_v29 = vpop.permute.xlu0 %1732 }
 0x1c5   : > { %1563 = vrot.lane.b32.xlu1 %v1476_v41, %s5481_s20  ;;  %1818 = vst.msk [vmem:[#allocation3 + $0x58] sm:$0xff] %vm1806_vm9, %v1733_v29  ;;  %v1868_v29 = vld [vmem:[#allocation2 + $0x18a] sm:$0xff] }
 0x1c6   : > { %1754 = vrot.lane.b32.xlu0 %v1668_v28, %s5482_s21 }
 0x1c7   : > { %v1924_v22 = vpop.permute.xlu1 %1923 }
 0x1c8   : > { %2010 = vst.msk [vmem:[#allocation3 + $0x50] sm:$0xff] %vm1999_vm10, %v1924_v22  ;;  %v1157_v40 = vpop.permute.xlu0 %1156 }
 0x1c9   : > { %1178 = vrot.lane.b32.xlu1 %v1668_v28, %s5479_s10  ;;  %1240 = vst.msk [vmem:[#allocation3 + $0x68] sm:$0xff] %vm1226_vm6, %v1157_v40  ;;  %v1484_v40 = vld [vmem:[#allocation2 + $0x1a0] sm:$0xff] }
 0x1ca   : > { %1756 = vrot.lane.b32.xlu0 %v1669_v30, %s5482_s21 }
 0x1cb   : > { %v1348_v18 = vpop.permute.xlu1 %1347 }
 0x1cc   : > { %1432 = vst.msk [vmem:[#allocation3 + $0x60] sm:$0xff] %vm1419_vm7, %v1348_v18  ;;  %v1926_v51 = vpop.permute.xlu0 %1925 }
 0x1cd   : > { %1947 = vrot.lane.b32.xlu1 %v1861_v32, %s5483_s27  ;;  %2011 = vst.msk [vmem:[#allocation3 + $0x58] sm:$0xff] %vm1999_vm10, %v1926_v51 }
 0x1ce   : > { %1180 = vrot.lane.b32.xlu0 %v1669_v30, %s5479_s10 }
 0x1cf   : > { %v1350_v43 = vpop.permute.xlu1 %1349  ;;  %v2042_v44 = vld [vmem:[#allocation3 + $0x50] sm:$0xff] }
 0x1d0   : > { %1433 = vst.msk [vmem:[#allocation3 + $0x68] sm:$0xff] %vm1419_vm7, %v1350_v43  ;;  %5341 = vmatprep.mubr.msk.f32.mxu0 %vm2069_vm11, %v2042_v44  ;;  %v1542_v50 = vpop.permute.xlu0 %1541  ;;  %v1676_v44 = vld [vmem:[#allocation2 + $0x199] sm:$0xff] }
 0x1d1   : > { %1371 = vrot.lane.b32.xlu1 %v1861_v32, %s5480_s15  ;;  %1626 = vst.msk [vmem:[#allocation3 + $0x60] sm:$0xff] %vm1613_vm8, %v1542_v50  ;;  %v1483_v32 = vld [vmem:[#allocation2 + $0x198] sm:$0xff] }
 0x1d2   : > { %1949 = vrot.lane.b32.xlu0 %v1862_v35, %s5483_s27 }
 0x1d3   : > { %v1544_v49 = vpop.permute.xlu1 %1543 }
 0x1d4   : > { %1627 = vst.msk [vmem:[#allocation3 + $0x68] sm:$0xff] %vm1613_vm8, %v1544_v49  ;;  %v1735_v56 = vpop.permute.xlu0 %1734  ;;  %v2043_v54 = vld [vmem:[#allocation3 + $0x58] sm:$0xff] }
 0x1d5   : > { %1373 = vrot.lane.b32.xlu1 %v1862_v35, %s5480_s15  ;;  %1819 = vst.msk [vmem:[#allocation3 + $0x60] sm:$0xff] %vm1806_vm9, %v1735_v56  ;;  %5342 = vmatmul.mubr.msk.f32.gmra.mrb[10].mxu0 %vm2069_vm11, %v2043_v54  ;;  %v1677_v35 = vld [vmem:[#allocation2 + $0x1a1] sm:$0xff] }
 0x1d6   : > { %1565 = vrot.lane.b32.xlu0 %v1477_v52, %s5481_s20  ;;  %v1869_v52 = vld [vmem:[#allocation2 + $0x19a] sm:$0xff] }
 0x1d7   : > { %v1159_v53 = vpop.permute.xlu1 %1158 }
 0x1d8   : > { %1241 = vst.msk [vmem:[#allocation3 + $0x70] sm:$0xff] %vm1226_vm6, %v1159_v53  ;;  %v1737_v48 = vpop.permute.xlu0 %1736 }
 0x1d9   : > { %1567 = vrot.lane.b32.xlu1 %v1478_v16, %s5481_s20  ;;  %1820 = vst.msk [vmem:[#allocation3 + $0x68] sm:$0xff] %vm1806_vm9, %v1737_v48  ;;  %v1870_v16 = vld [vmem:[#allocation2 + $0x1a2] sm:$0xff] }
 0x1da   : > { %1758 = vrot.lane.b32.xlu0 %v1670_v11, %s5482_s21 }
 0x1db   : > { %v1928_v6 = vpop.permute.xlu1 %1927 }
 0x1dc   : > { %2012 = vst.msk [vmem:[#allocation3 + $0x60] sm:$0xff] %vm1999_vm10, %v1928_v6  ;;  %v1161_v15 = vpop.permute.xlu0 %1160 }
 0x1dd   : > { %1182 = vrot.lane.b32.xlu1 %v1670_v11, %s5479_s10  ;;  %1242 = vst.msk [vmem:[#allocation3 + $0x78] sm:$0xff] %vm1226_vm6, %v1161_v15 }
 0x1de   : > { %1760 = vrot.lane.b32.xlu0 %v1671_v57, %s5482_s21 }
 0x1df   : > { %v1352_v59 = vpop.permute.xlu1 %1351 }
 0x1e0   : > { %1434 = vst.msk [vmem:[#allocation3 + $0x70] sm:$0xff] %vm1419_vm7, %v1352_v59  ;;  %v1930_v5 = vpop.permute.xlu0 %1929 }
 0x1e1   : > { %1951 = vrot.lane.b32.xlu1 %v1863_v0, %s5483_s27  ;;  %2013 = vst.msk [vmem:[#allocation3 + $0x68] sm:$0xff] %vm1999_vm10, %v1930_v5 }
 0x1e2   : > { %1184 = vrot.lane.b32.xlu0 %v1671_v57, %s5479_s10 }
 0x1e3   : > { %v1354_v3 = vpop.permute.xlu1 %1353  ;;  %v2044_v39 = vld [vmem:[#allocation3 + $0x60] sm:$0xff] }
 0x1e4   : > { %1435 = vst.msk [vmem:[#allocation3 + $0x78] sm:$0xff] %vm1419_vm7, %v1354_v3  ;;  %5344 = vmatprep.mubr.msk.f32.mxu0 %vm2069_vm11, %v2044_v39  ;;  %v1546_v2 = vpop.permute.xlu0 %1545 }
 0x1e5   : > { %1375 = vrot.lane.b32.xlu1 %v1863_v0, %s5480_s15  ;;  %1628 = vst.msk [vmem:[#allocation3 + $0x70] sm:$0xff] %vm1613_vm8, %v1546_v2 }
 0x1e6   : > { %1953 = vrot.lane.b32.xlu0 %v1864_v17, %s5483_s27 }
 0x1e7   : > { %v1548_v62 = vpop.permute.xlu1 %1547 }
 0x1e8   : > { %1629 = vst.msk [vmem:[#allocation3 + $0x78] sm:$0xff] %vm1613_vm8, %v1548_v62  ;;  %v1739_v38 = vpop.permute.xlu0 %1738  ;;  %v2045_v23 = vld [vmem:[#allocation3 + $0x68] sm:$0xff] }
 0x1e9   : > { %1377 = vrot.lane.b32.xlu1 %v1864_v17, %s5480_s15  ;;  %1821 = vst.msk [vmem:[#allocation3 + $0x70] sm:$0xff] %vm1806_vm9, %v1739_v38  ;;  %5345 = vmatmul.mubr.msk.f32.gmra.mrb[12].mxu0 %vm2069_vm11, %v2045_v23 }
 0x1ea   : > { %1569 = vrot.lane.b32.xlu0 %v1479_v4, %s5481_s20 }
 0x1eb   : > { %v1163_v58 = vpop.permute.xlu1 %1162 }
 0x1ec   : > { %1243 = vst.msk [vmem:[#allocation3 + $0x80] sm:$0xff] %vm1226_vm6, %v1163_v58  ;;  %v1741_v20 = vpop.permute.xlu0 %1740 }
 0x1ed   : > { %1571 = vrot.lane.b32.xlu1 %v1480_v61, %s5481_s20  ;;  %1822 = vst.msk [vmem:[#allocation3 + $0x78] sm:$0xff] %vm1806_vm9, %v1741_v20 }
 0x1ee   : > { %1762 = vrot.lane.b32.xlu0 %v1672_v10, %s5482_s21 }
 0x1ef   : > { %v1932_v37 = vpop.permute.xlu1 %1931 }
 0x1f0   : > { %2014 = vst.msk [vmem:[#allocation3 + $0x70] sm:$0xff] %vm1999_vm10, %v1932_v37  ;;  %v1165_v14 = vpop.permute.xlu0 %1164 }
 0x1f1   : > { %1186 = vrot.lane.b32.xlu1 %v1672_v10, %s5479_s10  ;;  %1244 = vst.msk [vmem:[#allocation3 + $0x88] sm:$0xff] %vm1226_vm6, %v1165_v14 }
 0x1f2   : > { %1764 = vrot.lane.b32.xlu0 %v1673_v24, %s5482_s21 }
 0x1f3   : > { %v1356_v9 = vpop.permute.xlu1 %1355 }
 0x1f4   : > { %1436 = vst.msk [vmem:[#allocation3 + $0x80] sm:$0xff] %vm1419_vm7, %v1356_v9  ;;  %v1934_v8 = vpop.permute.xlu0 %1933 }
 0x1f5   : > { %1955 = vrot.lane.b32.xlu1 %v1865_v33, %s5483_s27  ;;  %2015 = vst.msk [vmem:[#allocation3 + $0x78] sm:$0xff] %vm1999_vm10, %v1934_v8 }
 0x1f6   : > { %1188 = vrot.lane.b32.xlu0 %v1673_v24, %s5479_s10 }
 0x1f7   : > { %v1358_v55 = vpop.permute.xlu1 %1357  ;;  %v2046_v31 = vld [vmem:[#allocation3 + $0x70] sm:$0xff] }
 0x1f8   : > { %1437 = vst.msk [vmem:[#allocation3 + $0x88] sm:$0xff] %vm1419_vm7, %v1358_v55  ;;  %5347 = vmatprep.mubr.msk.f32.mxu0 %vm2069_vm11, %v2046_v31  ;;  %v1550_v13 = vpop.permute.xlu0 %1549 }
 0x1f9   : > { %1379 = vrot.lane.b32.xlu1 %v1865_v33, %s5480_s15  ;;  %1630 = vst.msk [vmem:[#allocation3 + $0x80] sm:$0xff] %vm1613_vm8, %v1550_v13 }
 0x1fa   : > { %1957 = vrot.lane.b32.xlu0 %v1866_v26, %s5483_s27 }
 0x1fb   : > { %v1552_v42 = vpop.permute.xlu1 %1551 }
 0x1fc   : > { %1631 = vst.msk [vmem:[#allocation3 + $0x88] sm:$0xff] %vm1613_vm8, %v1552_v42  ;;  %v1743_v34 = vpop.permute.xlu0 %1742  ;;  %v2047_v12 = vld [vmem:[#allocation3 + $0x78] sm:$0xff] }
 0x1fd   : > { %1381 = vrot.lane.b32.xlu1 %v1866_v26, %s5480_s15  ;;  %1823 = vst.msk [vmem:[#allocation3 + $0x80] sm:$0xff] %vm1806_vm9, %v1743_v34  ;;  %5348 = vmatmul.mubr.msk.f32.gmra.mrb[14].mxu0 %vm2069_vm11, %v2047_v12 }
 0x1fe   : > { %1573 = vrot.lane.b32.xlu0 %v1481_v19, %s5481_s20 }
 0x1ff   : > { %v1167_v36 = vpop.permute.xlu1 %1166 }
 0x200   : > { %1245 = vst.msk [vmem:[#allocation3 + $0x90] sm:$0xff] %vm1226_vm6, %v1167_v36  ;;  %v1745_v63 = vpop.permute.xlu0 %1744 }
 0x201   : > { %1575 = vrot.lane.b32.xlu1 %v1482_v46, %s5481_s20  ;;  %1824 = vst.msk [vmem:[#allocation3 + $0x88] sm:$0xff] %vm1806_vm9, %v1745_v63 }
 0x202   : > { %1766 = vrot.lane.b32.xlu0 %v1674_v7, %s5482_s21 }
 0x203   : > { %v1936_v60 = vpop.permute.xlu1 %1935 }
 0x204   : > { %2016 = vst.msk [vmem:[#allocation3 + $0x80] sm:$0xff] %vm1999_vm10, %v1936_v60  ;;  %v1169_v41 = vpop.permute.xlu0 %1168 }
 0x205   : > { %1190 = vrot.lane.b32.xlu1 %v1674_v7, %s5479_s10  ;;  %1246 = vst.msk [vmem:[#allocation3 + $0x98] sm:$0xff] %vm1226_vm6, %v1169_v41 }
 0x206   : > { %1768 = vrot.lane.b32.xlu0 %v1675_v21, %s5482_s21 }
 0x207   : > { %v1360_v45 = vpop.permute.xlu1 %1359 }
 0x208   : > { %1438 = vst.msk [vmem:[#allocation3 + $0x90] sm:$0xff] %vm1419_vm7, %v1360_v45  ;;  %v1938_v25 = vpop.permute.xlu0 %1937 }
 0x209   : > { %1959 = vrot.lane.b32.xlu1 %v1867_v47, %s5483_s27  ;;  %2017 = vst.msk [vmem:[#allocation3 + $0x88] sm:$0xff] %vm1999_vm10, %v1938_v25 }
 0x20a   : > { %1192 = vrot.lane.b32.xlu0 %v1675_v21, %s5479_s10 }
 0x20b   : > { %v1362_v27 = vpop.permute.xlu1 %1361  ;;  %v2048_v28 = vld [vmem:[#allocation3 + $0x80] sm:$0xff] }
 0x20c   : > { %1439 = vst.msk [vmem:[#allocation3 + $0x98] sm:$0xff] %vm1419_vm7, %v1362_v27  ;;  %5350 = vmatprep.mubr.msk.f32.mxu0 %vm2069_vm11, %v2048_v28  ;;  %v1554_v22 = vpop.permute.xlu0 %1553 }
 0x20d   : > { %1383 = vrot.lane.b32.xlu1 %v1867_v47, %s5480_s15  ;;  %1632 = vst.msk [vmem:[#allocation3 + $0x90] sm:$0xff] %vm1613_vm8, %v1554_v22 }
 0x20e   : > { %1961 = vrot.lane.b32.xlu0 %v1868_v29, %s5483_s27 }
 0x20f   : > { %v1556_v30 = vpop.permute.xlu1 %1555 }
 0x210   : > { %1633 = vst.msk [vmem:[#allocation3 + $0x98] sm:$0xff] %vm1613_vm8, %v1556_v30  ;;  %v1747_v18 = vpop.permute.xlu0 %1746  ;;  %v2049_v43 = vld [vmem:[#allocation3 + $0x88] sm:$0xff] }
 0x211   : > { %1385 = vrot.lane.b32.xlu1 %v1868_v29, %s5480_s15  ;;  %1825 = vst.msk [vmem:[#allocation3 + $0x90] sm:$0xff] %vm1806_vm9, %v1747_v18  ;;  %5351 = vmatmul.mubr.msk.f32.gmra.mrb[16].mxu0 %vm2069_vm11, %v2049_v43 }
 0x212   : > { %1577 = vrot.lane.b32.xlu0 %v1483_v32, %s5481_s20 }
 0x213   : > { %v1171_v51 = vpop.permute.xlu1 %1170 }
 0x214   : > { %1247 = vst.msk [vmem:[#allocation3 + $0xa0] sm:$0xff] %vm1226_vm6, %v1171_v51  ;;  %v1749_v50 = vpop.permute.xlu0 %1748 }
 0x215   : > { %1579 = vrot.lane.b32.xlu1 %v1484_v40, %s5481_s20  ;;  %1826 = vst.msk [vmem:[#allocation3 + $0x98] sm:$0xff] %vm1806_vm9, %v1749_v50 }
 0x216   : > { %1770 = vrot.lane.b32.xlu0 %v1676_v44, %s5482_s21 }
 0x217   : > { %v1940_v49 = vpop.permute.xlu1 %1939 }
 0x218   : > { %2018 = vst.msk [vmem:[#allocation3 + $0x90] sm:$0xff] %vm1999_vm10, %v1940_v49  ;;  %v1173_v56 = vpop.permute.xlu0 %1172 }
 0x219   : > { %1772 = vrot.lane.b32.xlu1 %v1677_v35, %s5482_s21  ;;  %1248 = vst.msk [vmem:[#allocation3 + $0xa8] sm:$0xff] %vm1226_vm6, %v1173_v56 }
 0x21a   : > { %1963 = vrot.lane.b32.xlu0 %v1869_v52, %s5483_s27 }
 0x21b   : > { %v1364_v53 = vpop.permute.xlu1 %1363 }
 0x21c   : > { %1440 = vst.msk [vmem:[#allocation3 + $0xa0] sm:$0xff] %vm1419_vm7, %v1364_v53  ;;  %v1942_v54 = vpop.permute.xlu0 %1941 }
 0x21d   : > { %1965 = vrot.lane.b32.xlu1 %v1870_v16, %s5483_s27  ;;  %2019 = vst.msk [vmem:[#allocation3 + $0x98] sm:$0xff] %vm1999_vm10, %v1942_v54 }
 0x21f   : > { %v1366_v11 = vpop.permute.xlu1 %1365  ;;  %v2050_v48 = vld [vmem:[#allocation3 + $0x90] sm:$0xff] }
 0x220   : > { %1441 = vst.msk [vmem:[#allocation3 + $0xa8] sm:$0xff] %vm1419_vm7, %v1366_v11  ;;  %5353 = vmatprep.mubr.msk.f32.mxu0 %vm2069_vm11, %v2050_v48  ;;  %v1558_v6 = vpop.permute.xlu0 %1557 }
 0x221   : > { %1634 = vst.msk [vmem:[#allocation3 + $0xa0] sm:$0xff] %vm1613_vm8, %v1558_v6 }
 0x223   : > { %v1560_v57 = vpop.permute.xlu1 %1559 }
 0x224   : > { %1635 = vst.msk [vmem:[#allocation3 + $0xa8] sm:$0xff] %vm1613_vm8, %v1560_v57  ;;  %v1751_v0 = vpop.permute.xlu0 %1750  ;;  %v2051_v59 = vld [vmem:[#allocation3 + $0x98] sm:$0xff] }
 0x225   : > { %1827 = vst.msk [vmem:[#allocation3 + $0xa0] sm:$0xff] %vm1806_vm9, %v1751_v0  ;;  %5354 = vmatmul.mubr.msk.f32.gmra.mrb[18].mxu0 %vm2069_vm11, %v2051_v59 }
 0x227   : > { %v1175_v15 = vpop.permute.xlu1 %1174 }
 0x228   : > { %1249 = vst.msk [vmem:[#allocation3 + $0xb0] sm:$0xff] %vm1226_vm6, %v1175_v15  ;;  %v1753_v5 = vpop.permute.xlu0 %1752 }
 0x229   : > { %1828 = vst.msk [vmem:[#allocation3 + $0xa8] sm:$0xff] %vm1806_vm9, %v1753_v5 }
 0x22b   : > { %v1944_v3 = vpop.permute.xlu1 %1943 }
 0x22c   : > { %2020 = vst.msk [vmem:[#allocation3 + $0xa0] sm:$0xff] %vm1999_vm10, %v1944_v3  ;;  %v1177_v39 = vpop.permute.xlu0 %1176 }
 0x22d   : > { %1250 = vst.msk [vmem:[#allocation3 + $0xb8] sm:$0xff] %vm1226_vm6, %v1177_v39 }
 0x22f   : > { %v1368_v17 = vpop.permute.xlu1 %1367 }
 0x230   : > { %1442 = vst.msk [vmem:[#allocation3 + $0xb0] sm:$0xff] %vm1419_vm7, %v1368_v17  ;;  %v1946_v2 = vpop.permute.xlu0 %1945 }
 0x231   : > { %2021 = vst.msk [vmem:[#allocation3 + $0xa8] sm:$0xff] %vm1999_vm10, %v1946_v2 }
 0x233   : > { %v1370_v62 = vpop.permute.xlu1 %1369  ;;  %v2052_v4 = vld [vmem:[#allocation3 + $0xa0] sm:$0xff] }
 0x234   : > { %1443 = vst.msk [vmem:[#allocation3 + $0xb8] sm:$0xff] %vm1419_vm7, %v1370_v62  ;;  %5356 = vmatprep.mubr.msk.f32.mxu0 %vm2069_vm11, %v2052_v4  ;;  %v1562_v61 = vpop.permute.xlu0 %1561 }
 0x235   : > { %1636 = vst.msk [vmem:[#allocation3 + $0xb0] sm:$0xff] %vm1613_vm8, %v1562_v61 }
 0x237   : > { %v1564_v38 = vpop.permute.xlu1 %1563 }
 0x238   : > { %1637 = vst.msk [vmem:[#allocation3 + $0xb8] sm:$0xff] %vm1613_vm8, %v1564_v38  ;;  %v1755_v58 = vpop.permute.xlu0 %1754  ;;  %v2053_v10 = vld [vmem:[#allocation3 + $0xa8] sm:$0xff] }
 0x239   : > { %1829 = vst.msk [vmem:[#allocation3 + $0xb0] sm:$0xff] %vm1806_vm9, %v1755_v58  ;;  %5357 = vmatmul.mubr.msk.f32.gmra.mrb[20].mxu0 %vm2069_vm11, %v2053_v10 }
 0x23b   : > { %v1179_v23 = vpop.permute.xlu1 %1178 }
 0x23c   : > { %1251 = vst.msk [vmem:[#allocation3 + $0xc0] sm:$0xff] %vm1226_vm6, %v1179_v23  ;;  %v1757_v20 = vpop.permute.xlu0 %1756 }
 0x23d   : > { %1830 = vst.msk [vmem:[#allocation3 + $0xb8] sm:$0xff] %vm1806_vm9, %v1757_v20 }
 0x23f   : > { %v1948_v37 = vpop.permute.xlu1 %1947 }
 0x240   : > { %2022 = vst.msk [vmem:[#allocation3 + $0xb0] sm:$0xff] %vm1999_vm10, %v1948_v37  ;;  %v1181_v24 = vpop.permute.xlu0 %1180 }
 0x241   : > { %1252 = vst.msk [vmem:[#allocation3 + $0xc8] sm:$0xff] %vm1226_vm6, %v1181_v24 }
 0x243   : > { %v1372_v33 = vpop.permute.xlu1 %1371 }
 0x244   : > { %1444 = vst.msk [vmem:[#allocation3 + $0xc0] sm:$0xff] %vm1419_vm7, %v1372_v33  ;;  %v1950_v14 = vpop.permute.xlu0 %1949 }
 0x245   : > { %2023 = vst.msk [vmem:[#allocation3 + $0xb8] sm:$0xff] %vm1999_vm10, %v1950_v14 }
 0x247   : > { %v1374_v9 = vpop.permute.xlu1 %1373  ;;  %v2054_v8 = vld [vmem:[#allocation3 + $0xb0] sm:$0xff] }
 0x248   : > { %1445 = vst.msk [vmem:[#allocation3 + $0xc8] sm:$0xff] %vm1419_vm7, %v1374_v9  ;;  %5359 = vmatprep.mubr.msk.f32.mxu0 %vm2069_vm11, %v2054_v8  ;;  %v1566_v55 = vpop.permute.xlu0 %1565 }
 0x249   : > { %1638 = vst.msk [vmem:[#allocation3 + $0xc0] sm:$0xff] %vm1613_vm8, %v1566_v55 }
 0x24b   : > { %v1568_v31 = vpop.permute.xlu1 %1567 }
 0x24c   : > { %1639 = vst.msk [vmem:[#allocation3 + $0xc8] sm:$0xff] %vm1613_vm8, %v1568_v31  ;;  %v1759_v26 = vpop.permute.xlu0 %1758  ;;  %v2055_v42 = vld [vmem:[#allocation3 + $0xb8] sm:$0xff] }
 0x24d   : > { %1831 = vst.msk [vmem:[#allocation3 + $0xc0] sm:$0xff] %vm1806_vm9, %v1759_v26  ;;  %5360 = vmatmul.mubr.msk.f32.gmra.mrb[22].mxu0 %vm2069_vm11, %v2055_v42 }
 0x24f   : > { %v1183_v13 = vpop.permute.xlu1 %1182 }
 0x250   : > { %1253 = vst.msk [vmem:[#allocation3 + $0xd0] sm:$0xff] %vm1226_vm6, %v1183_v13  ;;  %v1761_v19 = vpop.permute.xlu0 %1760 }
 0x251   : > { %1832 = vst.msk [vmem:[#allocation3 + $0xc8] sm:$0xff] %vm1806_vm9, %v1761_v19 }
 0x253   : > { %v1952_v46 = vpop.permute.xlu1 %1951 }
 0x254   : > { %2024 = vst.msk [vmem:[#allocation3 + $0xc0] sm:$0xff] %vm1999_vm10, %v1952_v46  ;;  %v1185_v36 = vpop.permute.xlu0 %1184 }
 0x255   : > { %1254 = vst.msk [vmem:[#allocation3 + $0xd8] sm:$0xff] %vm1226_vm6, %v1185_v36 }
 0x257   : > { %v6540_v34 = vpop.f32.mrb[0].mxu0  ;;  %v1376_v63 = vpop.permute.xlu1 %1375 }
 0x258   : > { %v2396_v12 = vsel %vm312_vm0, %v6540_v34, 0.0  ;;  %v2465_v7 = vmul.f32 %v6540_v34, %v6540_v34  ;;  %v6547_v60 = vpop.f32.mrb[1].mxu0  ;;  %1446 = vst.msk [vmem:[#allocation3 + $0xd0] sm:$0xff] %vm1419_vm7, %v1376_v63  ;;  %v1954_v27 = vpop.permute.xlu0 %1953 }
 0x259   : > { %v2395_v21 = vsel %vm312_vm0, %v6547_v60, 0.0  ;;  %v2464_v47 = vmul.f32 %v6547_v60, %v6547_v60  ;;  %2025 = vst.msk [vmem:[#allocation3 + $0xc8] sm:$0xff] %vm1999_vm10, %v1954_v27 }
 0x25a   : > { %v2497_v41 = vsel %vm312_vm0, %v2465_v7, 0.0  ;;  %v2397_v45 = vadd.f32 %v2396_v12, %v2395_v21 }
 0x25b   : > { %v2496_v25 = vsel %vm312_vm0, %v2464_v47, 0.0  ;;  %v2056_v28 = vld [vmem:[#allocation3 + $0xc0] sm:$0xff]  ;;  %v1378_v22 = vpop.permute.xlu1 %1377 }
 0x25c   : > { %v2498_v29 = vadd.f32 %v2497_v41, %v2496_v25  ;;  %5362 = vmatprep.mubr.msk.f32.mxu0 %vm2069_vm11, %v2056_v28  ;;  %1447 = vst.msk [vmem:[#allocation3 + $0xd8] sm:$0xff] %vm1419_vm7, %v1378_v22  ;;  %v1570_v30 = vpop.permute.xlu0 %1569 }
 0x25d   : > { %1640 = vst.msk [vmem:[#allocation3 + $0xd0] sm:$0xff] %vm1613_vm8, %v1570_v30 }
 0x25f   : > { %v1572_v32 = vpop.permute.xlu1 %1571 }
 0x260   : > { %1641 = vst.msk [vmem:[#allocation3 + $0xd8] sm:$0xff] %vm1613_vm8, %v1572_v32  ;;  %v1763_v40 = vpop.permute.xlu0 %1762  ;;  %v2057_v18 = vld [vmem:[#allocation3 + $0xc8] sm:$0xff] }
 0x261   : > { %1833 = vst.msk [vmem:[#allocation3 + $0xd0] sm:$0xff] %vm1806_vm9, %v1763_v40  ;;  %5363 = vmatmul.mubr.msk.f32.gmra.mrb[24].mxu0 %vm2069_vm11, %v2057_v18 }
 0x263   : > { %v1187_v51 = vpop.permute.xlu1 %1186 }
 0x264   : > { %1255 = vst.msk [vmem:[#allocation3 + $0xe0] sm:$0xff] %vm1226_vm6, %v1187_v51  ;;  %v1765_v43 = vpop.permute.xlu0 %1764 }
 0x265   : > { %1834 = vst.msk [vmem:[#allocation3 + $0xd8] sm:$0xff] %vm1806_vm9, %v1765_v43 }
 0x267   : > { %v6564_v44 = vpop.f32.mrb[2].mxu0  ;;  %v1956_v35 = vpop.permute.xlu1 %1955 }
 0x268   : > { %v6567_v50 = vpop.f32.mrb[3].mxu0  ;;  %v2467_v49 = vmul.f32 %v6564_v44, %v6564_v44  ;;  %2026 = vst.msk [vmem:[#allocation3 + $0xd0] sm:$0xff] %vm1999_vm10, %v1956_v35  ;;  %v2400_v53 = vsel %vm312_vm0, %v6564_v44, 0.0  ;;  %v1189_v11 = vpop.permute.xlu0 %1188 }
 0x269   : > { %v2398_v52 = vsel %vm312_vm0, %v6567_v50, 0.0  ;;  %v2466_v16 = vmul.f32 %v6567_v50, %v6567_v50  ;;  %1256 = vst.msk [vmem:[#allocation3 + $0xe8] sm:$0xff] %vm1226_vm6, %v1189_v11 }
 0x26a   : > { %v2399_v56 = vadd.f32 %v2398_v52, %v2397_v45  ;;  %v2501_v0 = vsel %vm312_vm0, %v2467_v49, 0.0 }
 0x26b   : > { %v2499_v54 = vsel %vm312_vm0, %v2466_v16, 0.0  ;;  %v1380_v6 = vpop.permute.xlu1 %1379 }
 0x26c   : > { %v2500_v48 = vadd.f32 %v2499_v54, %v2498_v29  ;;  %v2401_v57 = vadd.f32 %v2400_v53, %v2399_v56  ;;  %1448 = vst.msk [vmem:[#allocation3 + $0xe0] sm:$0xff] %vm1419_vm7, %v1380_v6  ;;  %v1958_v59 = vpop.permute.xlu0 %1957 }
 0x26d   : > { %2027 = vst.msk [vmem:[#allocation3 + $0xd8] sm:$0xff] %vm1999_vm10, %v1958_v59 }
 0x26e   : > { %v2502_v15 = vadd.f32 %v2501_v0, %v2500_v48 }
 0x26f   : > { %v1382_v5 = vpop.permute.xlu1 %1381  ;;  %v2058_v3 = vld [vmem:[#allocation3 + $0xd0] sm:$0xff] }
 0x270   : > { %1449 = vst.msk [vmem:[#allocation3 + $0xe8] sm:$0xff] %vm1419_vm7, %v1382_v5  ;;  %5365 = vmatprep.mubr.msk.f32.mxu0 %vm2069_vm11, %v2058_v3  ;;  %v1574_v39 = vpop.permute.xlu0 %1573 }
 0x271   : > { %1642 = vst.msk [vmem:[#allocation3 + $0xe0] sm:$0xff] %vm1613_vm8, %v1574_v39 }
 0x273   : > { %v1576_v17 = vpop.permute.xlu1 %1575 }
 0x274   : > { %1643 = vst.msk [vmem:[#allocation3 + $0xe8] sm:$0xff] %vm1613_vm8, %v1576_v17  ;;  %v1767_v2 = vpop.permute.xlu0 %1766  ;;  %v2059_v4 = vld [vmem:[#allocation3 + $0xd8] sm:$0xff] }
 0x275   : > { %1835 = vst.msk [vmem:[#allocation3 + $0xe0] sm:$0xff] %vm1806_vm9, %v1767_v2  ;;  %5366 = vmatmul.mubr.msk.f32.gmra.mrb[26].mxu0 %vm2069_vm11, %v2059_v4 }
 0x277   : > { %v6587_v62 = vpop.f32.mrb[4].mxu0  ;;  %v1191_v61 = vpop.permute.xlu1 %1190 }
 0x278   : > { %v6590_v38 = vpop.f32.mrb[5].mxu0  ;;  %v2469_v58 = vmul.f32 %v6587_v62, %v6587_v62  ;;  %1257 = vst.msk [vmem:[#allocation3 + $0xf0] sm:$0xff] %vm1226_vm6, %v1191_v61  ;;  %v2404_v37 = vsel %vm312_vm0, %v6587_v62, 0.0  ;;  %v1769_v33 = vpop.permute.xlu0 %1768 }
 0x279   : > { %v2402_v23 = vsel %vm312_vm0, %v6590_v38, 0.0  ;;  %v2468_v10 = vmul.f32 %v6590_v38, %v6590_v38  ;;  %1836 = vst.msk [vmem:[#allocation3 + $0xe8] sm:$0xff] %vm1806_vm9, %v1769_v33 }
 0x27a   : > { %v2403_v20 = vadd.f32 %v2402_v23, %v2401_v57  ;;  %v2505_v55 = vsel %vm312_vm0, %v2469_v58, 0.0 }
 0x27b   : > { %v2503_v24 = vsel %vm312_vm0, %v2468_v10, 0.0  ;;  %v1960_v9 = vpop.permute.xlu1 %1959 }
 0x27c   : > { %v2504_v14 = vadd.f32 %v2503_v24, %v2502_v15  ;;  %v2405_v8 = vadd.f32 %v2404_v37, %v2403_v20  ;;  %2028 = vst.msk [vmem:[#allocation3 + $0xe0] sm:$0xff] %vm1999_vm10, %v1960_v9  ;;  %v1193_v26 = vpop.permute.xlu0 %1192 }
 0x27d   : > { %1258 = vst.msk [vmem:[#allocation3 + $0xf8] sm:$0xff] %vm1226_vm6, %v1193_v26 }
 0x27e   : > { %v2506_v31 = vadd.f32 %v2505_v55, %v2504_v14 }
 0x27f   : > { %v1384_v13 = vpop.permute.xlu1 %1383 }
 0x280   : > { %1450 = vst.msk [vmem:[#allocation3 + $0xf0] sm:$0xff] %vm1419_vm7, %v1384_v13  ;;  %v1962_v42 = vpop.permute.xlu0 %1961 }
 0x281   : > { %2029 = vst.msk [vmem:[#allocation3 + $0xe8] sm:$0xff] %vm1999_vm10, %v1962_v42 }
 0x283   : > { %v1386_v19 = vpop.permute.xlu1 %1385  ;;  %v2060_v46 = vld [vmem:[#allocation3 + $0xe0] sm:$0xff] }
 0x284   : > { %1451 = vst.msk [vmem:[#allocation3 + $0xf8] sm:$0xff] %vm1419_vm7, %v1386_v19  ;;  %5368 = vmatprep.mubr.msk.f32.mxu0 %vm2069_vm11, %v2060_v46  ;;  %v1578_v36 = vpop.permute.xlu0 %1577 }
 0x285   : > { %1644 = vst.msk [vmem:[#allocation3 + $0xf0] sm:$0xff] %vm1613_vm8, %v1578_v36 }
 0x287   : > { %v6611_v12 = vpop.f32.mrb[6].mxu0  ;;  %v1580_v7 = vpop.permute.xlu1 %1579 }
 0x288   : > { %v6614_v63 = vpop.f32.mrb[7].mxu0  ;;  %v2471_v21 = vmul.f32 %v6611_v12, %v6611_v12  ;;  %1645 = vst.msk [vmem:[#allocation3 + $0xf8] sm:$0xff] %vm1613_vm8, %v1580_v7  ;;  %v2408_v25 = vsel %vm312_vm0, %v6611_v12, 0.0  ;;  %v1771_v28 = vpop.permute.xlu0 %1770  ;;  %v2061_v29 = vld [vmem:[#allocation3 + $0xe8] sm:$0xff] }
 0x289   : > { %v2406_v47 = vsel %vm312_vm0, %v6614_v63, 0.0  ;;  %v2470_v41 = vmul.f32 %v6614_v63, %v6614_v63  ;;  %1837 = vst.msk [vmem:[#allocation3 + $0xf0] sm:$0xff] %vm1806_vm9, %v1771_v28  ;;  %5369 = vmatmul.mubr.msk.f32.gmra.mrb[28].mxu0 %vm2069_vm11, %v2061_v29 }
 0x28a   : > { %v2407_v45 = vadd.f32 %v2406_v47, %v2405_v8  ;;  %v2509_v40 = vsel %vm312_vm0, %v2471_v21, 0.0 }
 0x28b   : > { %v2507_v27 = vsel %vm312_vm0, %v2470_v41, 0.0  ;;  %v1773_v30 = vpop.permute.xlu1 %1772 }
 0x28c   : > { %v2508_v22 = vadd.f32 %v2507_v27, %v2506_v31  ;;  %v2409_v32 = vadd.f32 %v2408_v25, %v2407_v45  ;;  %1838 = vst.msk [vmem:[#allocation3 + $0xf8] sm:$0xff] %vm1806_vm9, %v1773_v30  ;;  %v1964_v51 = vpop.permute.xlu0 %1963 }
 0x28d   : > { %2030 = vst.msk [vmem:[#allocation3 + $0xf0] sm:$0xff] %vm1999_vm10, %v1964_v51 }
 0x28e   : > { %v2510_v18 = vadd.f32 %v2509_v40, %v2508_v22 }
 0x28f   : > { %v1966_v43 = vpop.permute.xlu1 %1965 }
 0x290   : > { %2031 = vst.msk [vmem:[#allocation3 + $0xf8] sm:$0xff] %vm1999_vm10, %v1966_v43 }
 0x294   : > { %v2062_v49 = vld [vmem:[#allocation3 + $0xf0] sm:$0xff] }
 0x295   : > { %5371 = vmatprep.mubr.msk.f32.mxu0 %vm2069_vm11, %v2062_v49 }
 0x297   : > { %v6632_v35 = vpop.f32.mrb[8].mxu0  ;;  %v2063_v16 = vld [vmem:[#allocation3 + $0xf8] sm:$0xff] }
 0x298   : > { %v6634_v52 = vpop.f32.mrb[9].mxu0  ;;  %v2473_v56 = vmul.f32 %v6632_v35, %v6632_v35  ;;  %5372 = vmatmul.mubr.msk.f32.gmra.mrb[30].mxu0 %vm2069_vm11, %v2063_v16  ;;  %v2412_v48 = vsel %vm312_vm0, %v6632_v35, 0.0 }
 0x299   : > { %v2410_v53 = vsel %vm312_vm0, %v6634_v52, 0.0  ;;  %v2472_v54 = vmul.f32 %v6634_v52, %v6634_v52 }
 0x29a   : > { %v2411_v11 = vadd.f32 %v2410_v53, %v2409_v32  ;;  %v2513_v15 = vsel %vm312_vm0, %v2473_v56, 0.0 }
 0x29b   : > { %v2511_v6 = vsel %vm312_vm0, %v2472_v54, 0.0 }
 0x29c   : > { %v2512_v57 = vadd.f32 %v2511_v6, %v2510_v18  ;;  %v2413_v0 = vadd.f32 %v2412_v48, %v2411_v11 }
 0x29e   : > { %v2514_v59 = vadd.f32 %v2513_v15, %v2512_v57 }
 0x2a8   : > { %v6648_v5 = vpop.f32.mrb[10].mxu0 }
 0x2a9   : > { %v6650_v3 = vpop.f32.mrb[11].mxu0  ;;  %v2475_v39 = vmul.f32 %v6648_v5, %v6648_v5  ;;  %v2416_v61 = vsel %vm312_vm0, %v6648_v5, 0.0 }
 0x2aa   : > { %v2414_v17 = vsel %vm312_vm0, %v6650_v3, 0.0  ;;  %v2474_v2 = vmul.f32 %v6650_v3, %v6650_v3 }
 0x2ab   : > { %v2415_v4 = vadd.f32 %v2414_v17, %v2413_v0  ;;  %v2517_v20 = vsel %vm312_vm0, %v2475_v39, 0.0 }
 0x2ac   : > { %v2515_v58 = vsel %vm312_vm0, %v2474_v2, 0.0 }
 0x2ad   : > { %v2516_v23 = vadd.f32 %v2515_v58, %v2514_v59  ;;  %v2417_v10 = vadd.f32 %v2416_v61, %v2415_v4 }
 0x2af   : > { %v2518_v37 = vadd.f32 %v2517_v20, %v2516_v23 }
 0x2bc   : > { %v6662_v24 = vpop.f32.mrb[12].mxu0 }
 0x2bd   : > { %v6664_v33 = vpop.f32.mrb[13].mxu0  ;;  %v2477_v14 = vmul.f32 %v6662_v24, %v6662_v24  ;;  %v2420_v31 = vsel %vm312_vm0, %v6662_v24, 0.0 }
 0x2be   : > { %v2418_v9 = vsel %vm312_vm0, %v6664_v33, 0.0  ;;  %v2476_v8 = vmul.f32 %v6664_v33, %v6664_v33 }
 0x2bf   : > { %v2419_v55 = vadd.f32 %v2418_v9, %v2417_v10  ;;  %v2521_v19 = vsel %vm312_vm0, %v2477_v14, 0.0 }
 0x2c0   : > { %v2519_v26 = vsel %vm312_vm0, %v2476_v8, 0.0 }
 0x2c1   : > { %v2520_v13 = vadd.f32 %v2519_v26, %v2518_v37  ;;  %v2421_v42 = vadd.f32 %v2420_v31, %v2419_v55 }
 0x2c3   : > { %v2522_v46 = vadd.f32 %v2521_v19, %v2520_v13 }
 0x2d0   : > { %v6676_v36 = vpop.f32.mrb[14].mxu0 }
 0x2d1   : > { %v6678_v7 = vpop.f32.mrb[15].mxu0  ;;  %v2479_v21 = vmul.f32 %v6676_v36, %v6676_v36  ;;  %v2424_v25 = vsel %vm312_vm0, %v6676_v36, 0.0 }
 0x2d2   : > { %v2422_v47 = vsel %vm312_vm0, %v6678_v7, 0.0  ;;  %v2478_v41 = vmul.f32 %v6678_v7, %v6678_v7 }
 0x2d3   : > { %v2423_v45 = vadd.f32 %v2422_v47, %v2421_v42  ;;  %v2525_v22 = vsel %vm312_vm0, %v2479_v21, 0.0 }
 0x2d4   : > { %v2523_v27 = vsel %vm312_vm0, %v2478_v41, 0.0 }
 0x2d5   : > { %v2524_v28 = vadd.f32 %v2523_v27, %v2522_v46  ;;  %v2425_v29 = vadd.f32 %v2424_v25, %v2423_v45 }
 0x2d7   : > { %v2526_v30 = vadd.f32 %v2525_v22, %v2524_v28 }
 0x2e4   : > { %v6690_v32 = vpop.f32.mrb[16].mxu0 }
 0x2e5   : > { %v6692_v40 = vpop.f32.mrb[17].mxu0  ;;  %v2481_v18 = vmul.f32 %v6690_v32, %v6690_v32  ;;  %v2428_v16 = vsel %vm312_vm0, %v6690_v32, 0.0 }
 0x2e6   : > { %v2426_v51 = vsel %vm312_vm0, %v6692_v40, 0.0  ;;  %v2480_v43 = vmul.f32 %v6692_v40, %v6692_v40 }
 0x2e7   : > { %v2427_v49 = vadd.f32 %v2426_v51, %v2425_v29  ;;  %v2529_v11 = vsel %vm312_vm0, %v2481_v18, 0.0 }
 0x2e8   : > { %v2527_v56 = vsel %vm312_vm0, %v2480_v43, 0.0 }
 0x2e9   : > { %v2528_v53 = vadd.f32 %v2527_v56, %v2526_v30  ;;  %v2429_v54 = vadd.f32 %v2428_v16, %v2427_v49 }
 0x2eb   : > { %v2530_v48 = vadd.f32 %v2529_v11, %v2528_v53 }
 0x2f8   : > { %v6704_v6 = vpop.f32.mrb[18].mxu0 }
 0x2f9   : > { %v6706_v57 = vpop.f32.mrb[19].mxu0  ;;  %v2483_v0 = vmul.f32 %v6704_v6, %v6704_v6  ;;  %v2432_v17 = vsel %vm312_vm0, %v6704_v6, 0.0 }
 0x2fa   : > { %v2430_v15 = vsel %vm312_vm0, %v6706_v57, 0.0  ;;  %v2482_v59 = vmul.f32 %v6706_v57, %v6706_v57 }
 0x2fb   : > { %v2431_v39 = vadd.f32 %v2430_v15, %v2429_v54  ;;  %v2533_v58 = vsel %vm312_vm0, %v2483_v0, 0.0 }
 0x2fc   : > { %v2531_v2 = vsel %vm312_vm0, %v2482_v59, 0.0 }
 0x2fd   : > { %v2532_v4 = vadd.f32 %v2531_v2, %v2530_v48  ;;  %v2433_v61 = vadd.f32 %v2432_v17, %v2431_v39 }
 0x2ff   : > { %v2534_v23 = vadd.f32 %v2533_v58, %v2532_v4 }
 0x30c   : > { %v6718_v10 = vpop.f32.mrb[20].mxu0 }
 0x30d   : > { %v6720_v20 = vpop.f32.mrb[21].mxu0  ;;  %v2485_v37 = vmul.f32 %v6718_v10, %v6718_v10  ;;  %v2436_v55 = vsel %vm312_vm0, %v6718_v10, 0.0 }
 0x30e   : > { %v2434_v14 = vsel %vm312_vm0, %v6720_v20, 0.0  ;;  %v2484_v9 = vmul.f32 %v6720_v20, %v6720_v20 }
 0x30f   : > { %v2435_v8 = vadd.f32 %v2434_v14, %v2433_v61  ;;  %v2537_v42 = vsel %vm312_vm0, %v2485_v37, 0.0 }
 0x310   : > { %v2535_v31 = vsel %vm312_vm0, %v2484_v9, 0.0 }
 0x311   : > { %v2536_v26 = vadd.f32 %v2535_v31, %v2534_v23  ;;  %v2437_v13 = vadd.f32 %v2436_v55, %v2435_v8 }
 0x313   : > { %v2538_v19 = vadd.f32 %v2537_v42, %v2536_v26 }
 0x320   : > { %v6732_v46 = vpop.f32.mrb[22].mxu0 }
 0x321   : > { %v6734_v21 = vpop.f32.mrb[23].mxu0  ;;  %v2487_v47 = vmul.f32 %v6732_v46, %v6732_v46  ;;  %v2440_v27 = vsel %vm312_vm0, %v6732_v46, 0.0 }
 0x322   : > { %v2438_v41 = vsel %vm312_vm0, %v6734_v21, 0.0  ;;  %v2486_v45 = vmul.f32 %v6734_v21, %v6734_v21 }
 0x323   : > { %v2439_v25 = vadd.f32 %v2438_v41, %v2437_v13  ;;  %v2541_v30 = vsel %vm312_vm0, %v2487_v47, 0.0 }
 0x324   : > { %v2539_v28 = vsel %vm312_vm0, %v2486_v45, 0.0 }
 0x325   : > { %v2540_v29 = vadd.f32 %v2539_v28, %v2538_v19  ;;  %v2441_v22 = vadd.f32 %v2440_v27, %v2439_v25 }
 0x327   : > { %v2542_v18 = vadd.f32 %v2541_v30, %v2540_v29 }
 0x334   : > { %v6746_v51 = vpop.f32.mrb[24].mxu0 }
 0x335   : > { %v6748_v43 = vpop.f32.mrb[25].mxu0  ;;  %v2489_v49 = vmul.f32 %v6746_v51, %v6746_v51  ;;  %v2444_v54 = vsel %vm312_vm0, %v6746_v51, 0.0 }
 0x336   : > { %v2442_v16 = vsel %vm312_vm0, %v6748_v43, 0.0  ;;  %v2488_v56 = vmul.f32 %v6748_v43, %v6748_v43 }
 0x337   : > { %v2443_v53 = vadd.f32 %v2442_v16, %v2441_v22  ;;  %v2545_v15 = vsel %vm312_vm0, %v2489_v49, 0.0 }
 0x338   : > { %v2543_v11 = vsel %vm312_vm0, %v2488_v56, 0.0 }
 0x339   : > { %v2544_v48 = vadd.f32 %v2543_v11, %v2542_v18  ;;  %v2445_v0 = vadd.f32 %v2444_v54, %v2443_v53 }
 0x33b   : > { %v2546_v59 = vadd.f32 %v2545_v15, %v2544_v48 }
 0x348   : > { %v6760_v39 = vpop.f32.mrb[26].mxu0 }
 0x349   : > { %v6762_v17 = vpop.f32.mrb[27].mxu0  ;;  %v2491_v2 = vmul.f32 %v6760_v39, %v6760_v39  ;;  %v2448_v23 = vsel %vm312_vm0, %v6760_v39, 0.0 }
 0x34a   : > { %v2446_v4 = vsel %vm312_vm0, %v6762_v17, 0.0  ;;  %v2490_v61 = vmul.f32 %v6762_v17, %v6762_v17 }
 0x34b   : > { %v2447_v58 = vadd.f32 %v2446_v4, %v2445_v0  ;;  %v2549_v8 = vsel %vm312_vm0, %v2491_v2, 0.0 }
 0x34c   : > { %v2547_v37 = vsel %vm312_vm0, %v2490_v61, 0.0 }
 0x34d   : > { %v2548_v14 = vadd.f32 %v2547_v37, %v2546_v59  ;;  %v2449_v9 = vadd.f32 %v2448_v23, %v2447_v58 }
 0x34f   : > { %v2550_v55 = vadd.f32 %v2549_v8, %v2548_v14 }
 0x35c   : > { %v6774_v31 = vpop.f32.mrb[28].mxu0 }
 0x35d   : > { %v6776_v26 = vpop.f32.mrb[29].mxu0  ;;  %v2493_v13 = vmul.f32 %v6774_v31, %v6774_v31  ;;  %v2452_v41 = vsel %vm312_vm0, %v6774_v31, 0.0 }
 0x35e   : > { %v2450_v42 = vsel %vm312_vm0, %v6776_v26, 0.0  ;;  %v2492_v19 = vmul.f32 %v6776_v26, %v6776_v26 }
 0x35f   : > { %v2451_v47 = vadd.f32 %v2450_v42, %v2449_v9  ;;  %v2553_v28 = vsel %vm312_vm0, %v2493_v13, 0.0 }
 0x360   : > { %v2551_v45 = vsel %vm312_vm0, %v2492_v19, 0.0 }
 0x361   : > { %v2552_v25 = vadd.f32 %v2551_v45, %v2550_v55  ;;  %v2453_v27 = vadd.f32 %v2452_v41, %v2451_v47 }
 0x363   : > { %v2554_v29 = vadd.f32 %v2553_v28, %v2552_v25 }
 0x36b   : > { %v6788_v22 = vpop.f32.mrb[30].mxu0 }
 0x36c   : > { %v2386_v30 = vpop.f32.mrb[31].mxu0  ;;  %v2495_v18 = vmul.f32 %v6788_v22, %v6788_v22  ;;  %v2456_v53 = vsel %vm312_vm0, %v6788_v22, 0.0 }
 0x36d   : > { %v2454_v49 = vsel %vm312_vm0, %v2386_v30, 0.0  ;;  %v2494_v16 = vmul.f32 %v2386_v30, %v2386_v30 }
 0x36e   : > { %v2455_v56 = vadd.f32 %v2454_v49, %v2453_v27  ;;  %v2557_v0 = vsel %vm312_vm0, %v2495_v18, 0.0  ;;  %v2578_v27 = vlaneseq }
 0x36f   : > { %v2555_v54 = vsel %vm312_vm0, %v2494_v16, 0.0 }
 0x370   : > { %v2457_v11 = vadd.f32 %v2456_v53, %v2455_v56  ;;  %v2556_v48 = vadd.f32 %v2555_v54, %v2554_v29  ;;  %v2579_v28 = vshrl.u32 %v2578_v27, 7  ;;  %v2570_v29 = vld [vmem:[%s8257_s2] sm:$0x1] }
 0x371   : > { %v2574_v56 = vld [vmem:[%s8258_s3] sm:$0x1] }
 0x372   : > { %v2458_v15 = vrot.slane %v2457_v11, 4  ;;  %v2558_v59 = vadd.f32 %v2557_v0, %v2556_v48  ;;  %v6800_v18 = vsub.s32 0, %v2579_v28 }
 0x374   : > { %v2459_v2 = vadd.f32 %v2458_v15, %v2457_v11  ;;  %v2559_v4 = vrot.slane %v2558_v59, 4 }
 0x376   : > { %v2460_v61 = vrot.slane %v2459_v2, 2  ;;  %v2560_v58 = vadd.f32 %v2559_v4, %v2558_v59 }
 0x378   : > { %v2461_v23 = vadd.f32 %v2460_v61, %v2459_v2  ;;  %v2561_v37 = vrot.slane %v2560_v58, 2 }
 0x37a   : > { %v2462_v14 = vrot.slane %v2461_v23, 1  ;;  %v2562_v9 = vadd.f32 %v2561_v37, %v2560_v58 }
 0x37c   : > { %v2463_v8 = vadd.f32 %v2462_v14, %v2461_v23  ;;  %v2563_v55 = vrot.slane %v2562_v9, 1 }
 0x37e   : > { %v2564_v13 = vadd.f32 %v2563_v55, %v2562_v9  ;;  %v2565_v42 = vmul.f32 0.00390625, %v2463_v8 }
 0x380   : > { %v2566_v19 = vmul.f32 0.00390625, %v2564_v13  ;;  %v2567_v47 = vmul.f32 %v2565_v42, %v2565_v42 }
 0x382   : > { %v2568_v41 = vsub.f32 %v2566_v19, %v2567_v47 }
 0x384   : > { %v2569_v45 = vmax.f32 %v2568_v41, 0.0 }
 0x386   : > { %v2571_v25 = vadd.f32 1e-05, %v2569_v45 }
 0x388   : > { %5464 = vrsqrt.f32 %v2571_v25 }
 0x392   : > { %v5465_v49 = vpop.eup %5464 }
 0x393   : > { %v2573_v16 = vmul.f32 %v5465_v49, %v2570_v29 }
 0x395   : > { %v2575_v53 = vmul.f32 %v2573_v16, %v2565_v42  ;;  %v2581_v54 = vrot.slane %v2573_v16, %v6800_v18 }
 0x397   : > { %v2576_v11 = vsub.f32 %v2574_v56, %v2575_v53  ;;  %v2613_v48 = vmul.f32 %v2581_v54, %v2386_v30  ;;  %v2583_v0 = vmul.f32 %v2581_v54, %v6547_v60  ;;  %v2584_v15 = vmul.f32 %v6540_v34, %v2581_v54 }
 0x398   : > { %v2585_v59 = vmul.f32 %v2581_v54, %v6567_v50  ;;  %v2586_v2 = vmul.f32 %v6564_v44, %v2581_v54  ;;  %v2587_v4 = vmul.f32 %v2581_v54, %v6590_v38  ;;  %v2588_v61 = vmul.f32 %v6587_v62, %v2581_v54 }
 0x399   : > { %v6813_v58 = vrot.slane %v2576_v11, %v6800_v18  ;;  %v2589_v23 = vmul.f32 %v2581_v54, %v6614_v63  ;;  %v2590_v37 = vmul.f32 %v6611_v12, %v2581_v54  ;;  %v2591_v30 = vmul.f32 %v2581_v54, %v6634_v52 }
 0x39a   : > { %v2592_v60 = vmul.f32 %v6632_v35, %v2581_v54  ;;  %v2593_v34 = vmul.f32 %v2581_v54, %v6650_v3  ;;  %v2594_v50 = vmul.f32 %v6648_v5, %v2581_v54  ;;  %v2595_v44 = vmul.f32 %v2581_v54, %v6664_v33 }
 0x39b   : > { %v2651_v38 = vadd.f32 %v6813_v58, %v2613_v48  ;;  %v2596_v62 = vmul.f32 %v6662_v24, %v2581_v54  ;;  %v2597_v14 = vmul.f32 %v2581_v54, %v6678_v7  ;;  %v2598_v63 = vmul.f32 %v6676_v36, %v2581_v54 }
 0x39c   : > { %v2599_v12 = vmul.f32 %v2581_v54, %v6692_v40  ;;  %v2600_v52 = vmul.f32 %v6690_v32, %v2581_v54  ;;  %v2601_v35 = vmul.f32 %v2581_v54, %v6706_v57  ;;  %v2602_v3 = vmul.f32 %v6704_v6, %v2581_v54 }
 0x39d   : > { %v2683_v9 = vmax.f32 %v2651_v38, 0.0  ;;  %v2603_v5 = vmul.f32 %v2581_v54, %v6720_v20  ;;  %v2604_v33 = vmul.f32 %v6718_v10, %v2581_v54  ;;  %v2605_v8 = vmul.f32 %v2581_v54, %v6734_v21 }
 0x39e   : > { %v2606_v24 = vmul.f32 %v6732_v46, %v2581_v54  ;;  %v2607_v7 = vmul.f32 %v2581_v54, %v6748_v43  ;;  %v2608_v36 = vmul.f32 %v6746_v51, %v2581_v54  ;;  %v2609_v40 = vmul.f32 %v2581_v54, %v6762_v17 }
 0x39f   : > { %v2610_v32 = vmul.f32 %v6760_v39, %v2581_v54  ;;  %v2611_v57 = vmul.f32 %v2581_v54, %v6776_v26  ;;  %v2612_v6 = vmul.f32 %v6774_v31, %v2581_v54  ;;  %v2614_v20 = vmul.f32 %v6788_v22, %v2581_v54  ;;  %2715 = vst.msk [vmem:[#allocation2 + $0x181] sm:$0xff] %vm312_vm0, %v2683_v9 }
 0x3a0   : > { %v2624_v10 = vadd.f32 %v6813_v58, %v2586_v2  ;;  %v2621_v46 = vadd.f32 %v6813_v58, %v2583_v0  ;;  %v2622_v21 = vadd.f32 %v6813_v58, %v2584_v15  ;;  %v2623_v51 = vadd.f32 %v6813_v58, %v2585_v59 }
 0x3a1   : > { %v2625_v43 = vadd.f32 %v6813_v58, %v2587_v4  ;;  %v2626_v39 = vadd.f32 %v6813_v58, %v2588_v61  ;;  %v2627_v17 = vadd.f32 %v6813_v58, %v2589_v23  ;;  %v2628_v31 = vadd.f32 %v6813_v58, %v2590_v37 }
 0x3a2   : > { %v2656_v26 = vmax.f32 %v2624_v10, 0.0  ;;  %v2629_v22 = vadd.f32 %v6813_v58, %v2591_v30  ;;  %v2630_v55 = vadd.f32 %v6813_v58, %v2592_v60  ;;  %v2631_v13 = vadd.f32 %v6813_v58, %v2593_v34 }
 0x3a3   : > { %v2632_v42 = vadd.f32 %v6813_v58, %v2594_v50  ;;  %v2633_v19 = vadd.f32 %v6813_v58, %v2595_v44  ;;  %v6856_v47 = vadd.f32 %v6813_v58, %v2596_v62  ;;  %v6859_v41 = vadd.f32 %v6813_v58, %v2597_v14 }
 0x3a4   : > { %2718 = vst.msk [vmem:[#allocation2 + $0x9] sm:$0xff] %vm312_vm0, %v2656_v26  ;;  %v2636_v45 = vadd.f32 %v6813_v58, %v2598_v63  ;;  %v2637_v25 = vadd.f32 %v6813_v58, %v2599_v12  ;;  %v6865_v27 = vadd.f32 %v6813_v58, %v2600_v52  ;;  %v6868_v28 = vadd.f32 %v6813_v58, %v2601_v35 }
 0x3a5   : > { %2688 = vst.msk [vmem:[#allocation2 + $0x39] sm:$0xff] %vm312_vm0, %v2656_v26  ;;  %v6872_v29 = vadd.f32 %v6813_v58, %v2602_v3  ;;  %v6875_v49 = vadd.f32 %v6813_v58, %v2603_v5  ;;  %v6878_v16 = vadd.f32 %v6813_v58, %v2604_v33  ;;  %v6881_v56 = vadd.f32 %v6813_v58, %v2605_v8 }
 0x3a6   : > { %v6884_v53 = vadd.f32 %v6813_v58, %v2606_v24  ;;  %v6887_v54 = vadd.f32 %v6813_v58, %v2607_v7  ;;  %v6890_v11 = vadd.f32 %v6813_v58, %v2608_v36  ;;  %v6893_v48 = vadd.f32 %v6813_v58, %v2609_v40  ;;  %v2737_v0 = vld [vmem:[#allocation2 + $0x182] sm:$0x1] }
 0x3a7   : > { %v6896_v15 = vadd.f32 %v6813_v58, %v2610_v32  ;;  %v6899_v59 = vadd.f32 %v6813_v58, %v2611_v57  ;;  %v6902_v2 = vadd.f32 %v6813_v58, %v2612_v6  ;;  %v6905_v4 = vadd.f32 %v6813_v58, %v2614_v20  ;;  %2755 = vst.msk [vmem:[#allocation2 + $0x180] sm:$0x1] %vm368_vm1, %v2737_v0 }
 0x3a8   : > { %v2655_v61 = vmax.f32 %v2623_v51, 0.0  ;;  %v2653_v23 = vmax.f32 %v2621_v46, 0.0  ;;  %v2654_v37 = vmax.f32 %v2622_v21, 0.0  ;;  %v2657_v30 = vmax.f32 %v2625_v43, 0.0 }
 0x3a9   : > { %v2658_v60 = vmax.f32 %v2626_v39, 0.0  ;;  %v2659_v34 = vmax.f32 %v2627_v17, 0.0  ;;  %v2660_v50 = vmax.f32 %v2628_v31, 0.0  ;;  %v2661_v44 = vmax.f32 %v2629_v22, 0.0 }
 0x3aa   : > { %2717 = vst.msk [vmem:[#allocation2 + $0x1] sm:$0xff] %vm312_vm0, %v2655_v61  ;;  %v2662_v38 = vmax.f32 %v2630_v55, 0.0  ;;  %v2663_v62 = vmax.f32 %v2631_v13, 0.0  ;;  %v2664_v14 = vmax.f32 %v2632_v42, 0.0  ;;  %v2665_v63 = vmax.f32 %v2633_v19, 0.0  ;;  %2687 = vst.msk [vmem:[#allocation2 + $0x31] sm:$0xff] %vm312_vm0, %v2655_v61 }
 0x3ab   : > { %2686 = vst.msk [vmem:[#allocation2 + $0x21] sm:$0xff] %vm312_vm0, %v2654_v37  ;;  %2685 = vst.msk [vmem:[#allocation2 + $0x19] sm:$0xff] %vm312_vm0, %v2653_v23  ;;  %v2858_v58 = vld [vmem:[#allocation2 + $0x9] sm:$0xff]  ;;  %v2666_v12 = vmax.f32 %v6856_v47, 0.0  ;;  %v2667_v52 = vmax.f32 %v6859_v41, 0.0  ;;  %v2668_v35 = vmax.f32 %v2636_v45, 0.0 }
 0x3ac   : > { %2689 = vst.msk [vmem:[#allocation2 + $0x49] sm:$0xff] %vm312_vm0, %v2657_v30  ;;  %v2669_v3 = vmax.f32 %v2637_v25, 0.0  ;;  %2690 = vst.msk [vmem:[#allocation2 + $0x51] sm:$0xff] %vm312_vm0, %v2658_v60  ;;  %2923 = vrot.lane.b32.xlu1 %v2858_v58, %s5476_s30  ;;  %v2670_v9 = vmax.f32 %v6865_v27, 0.0  ;;  %v2671_v5 = vmax.f32 %v6868_v28, 0.0  ;;  %v2672_v33 = vmax.f32 %v6872_v29, 0.0 }
 0x3ad   : > { %2691 = vst.msk [vmem:[#allocation2 + $0x61] sm:$0xff] %vm312_vm0, %v2659_v34  ;;  %2692 = vst.msk [vmem:[#allocation2 + $0x69] sm:$0xff] %vm312_vm0, %v2660_v50  ;;  %v2673_v8 = vmax.f32 %v6875_v49, 0.0  ;;  %v2757_v24 = vld [vmem:[#allocation2 + $0xf] sm:$0x1]  ;;  %v2674_v7 = vmax.f32 %v6878_v16, 0.0 }
 0x3ae   : > { %2693 = vst.msk [vmem:[#allocation2 + $0x79] sm:$0xff] %vm312_vm0, %v2661_v44  ;;  %2694 = vst.msk [vmem:[#allocation2 + $0x81] sm:$0xff] %vm312_vm0, %v2662_v38  ;;  %v2675_v36 = vmax.f32 %v6881_v56, 0.0  ;;  %v2676_v40 = vmax.f32 %v6884_v53, 0.0  ;;  %v2677_v32 = vmax.f32 %v6887_v54, 0.0  ;;  %v2678_v6 = vmax.f32 %v6890_v11, 0.0 }
 0x3af   : > { %2695 = vst.msk [vmem:[#allocation2 + $0x91] sm:$0xff] %vm312_vm0, %v2663_v62  ;;  %2696 = vst.msk [vmem:[#allocation2 + $0x99] sm:$0xff] %vm312_vm0, %v2664_v14  ;;  %v2759_v57 = vld [vmem:[#allocation2 + $0x3f] sm:$0x1]  ;;  %v2679_v20 = vmax.f32 %v6893_v48, 0.0  ;;  %v2680_v10 = vmax.f32 %v6896_v15, 0.0 }
 0x3b0   : > { %2697 = vst.msk [vmem:[#allocation2 + $0xa9] sm:$0xff] %vm312_vm0, %v2665_v63  ;;  %2698 = vst.msk [vmem:[#allocation2 + $0xb1] sm:$0xff] %vm312_vm0, %v2666_v12  ;;  %v2681_v46 = vmax.f32 %v6899_v59, 0.0  ;;  %v2682_v21 = vmax.f32 %v6902_v2, 0.0  ;;  %v2684_v51 = vmax.f32 %v6905_v4, 0.0  ;;  %v6967_v31 = vld [vmem:[#allocation2 + $0x39] sm:$0xff] }
 0x3b1   : > { %2699 = vst.msk [vmem:[#allocation2 + $0xc1] sm:$0xff] %vm312_vm0, %v2667_v52  ;;  %2700 = vst.msk [vmem:[#allocation2 + $0xc9] sm:$0xff] %vm312_vm0, %v2668_v35  ;;  %v2857_v43 = vld [vmem:[#allocation2 + $0x1] sm:$0xff]  ;;  %v6973_v26 = vld [vmem:[#allocation2 + $0x31] sm:$0xff] }
 0x3b2   : > { %2701 = vst.msk [vmem:[#allocation2 + $0xd9] sm:$0xff] %vm312_vm0, %v2669_v3  ;;  %2702 = vst.msk [vmem:[#allocation2 + $0xe1] sm:$0xff] %vm312_vm0, %v2670_v9  ;;  %v6957_v39 = vld [vmem:[#allocation2 + $0x21] sm:$0xff]  ;;  %2921 = vrot.lane.b32.xlu0 %v2857_v43, %s5476_s30  ;;  %v6965_v17 = vld [vmem:[#allocation2 + $0x19] sm:$0xff] }
 0x3b3   : > { %2775 = vst.msk [vmem:[#allocation2 + $0x11] sm:$0x1] %vm368_vm1, %v2757_v24  ;;  %2777 = vst.msk [vmem:[#allocation2 + $0x41] sm:$0x1] %vm368_vm1, %v2759_v57  ;;  %2927 = vrot.lane.b32.xlu1 %v6957_v39, %s5476_s30  ;;  %v6975_v22 = vld [vmem:[#allocation2 + $0x51] sm:$0xff]  ;;  %v6981_v13 = vld [vmem:[#allocation2 + $0x49] sm:$0xff] }
 0x3b4   : > { %2703 = vst.msk [vmem:[#allocation2 + $0xf1] sm:$0xff] %vm312_vm0, %v2671_v5  ;;  %2704 = vst.msk [vmem:[#allocation2 + $0xf9] sm:$0xff] %vm312_vm0, %v2672_v33  ;;  %v2758_v55 = vld [vmem:[#allocation2 + $0x27] sm:$0x1]  ;;  %v6984_v42 = vld [vmem:[#allocation2 + $0x69] sm:$0xff] }
 0x3b5   : > { %2705 = vst.msk [vmem:[#allocation2 + $0x109] sm:$0xff] %vm312_vm0, %v2673_v8  ;;  %2706 = vst.msk [vmem:[#allocation2 + $0x111] sm:$0xff] %vm312_vm0, %v2674_v7  ;;  %v2760_v19 = vld [vmem:[#allocation2 + $0x57] sm:$0x1]  ;;  %v2761_v47 = vld [vmem:[#allocation2 + $0x6f] sm:$0x1] }
 0x3b6   : > { %2707 = vst.msk [vmem:[#allocation2 + $0x121] sm:$0xff] %vm312_vm0, %v2675_v36  ;;  %2708 = vst.msk [vmem:[#allocation2 + $0x129] sm:$0xff] %vm312_vm0, %v2676_v40  ;;  %2925 = vrot.lane.b32.xlu0 %v6965_v17, %s5476_s30  ;;  %v2762_v41 = vld [vmem:[#allocation2 + $0x87] sm:$0x1]  ;;  %v2763_v45 = vld [vmem:[#allocation2 + $0x9f] sm:$0x1] }
 0x3b7   : > { %2709 = vst.msk [vmem:[#allocation2 + $0x139] sm:$0xff] %vm312_vm0, %v2677_v32  ;;  %2710 = vst.msk [vmem:[#allocation2 + $0x141] sm:$0xff] %vm312_vm0, %v2678_v6  ;;  %2931 = vrot.lane.b32.xlu1 %v6967_v31, %s5476_s30  ;;  %v2764_v25 = vld [vmem:[#allocation2 + $0xb7] sm:$0x1]  ;;  %v6993_v27 = vld [vmem:[#allocation2 + $0x61] sm:$0xff] }
 0x3b8   : > { %2711 = vst.msk [vmem:[#allocation2 + $0x151] sm:$0xff] %vm312_vm0, %v2679_v20  ;;  %2712 = vst.msk [vmem:[#allocation2 + $0x159] sm:$0xff] %vm312_vm0, %v2680_v10  ;;  %v2765_v28 = vld [vmem:[#allocation2 + $0xcf] sm:$0x1]  ;;  %v6997_v29 = vld [vmem:[#allocation2 + $0x81] sm:$0xff] }
 0x3b9   : > { %2713 = vst.msk [vmem:[#allocation2 + $0x169] sm:$0xff] %vm312_vm0, %v2681_v46  ;;  %2719 = vst.msk [vmem:[#allocation2 + $0x199] sm:$0xff] %vm312_vm0, %v2681_v46  ;;  %v2766_v49 = vld [vmem:[#allocation2 + $0xe7] sm:$0x1]  ;;  %v2794_v54 = vld [vmem:[#allocation2 + $0x8] sm:$0xff] }
 0x3ba   : > { %2714 = vst.msk [vmem:[#allocation2 + $0x171] sm:$0xff] %vm312_vm0, %v2682_v21  ;;  %2716 = vst.msk [vmem:[#allocation2 + $0x189] sm:$0xff] %vm312_vm0, %v2684_v51  ;;  %2929 = vrot.lane.b32.xlu0 %v6973_v26, %s5476_s30  ;;  %v2721_v11 = vld [vmem:[#allocation2 + $0x2] sm:$0x1]  ;;  %v7010_v0 = vld [vmem:[#allocation2 + $0x79] sm:$0xff] }
 0x3bb   : > { %2720 = vst.msk [vmem:[#allocation2 + $0x1a1] sm:$0xff] %vm312_vm0, %v2682_v21  ;;  %2935 = vrot.lane.b32.xlu1 %v6975_v22, %s5476_s30  ;;  %v2767_v16 = vld [vmem:[#allocation2 + $0xff] sm:$0x1]  ;;  %v7008_v48 = vld [vmem:[#allocation2 + $0x20] sm:$0xff]  ;;  %2826 = vst.msk [vmem:[#allocation3 + $0x8] sm:$0xff] %vm312_vm0, %v2794_v54 }
 0x3bc   : > { %2776 = vst.msk [vmem:[#allocation2 + $0x29] sm:$0x1] %vm368_vm1, %v2758_v55  ;;  %2778 = vst.msk [vmem:[#allocation2 + $0x59] sm:$0x1] %vm368_vm1, %v2760_v19  ;;  %v2768_v56 = vld [vmem:[#allocation2 + $0x117] sm:$0x1] }
 0x3bd   : > { %2779 = vst.msk [vmem:[#allocation2 + $0x71] sm:$0x1] %vm368_vm1, %v2761_v47  ;;  %2780 = vst.msk [vmem:[#allocation2 + $0x89] sm:$0x1] %vm368_vm1, %v2762_v41  ;;  %v2769_v53 = vld [vmem:[#allocation2 + $0x12f] sm:$0x1] }
 0x3be   : > { %2933 = vrot.lane.b32.xlu0 %v6981_v13, %s5476_s30  ;;  %2781 = vst.msk [vmem:[#allocation2 + $0xa1] sm:$0x1] %vm368_vm1, %v2763_v45  ;;  %2782 = vst.msk [vmem:[#allocation2 + $0xb9] sm:$0x1] %vm368_vm1, %v2764_v25  ;;  %v7012_v15 = vld [vmem:[#allocation2 + $0x99] sm:$0xff]  ;;  %v7028_v61 = vld [vmem:[#allocation2 + $0x50] sm:$0xff] }
 0x3bf   : > { %2939 = vrot.lane.b32.xlu1 %v6984_v42, %s5476_s30  ;;  %2783 = vst.msk [vmem:[#allocation2 + $0xd1] sm:$0x1] %vm368_vm1, %v2765_v28  ;;  %2784 = vst.msk [vmem:[#allocation2 + $0xe9] sm:$0x1] %vm368_vm1, %v2766_v49  ;;  %v2722_v59 = vld [vmem:[#allocation2 + $0x1a] sm:$0x1] }
 0x3c0   : > { %2785 = vst.msk [vmem:[#allocation2 + $0x101] sm:$0x1] %vm368_vm1, %v2767_v16  ;;  %2786 = vst.msk [vmem:[#allocation2 + $0x119] sm:$0x1] %vm368_vm1, %v2768_v56  ;;  %v7023_v2 = vld [vmem:[#allocation2 + $0x38] sm:$0xff]  ;;  %v7032_v37 = vld [vmem:[#allocation2 + $0x68] sm:$0xff] }
 0x3c1   : > { %2787 = vst.msk [vmem:[#allocation2 + $0x131] sm:$0x1] %vm368_vm1, %v2769_v53  ;;  %2739 = vst.msk [vmem:[#allocation2] sm:$0x1] %vm368_vm1, %v2721_v11  ;;  %v2723_v4 = vld [vmem:[#allocation2 + $0x32] sm:$0x1] }
 0x3c2   : > { %2937 = vrot.lane.b32.xlu0 %v6993_v27, %s5476_s30  ;;  %2828 = vst.msk [vmem:[#allocation3 + $0x18] sm:$0xff] %vm312_vm0, %v7008_v48  ;;  %2830 = vst.msk [vmem:[#allocation3 + $0x28] sm:$0xff] %vm312_vm0, %v7023_v2  ;;  %v2724_v23 = vld [vmem:[#allocation2 + $0x4a] sm:$0x1]  ;;  %v7034_v30 = vld [vmem:[#allocation2 + $0x91] sm:$0xff] }
 0x3c3   : > { %2943 = vrot.lane.b32.xlu1 %v6997_v29, %s5476_s30  ;;  %2740 = vst.msk [vmem:[#allocation2 + $0x18] sm:$0x1] %vm368_vm1, %v2722_v59  ;;  %2741 = vst.msk [vmem:[#allocation2 + $0x30] sm:$0x1] %vm368_vm1, %v2723_v4  ;;  %v7036_v60 = vld [vmem:[#allocation2 + $0xb1] sm:$0xff]  ;;  %v7046_v50 = vld [vmem:[#allocation2 + $0x80] sm:$0xff] }
 0x3c4   : > { %2832 = vst.msk [vmem:[#allocation3 + $0x38] sm:$0xff] %vm312_vm0, %v7028_v61  ;;  %2834 = vst.msk [vmem:[#allocation3 + $0x48] sm:$0xff] %vm312_vm0, %v7032_v37  ;;  %v2725_v34 = vld [vmem:[#allocation2 + $0x62] sm:$0x1]  ;;  %v2726_v44 = vld [vmem:[#allocation2 + $0x7a] sm:$0x1] }
 0x3c5   : > { %2742 = vst.msk [vmem:[#allocation2 + $0x48] sm:$0x1] %vm368_vm1, %v2724_v23  ;;  %2743 = vst.msk [vmem:[#allocation2 + $0x60] sm:$0x1] %vm368_vm1, %v2725_v34  ;;  %v7048_v38 = vld [vmem:[#allocation2 + $0xa9] sm:$0xff]  ;;  %v7053_v14 = vld [vmem:[#allocation2 + $0x98] sm:$0xff] }
 0x3c6   : > { %2941 = vrot.lane.b32.xlu0 %v7010_v0, %s5476_s30  ;;  %v2874_v62 = vld [vmem:[#allocation2 + $0xc9] sm:$0xff]  ;;  %2836 = vst.msk [vmem:[#allocation3 + $0x58] sm:$0xff] %vm312_vm0, %v7046_v50  ;;  %v2727_v63 = vld [vmem:[#allocation2 + $0x92] sm:$0x1]  ;;  %2838 = vst.msk [vmem:[#allocation3 + $0x68] sm:$0xff] %vm312_vm0, %v7053_v14 }
 0x3c7   : > { %2947 = vrot.lane.b32.xlu1 %v7012_v15, %s5476_s30  ;;  %2744 = vst.msk [vmem:[#allocation2 + $0x78] sm:$0x1] %vm368_vm1, %v2726_v44  ;;  %2745 = vst.msk [vmem:[#allocation2 + $0x90] sm:$0x1] %vm368_vm1, %v2727_v63  ;;  %v7058_v12 = vld [vmem:[#allocation2 + $0xb0] sm:$0xff]  ;;  %v7066_v3 = vld [vmem:[#allocation2 + $0xc8] sm:$0xff] }
 0x3c8   : > { %v2793_v58 = vld [vmem:[#allocation2] sm:$0xff]  ;;  %v2728_v52 = vld [vmem:[#allocation2 + $0xaa] sm:$0x1]  ;;  %2840 = vst.msk [vmem:[#allocation3 + $0x78] sm:$0xff] %vm312_vm0, %v7058_v12  ;;  %2842 = vst.msk [vmem:[#allocation3 + $0x88] sm:$0xff] %vm312_vm0, %v7066_v3 }
 0x3c9   : > { %2825 = vst.msk [vmem:[#allocation3] sm:$0xff] %vm312_vm0, %v2793_v58  ;;  %v2729_v9 = vld [vmem:[#allocation2 + $0xc2] sm:$0x1]  ;;  %v2730_v8 = vld [vmem:[#allocation2 + $0xda] sm:$0x1]  ;;  %v7087_v32 = vld [vmem:[#allocation2 + $0x110] sm:$0xff] }
 0x3ca   : > { %2945 = vrot.lane.b32.xlu0 %v7034_v30, %s5476_s30  ;;  %v7061_v35 = vld [vmem:[#allocation2 + $0x18] sm:$0xff]  ;;  %2746 = vst.msk [vmem:[#allocation2 + $0xa8] sm:$0x1] %vm368_vm1, %v2728_v52  ;;  %v7073_v5 = vld [vmem:[#allocation2 + $0x30] sm:$0xff]  ;;  %2747 = vst.msk [vmem:[#allocation2 + $0xc0] sm:$0x1] %vm368_vm1, %v2729_v9 }
 0x3cb   : > { %2951 = vrot.lane.b32.xlu1 %v7036_v60, %s5476_s30  ;;  %2827 = vst.msk [vmem:[#allocation3 + $0x10] sm:$0xff] %vm312_vm0, %v7061_v35  ;;  %v7078_v33 = vld [vmem:[#allocation2 + $0xe0] sm:$0xff]  ;;  %2829 = vst.msk [vmem:[#allocation3 + $0x20] sm:$0xff] %vm312_vm0, %v7073_v5  ;;  %v7085_v36 = vld [vmem:[#allocation2 + $0xf8] sm:$0xff] }
 0x3cc   : > { %v2873_v24 = vld [vmem:[#allocation2 + $0xc1] sm:$0xff]  ;;  %2844 = vst.msk [vmem:[#allocation3 + $0x98] sm:$0xff] %vm312_vm0, %v7078_v33  ;;  %v2731_v40 = vld [vmem:[#allocation2 + $0xf2] sm:$0x1]  ;;  %2846 = vst.msk [vmem:[#allocation3 + $0xa8] sm:$0xff] %vm312_vm0, %v7085_v36 }
 0x3cd   : > { %v2876_v7 = vld [vmem:[#allocation2 + $0xe1] sm:$0xff]  ;;  %2748 = vst.msk [vmem:[#allocation2 + $0xd8] sm:$0x1] %vm368_vm1, %v2730_v8  ;;  %2749 = vst.msk [vmem:[#allocation2 + $0xf0] sm:$0x1] %vm368_vm1, %v2731_v40  ;;  %v2822_v55 = vld [vmem:[#allocation2 + $0x158] sm:$0xff] }
 0x3ce   : > { %2949 = vrot.lane.b32.xlu0 %v7048_v38, %s5476_s30  ;;  %v7089_v57 = vld [vmem:[#allocation2 + $0x48] sm:$0xff]  ;;  %2848 = vst.msk [vmem:[#allocation3 + $0xb8] sm:$0xff] %vm312_vm0, %v7087_v32  ;;  %v7100_v10 = vld [vmem:[#allocation2 + $0x60] sm:$0xff]  ;;  %v7109_v51 = vld [vmem:[#allocation2 + $0x78] sm:$0xff] }
 0x3cf   : > { %2955 = vrot.lane.b32.xlu1 %v2874_v62, %s5476_s30  ;;  %v2732_v6 = vld [vmem:[#allocation2 + $0x10a] sm:$0x1]  ;;  %2831 = vst.msk [vmem:[#allocation3 + $0x30] sm:$0xff] %vm312_vm0, %v7089_v57  ;;  %v2733_v46 = vld [vmem:[#allocation2 + $0x122] sm:$0x1]  ;;  %2833 = vst.msk [vmem:[#allocation3 + $0x40] sm:$0xff] %vm312_vm0, %v7100_v10 }
 0x3d0   : > { %v7096_v20 = vld [vmem:[#allocation2 + $0x128] sm:$0xff]  ;;  %2750 = vst.msk [vmem:[#allocation2 + $0x108] sm:$0x1] %vm368_vm1, %v2732_v6  ;;  %v2820_v21 = vld [vmem:[#allocation2 + $0x140] sm:$0xff]  ;;  %2751 = vst.msk [vmem:[#allocation2 + $0x120] sm:$0x1] %vm368_vm1, %v2733_v46 }
 0x3d1   : > { %2850 = vst.msk [vmem:[#allocation3 + $0xc8] sm:$0xff] %vm312_vm0, %v7096_v20  ;;  %2852 = vst.msk [vmem:[#allocation3 + $0xd8] sm:$0xff] %vm312_vm0, %v2820_v21  ;;  %v2734_v43 = vld [vmem:[#allocation2 + $0x13a] sm:$0x1]  ;;  %v7115_v19 = vld [vmem:[#allocation2 + $0x90] sm:$0xff] }
 0x3d2   : > { %2953 = vrot.lane.b32.xlu0 %v2873_v24, %s5476_s30  ;;  %2835 = vst.msk [vmem:[#allocation3 + $0x50] sm:$0xff] %vm312_vm0, %v7109_v51  ;;  %2854 = vst.msk [vmem:[#allocation3 + $0xe8] sm:$0xff] %vm312_vm0, %v2822_v55  ;;  %v2735_v47 = vld [vmem:[#allocation2 + $0x152] sm:$0x1]  ;;  %v7121_v45 = vld [vmem:[#allocation2 + $0xa8] sm:$0xff] }
 0x3d3   : > { %2959 = vrot.lane.b32.xlu1 %v2876_v7, %s5476_s30  ;;  %2752 = vst.msk [vmem:[#allocation2 + $0x138] sm:$0x1] %vm368_vm1, %v2734_v43  ;;  %v2824_v41 = vld [vmem:[#allocation2 + $0x170] sm:$0xff]  ;;  %2753 = vst.msk [vmem:[#allocation2 + $0x150] sm:$0x1] %vm368_vm1, %v2735_v47  ;;  %v2875_v28 = vld [vmem:[#allocation2 + $0xd9] sm:$0xff] }
 0x3d4   : > { %2837 = vst.msk [vmem:[#allocation3 + $0x60] sm:$0xff] %vm312_vm0, %v7115_v19  ;;  %2856 = vst.msk [vmem:[#allocation3 + $0xf8] sm:$0xff] %vm312_vm0, %v2824_v41  ;;  %v2736_v25 = vld [vmem:[#allocation2 + $0x16a] sm:$0x1]  ;;  %v2878_v49 = vld [vmem:[#allocation2 + $0xf9] sm:$0xff] }
 0x3d5   : > { %2839 = vst.msk [vmem:[#allocation3 + $0x70] sm:$0xff] %vm312_vm0, %v7121_v45  ;;  %v7127_v16 = vld [vmem:[#allocation2 + $0xc0] sm:$0xff]  ;;  %v7134_v56 = vld [vmem:[#allocation2 + $0xd8] sm:$0xff]  ;;  %v7138_v53 = vld [vmem:[#allocation2 + $0xf0] sm:$0xff] }
 0x3d6   : > { %2754 = vst.msk [vmem:[#allocation2 + $0x168] sm:$0x1] %vm368_vm1, %v2736_v25  ;;  %2957 = vrot.lane.b32.xlu0 %v2875_v28, %s5476_s30  ;;  %v2877_v11 = vld [vmem:[#allocation2 + $0xf1] sm:$0xff]  ;;  %v2879_v62 = vld [vmem:[#allocation2 + $0x109] sm:$0xff]  ;;  %v2770_v58 = vld [vmem:[#allocation2 + $0x147] sm:$0x1] }
 0x3d7   : > { %2963 = vrot.lane.b32.xlu1 %v2878_v49, %s5476_s30  ;;  %2841 = vst.msk [vmem:[#allocation3 + $0x80] sm:$0xff] %vm312_vm0, %v7127_v16  ;;  %2843 = vst.msk [vmem:[#allocation3 + $0x90] sm:$0xff] %vm312_vm0, %v7134_v56  ;;  %v7142_v54 = vld [vmem:[#allocation2 + $0x108] sm:$0xff]  ;;  %v2880_v59 = vld [vmem:[#allocation2 + $0x111] sm:$0xff] }
 0x3d8   : > { %2845 = vst.msk [vmem:[#allocation3 + $0xa0] sm:$0xff] %vm312_vm0, %v7138_v53  ;;  %2847 = vst.msk [vmem:[#allocation3 + $0xb0] sm:$0xff] %vm312_vm0, %v7142_v54  ;;  %v7146_v4 = vld [vmem:[#allocation2 + $0x120] sm:$0xff]  ;;  %v2882_v63 = vld [vmem:[#allocation2 + $0x129] sm:$0xff] }
 0x3d9   : > { %2849 = vst.msk [vmem:[#allocation3 + $0xc0] sm:$0xff] %vm312_vm0, %v7146_v4  ;;  %v2881_v52 = vld [vmem:[#allocation2 + $0x121] sm:$0xff]  ;;  %v2771_v8 = vld [vmem:[#allocation2 + $0x15f] sm:$0x1]  ;;  %v2772_v24 = vld [vmem:[#allocation2 + $0x177] sm:$0x1] }
 0x3da   : > { %2961 = vrot.lane.b32.xlu0 %v2877_v11, %s5476_s30  ;;  %v7152_v23 = vld [vmem:[#allocation2 + $0x138] sm:$0xff]  ;;  %v2821_v34 = vld [vmem:[#allocation2 + $0x150] sm:$0xff]  ;;  %2788 = vst.msk [vmem:[#allocation2 + $0x149] sm:$0x1] %vm368_vm1, %v2770_v58  ;;  %v2884_v9 = vld [vmem:[#allocation2 + $0x141] sm:$0xff] }
 0x3db   : > { %2967 = vrot.lane.b32.xlu1 %v2880_v59, %s5476_s30  ;;  %2851 = vst.msk [vmem:[#allocation3 + $0xd0] sm:$0xff] %vm312_vm0, %v7152_v23  ;;  %2853 = vst.msk [vmem:[#allocation3 + $0xe0] sm:$0xff] %vm312_vm0, %v2821_v34  ;;  %v2773_v7 = vld [vmem:[#allocation2 + $0x18f] sm:$0x1]  ;;  %v2883_v40 = vld [vmem:[#allocation2 + $0x139] sm:$0xff] }
 0x3dc   : > { %2789 = vst.msk [vmem:[#allocation2 + $0x161] sm:$0x1] %vm368_vm1, %v2771_v8  ;;  %2790 = vst.msk [vmem:[#allocation2 + $0x179] sm:$0x1] %vm368_vm1, %v2772_v24  ;;  %v2886_v6 = vld [vmem:[#allocation2 + $0x159] sm:$0xff]  ;;  %v2885_v43 = vld [vmem:[#allocation2 + $0x151] sm:$0xff] }
 0x3dd   : > { %v2823_v44 = vld [vmem:[#allocation2 + $0x168] sm:$0xff]  ;;  %2791 = vst.msk [vmem:[#allocation2 + $0x191] sm:$0x1] %vm368_vm1, %v2773_v7  ;;  %v2738_v46 = vld [vmem:[#allocation2 + $0x19a] sm:$0x1]  ;;  %v2888_v55 = vld [vmem:[#allocation2 + $0x171] sm:$0xff] }
 0x3de   : > { %2855 = vst.msk [vmem:[#allocation3 + $0xf0] sm:$0xff] %vm312_vm0, %v2823_v44  ;;  %2965 = vrot.lane.b32.xlu0 %v2879_v62, %s5476_s30  ;;  %v2774_v21 = vld [vmem:[#allocation2 + $0x1a7] sm:$0x1]  ;;  %v2887_v47 = vld [vmem:[#allocation2 + $0x169] sm:$0xff]  ;;  %v7176_v49 = vld [vmem:[#allocation2 + $0x1a] sm:$0xff] }
 0x3df   : > { %2971 = vrot.lane.b32.xlu1 %v2882_v63, %s5476_s30  ;;  %2756 = vst.msk [vmem:[#allocation2 + $0x198] sm:$0x1] %vm368_vm1, %v2738_v46  ;;  %2792 = vst.msk [vmem:[#allocation2 + $0x1a9] sm:$0x1] %vm368_vm1, %v2774_v21  ;;  %v3050_v41 = vld [vmem:[#allocation2 + $0xa] sm:$0xff]  ;;  %v3049_v25 = vld [vmem:[#allocation2 + $0x2] sm:$0xff] }
 0x3e0   : > { %v3052_v28 = vld [vmem:[#allocation2 + $0x22] sm:$0xff]  ;;  %v7178_v11 = vld [vmem:[#allocation2 + $0x3a] sm:$0xff]  ;;  %v7184_v59 = vld [vmem:[#allocation2 + $0x32] sm:$0xff] }
 0x3e1   : > { %v7186_v34 = vld [vmem:[#allocation2 + $0x52] sm:$0xff]  ;;  %v7192_v44 = vld [vmem:[#allocation2 + $0x4a] sm:$0xff]  ;;  %v7200_v63 = vld [vmem:[#allocation2 + $0x62] sm:$0xff] }
 0x3e2   : > { %2969 = vrot.lane.b32.xlu0 %v2881_v52, %s5476_s30  ;;  %v7194_v62 = vld [vmem:[#allocation2 + $0x6a] sm:$0xff]  ;;  %v7202_v58 = vld [vmem:[#allocation2 + $0x82] sm:$0xff]  ;;  %v7208_v52 = vld [vmem:[#allocation2 + $0x7a] sm:$0xff] }
 0x3e3   : > { %2975 = vrot.lane.b32.xlu1 %v2884_v9, %s5476_s30  ;;  %v7210_v9 = vld [vmem:[#allocation2 + $0x9a] sm:$0xff]  ;;  %v7216_v8 = vld [vmem:[#allocation2 + $0x92] sm:$0xff]  ;;  %v7224_v7 = vld [vmem:[#allocation2 + $0xaa] sm:$0xff] }
 0x3e4   : > { %v7218_v24 = vld [vmem:[#allocation2 + $0xb2] sm:$0xff]  ;;  %v3068_v46 = vld [vmem:[#allocation2 + $0xe2] sm:$0xff]  ;;  %v3067_v21 = vld [vmem:[#allocation2 + $0xda] sm:$0xff] }
 0x3e6   : > { %2973 = vrot.lane.b32.xlu0 %v2883_v40, %s5476_s30  ;;  %v7226_v40 = vld [vmem:[#allocation2 + $0xca] sm:$0xff] }
 0x3e7   : > { %2979 = vrot.lane.b32.xlu1 %v2886_v6, %s5476_s30  ;;  %v7232_v6 = vld [vmem:[#allocation2 + $0xc2] sm:$0xff] }
 0x3ea   : > { %2977 = vrot.lane.b32.xlu0 %v2885_v43, %s5476_s30  ;;  %v3070_v43 = vld [vmem:[#allocation2 + $0xfa] sm:$0xff] }
 0x3eb   : > { %2983 = vrot.lane.b32.xlu1 %v2888_v55, %s5476_s30  ;;  %v3069_v55 = vld [vmem:[#allocation2 + $0xf2] sm:$0xff] }
 0x3ee   : > { %2981 = vrot.lane.b32.xlu0 %v2887_v47, %s5476_s30  ;;  %v3072_v47 = vld [vmem:[#allocation2 + $0x112] sm:$0xff] }
 0x3ef   : > { %3115 = vrot.lane.b32.xlu1 %v3050_v41, %s5477_s8  ;;  %v3071_v41 = vld [vmem:[#allocation2 + $0x10a] sm:$0xff] }
 0x3f2   : > { %3113 = vrot.lane.b32.xlu0 %v3049_v25, %s5477_s8  ;;  %v3074_v25 = vld [vmem:[#allocation2 + $0x12a] sm:$0xff] }
 0x3f3   : > { %3119 = vrot.lane.b32.xlu1 %v3052_v28, %s5477_s8 }
 0x3f6   : > { %3117 = vrot.lane.b32.xlu0 %v7176_v49, %s5477_s8 }
 0x3f7   : > { %3123 = vrot.lane.b32.xlu1 %v7178_v11, %s5477_s8 }
 0x3fa   : > { %3121 = vrot.lane.b32.xlu0 %v7184_v59, %s5477_s8 }
 0x3fb   : > { %3127 = vrot.lane.b32.xlu1 %v7186_v34, %s5477_s8 }
 0x3fe   : > { %3125 = vrot.lane.b32.xlu0 %v7192_v44, %s5477_s8 }
 0x3ff   : > { %3131 = vrot.lane.b32.xlu1 %v7194_v62, %s5477_s8 }
 0x402   : > { %3129 = vrot.lane.b32.xlu0 %v7200_v63, %s5477_s8 }
 0x403   : > { %3135 = vrot.lane.b32.xlu1 %v7202_v58, %s5477_s8 }
 0x406   : > { %3133 = vrot.lane.b32.xlu0 %v7208_v52, %s5477_s8 }
 0x407   : > { %3139 = vrot.lane.b32.xlu1 %v7210_v9, %s5477_s8 }
 0x40a   : > { %3137 = vrot.lane.b32.xlu0 %v7216_v8, %s5477_s8 }
 0x40b   : > { %3143 = vrot.lane.b32.xlu1 %v7218_v24, %s5477_s8 }
 0x40e   : > { %3141 = vrot.lane.b32.xlu0 %v7224_v7, %s5477_s8 }
 0x40f   : > { %3147 = vrot.lane.b32.xlu1 %v7226_v40, %s5477_s8 }
 0x412   : > { %3145 = vrot.lane.b32.xlu0 %v7232_v6, %s5477_s8 }
 0x413   : > { %3151 = vrot.lane.b32.xlu1 %v3068_v46, %s5477_s8  ;;  %v3073_v46 = vld [vmem:[#allocation2 + $0x122] sm:$0xff] }
 0x416   : > { %3149 = vrot.lane.b32.xlu0 %v3067_v21, %s5477_s8 }
 0x417   : > { %3155 = vrot.lane.b32.xlu1 %v3070_v43, %s5477_s8 }
 0x41a   : > { %3153 = vrot.lane.b32.xlu0 %v3069_v55, %s5477_s8 }
 0x41b   : > { %3159 = vrot.lane.b32.xlu1 %v3072_v47, %s5477_s8 }
 0x41e   : > { %3157 = vrot.lane.b32.xlu0 %v3071_v41, %s5477_s8  ;;  %v2924_v1 = vpop.permute.xlu1 %2923 }
 0x41f   : > { %3163 = vrot.lane.b32.xlu1 %v3074_v25, %s5477_s8  ;;  %3018 = vst.msk [vmem:[#allocation3 + $0x8] sm:$0xff] %vm647_vm2, %v2924_v1 }
 0x422   : > { %3161 = vrot.lane.b32.xlu0 %v3073_v46, %s5477_s8 }
 0x423   : > { %3307 = vrot.lane.b32.xlu1 %v7008_v48, %s5478_s9 }
 0x424   : > { %v2922_v21 = vpop.permute.xlu0 %2921 }
 0x425   : > { %v2928_v43 = vpop.permute.xlu1 %2927  ;;  %3017 = vst.msk [vmem:[#allocation3] sm:$0xff] %vm647_vm2, %v2922_v21  ;;  %v4428_v21 = vld [vmem:[%s8259_s4 + $0x18] sm:$0xff] }
 0x426   : > { %3020 = vst.msk [vmem:[#allocation3 + $0x18] sm:$0xff] %vm647_vm2, %v2928_v43  ;;  %3305 = vrot.lane.b32.xlu0 %v7061_v35, %s5478_s9 }
 0x427   : > { %3499 = vrot.lane.b32.xlu1 %v6957_v39, %s5479_s10 }
 0x428   : > { %v2926_v55 = vpop.permute.xlu0 %2925 }
 0x429   : > { %v2932_v1 = vpop.permute.xlu1 %2931  ;;  %3019 = vst.msk [vmem:[#allocation3 + $0x10] sm:$0xff] %vm647_vm2, %v2926_v55 }
 0x42a   : > { %3022 = vst.msk [vmem:[#allocation3 + $0x28] sm:$0xff] %vm647_vm2, %v2932_v1  ;;  %3497 = vrot.lane.b32.xlu0 %v6965_v17, %s5479_s10 }
 0x42b   : > { %3691 = vrot.lane.b32.xlu1 %v3052_v28, %s5480_s15 }
 0x42c   : > { %v2930_v48 = vpop.permute.xlu0 %2929 }
 0x42d   : > { %v2936_v47 = vpop.permute.xlu1 %2935  ;;  %3021 = vst.msk [vmem:[#allocation3 + $0x20] sm:$0xff] %vm647_vm2, %v2930_v48 }
 0x42e   : > { %3024 = vst.msk [vmem:[#allocation3 + $0x38] sm:$0xff] %vm647_vm2, %v2936_v47  ;;  %3689 = vrot.lane.b32.xlu0 %v7176_v49, %s5480_s15  ;;  %v4425_v49 = vld [vmem:[%s8259_s4] sm:$0xff] }
 0x42f   : > { %3309 = vrot.lane.b32.xlu1 %v7073_v5, %s5478_s9 }
 0x430   : > { %v2934_v39 = vpop.permute.xlu0 %2933 }
 0x431   : > { %v2940_v35 = vpop.permute.xlu1 %2939  ;;  %3023 = vst.msk [vmem:[#allocation3 + $0x30] sm:$0xff] %vm647_vm2, %v2934_v39 }
 0x432   : > { %3026 = vst.msk [vmem:[#allocation3 + $0x48] sm:$0xff] %vm647_vm2, %v2940_v35  ;;  %3881 = vrot.lane.b32.xlu0 %v7073_v5, %s5481_s20  ;;  %v4426_v5 = vld [vmem:[%s8259_s4 + $0x8] sm:$0xff] }
 0x433   : > { %4073 = vrot.lane.b32.xlu1 %v6973_v26, %s5482_s21  ;;  %v5440_v41 = vpack.c.bf16 %v4426_v5, %v4425_v49 }
 0x434   : > { %v2938_v17 = vpop.permute.xlu0 %2937 }
 0x435   : > { %v2944_v28 = vpop.permute.xlu1 %2943  ;;  %3025 = vst.msk [vmem:[#allocation3 + $0x40] sm:$0xff] %vm647_vm2, %v2938_v17  ;;  %5441 = vmatprep.subr.bf16.mxu1 %v5440_v41 }
 0x436   : > { %3028 = vst.msk [vmem:[#allocation3 + $0x58] sm:$0xff] %vm647_vm2, %v2944_v28  ;;  %3883 = vrot.lane.b32.xlu0 %v7023_v2, %s5481_s20  ;;  %5443 = vmatpush3.bf16.msra.mxu1 %v5440_v41 }
 0x437   : > { %3501 = vrot.lane.b32.xlu1 %v6973_v26, %s5479_s10  ;;  %v4427_v26 = vld [vmem:[%s8259_s4 + $0x10] sm:$0xff] }
 0x438   : > { %v2942_v25 = vpop.permute.xlu0 %2941  ;;  %v5444_v43 = vpack.c.bf16 %v4428_v21, %v4427_v26 }
 0x439   : > { %v2948_v46 = vpop.permute.xlu1 %2947  ;;  %3027 = vst.msk [vmem:[#allocation3 + $0x50] sm:$0xff] %vm647_vm2, %v2942_v25 }
 0x43a   : > { %3030 = vst.msk [vmem:[#allocation3 + $0x68] sm:$0xff] %vm647_vm2, %v2948_v46  ;;  %3311 = vrot.lane.b32.xlu0 %v7023_v2, %s5478_s9  ;;  %5445 = vmatprep.subr.bf16.mxu1 %v5444_v43  ;;  %v4429_v2 = vld [vmem:[%s8259_s4 + $0x20] sm:$0xf] }
 0x43b   : > { %4265 = vrot.lane.b32.xlu1 %v7184_v59, %s5483_s27  ;;  %5447 = vmatpush3.bf16.msra.mxu1 %v5444_v43 }
 0x43c   : > { %v2946_v55 = vpop.permute.xlu0 %2945  ;;  %5382 = vmatprep.subr.msk.mxu1 %vm2166_vm4, %v4429_v2 }
 0x43d   : > { %v2952_v1 = vpop.permute.xlu1 %2951  ;;  %3029 = vst.msk [vmem:[#allocation3 + $0x60] sm:$0xff] %vm647_vm2, %v2946_v55 }
 0x43e   : > { %3032 = vst.msk [vmem:[#allocation3 + $0x78] sm:$0xff] %vm647_vm2, %v2952_v1  ;;  %4075 = vrot.lane.b32.xlu0 %v6967_v31, %s5482_s21 }
 0x43f   : > { %3693 = vrot.lane.b32.xlu1 %v7184_v59, %s5480_s15  ;;  %5383 = vmatpush3.msk.msra.mxu1 %vm2166_vm4, %v4429_v2 }
 0x440   : > { %v2950_v48 = vpop.permute.xlu0 %2949 }
 0x441   : > { %v2956_v47 = vpop.permute.xlu1 %2955  ;;  %3031 = vst.msk [vmem:[#allocation3 + $0x70] sm:$0xff] %vm647_vm2, %v2950_v48 }
 0x442   : > { %3034 = vst.msk [vmem:[#allocation3 + $0x88] sm:$0xff] %vm647_vm2, %v2956_v47  ;;  %3503 = vrot.lane.b32.xlu0 %v6967_v31, %s5479_s10 }
 0x443   : > { %3695 = vrot.lane.b32.xlu1 %v7178_v11, %s5480_s15 }
 0x444   : > { %v2954_v59 = vpop.permute.xlu0 %2953 }
 0x445   : > { %v2960_v39 = vpop.permute.xlu1 %2959  ;;  %3033 = vst.msk [vmem:[#allocation3 + $0x80] sm:$0xff] %vm647_vm2, %v2954_v59 }
 0x446   : > { %3036 = vst.msk [vmem:[#allocation3 + $0x98] sm:$0xff] %vm647_vm2, %v2960_v39  ;;  %4267 = vrot.lane.b32.xlu0 %v7178_v11, %s5483_s27 }
 0x447   : > { %3313 = vrot.lane.b32.xlu1 %v7089_v57, %s5478_s9 }
 0x448   : > { %v2958_v35 = vpop.permute.xlu0 %2957 }
 0x449   : > { %v2964_v17 = vpop.permute.xlu1 %2963  ;;  %3035 = vst.msk [vmem:[#allocation3 + $0x90] sm:$0xff] %vm647_vm2, %v2958_v35 }
 0x44a   : > { %3038 = vst.msk [vmem:[#allocation3 + $0xa8] sm:$0xff] %vm647_vm2, %v2964_v17  ;;  %3885 = vrot.lane.b32.xlu0 %v7089_v57, %s5481_s20 }
 0x44b   : > { %4077 = vrot.lane.b32.xlu1 %v6981_v13, %s5482_s21 }
 0x44c   : > { %v2962_v31 = vpop.permute.xlu0 %2961 }
 0x44d   : > { %v2968_v28 = vpop.permute.xlu1 %2967  ;;  %3037 = vst.msk [vmem:[#allocation3 + $0xa0] sm:$0xff] %vm647_vm2, %v2962_v31 }
 0x44e   : > { %3040 = vst.msk [vmem:[#allocation3 + $0xb8] sm:$0xff] %vm647_vm2, %v2968_v28  ;;  %3887 = vrot.lane.b32.xlu0 %v7028_v61, %s5481_s20 }
 0x44f   : > { %3505 = vrot.lane.b32.xlu1 %v6981_v13, %s5479_s10 }
 0x450   : > { %v2966_v11 = vpop.permute.xlu0 %2965 }
 0x451   : > { %v2972_v49 = vpop.permute.xlu1 %2971  ;;  %3039 = vst.msk [vmem:[#allocation3 + $0xb0] sm:$0xff] %vm647_vm2, %v2966_v11 }
 0x452   : > { %3042 = vst.msk [vmem:[#allocation3 + $0xc8] sm:$0xff] %vm647_vm2, %v2972_v49  ;;  %3315 = vrot.lane.b32.xlu0 %v7028_v61, %s5478_s9 }
 0x453   : > { %4269 = vrot.lane.b32.xlu1 %v7192_v44, %s5483_s27 }
 0x454   : > { %v2970_v57 = vpop.permute.xlu0 %2969 }
 0x455   : > { %v2976_v5 = vpop.permute.xlu1 %2975  ;;  %3041 = vst.msk [vmem:[#allocation3 + $0xc0] sm:$0xff] %vm647_vm2, %v2970_v57 }
 0x456   : > { %3044 = vst.msk [vmem:[#allocation3 + $0xd8] sm:$0xff] %vm647_vm2, %v2976_v5  ;;  %4079 = vrot.lane.b32.xlu0 %v6975_v22, %s5482_s21 }
 0x457   : > { %3697 = vrot.lane.b32.xlu1 %v7192_v44, %s5480_s15 }
 0x458   : > { %v2974_v13 = vpop.permute.xlu0 %2973 }
 0x459   : > { %v2980_v41 = vpop.permute.xlu1 %2979  ;;  %3043 = vst.msk [vmem:[#allocation3 + $0xd0] sm:$0xff] %vm647_vm2, %v2974_v13 }
 0x45a   : > { %3046 = vst.msk [vmem:[#allocation3 + $0xe8] sm:$0xff] %vm647_vm2, %v2980_v41  ;;  %3507 = vrot.lane.b32.xlu0 %v6975_v22, %s5479_s10 }
 0x45b   : > { %3699 = vrot.lane.b32.xlu1 %v7186_v34, %s5480_s15 }
 0x45c   : > { %v2978_v61 = vpop.permute.xlu0 %2977 }
 0x45d   : > { %v2984_v25 = vpop.permute.xlu1 %2983  ;;  %3045 = vst.msk [vmem:[#allocation3 + $0xe0] sm:$0xff] %vm647_vm2, %v2978_v61 }
 0x45e   : > { %3048 = vst.msk [vmem:[#allocation3 + $0xf8] sm:$0xff] %vm647_vm2, %v2984_v25  ;;  %4271 = vrot.lane.b32.xlu0 %v7186_v34, %s5483_s27 }
 0x45f   : > { %3317 = vrot.lane.b32.xlu1 %v7100_v10, %s5478_s9 }
 0x460   : > { %v2982_v44 = vpop.permute.xlu0 %2981 }
 0x461   : > { %v3116_v46 = vpop.permute.xlu1 %3115  ;;  %3047 = vst.msk [vmem:[#allocation3 + $0xf0] sm:$0xff] %vm647_vm2, %v2982_v44  ;;  %v3446_v44 = vld [vmem:[#allocation2 + $0xb1] sm:$0xff] }
 0x462   : > { %3210 = vst.msk [vmem:[#allocation3 + $0x8] sm:$0xff] %vm840_vm3, %v3116_v46  ;;  %3889 = vrot.lane.b32.xlu0 %v7100_v10, %s5481_s20 }
 0x463   : > { %4081 = vrot.lane.b32.xlu1 %v6993_v27, %s5482_s21 }
 0x464   : > { %v3114_v22 = vpop.permute.xlu0 %3113 }
 0x465   : > { %v3120_v26 = vpop.permute.xlu1 %3119  ;;  %3209 = vst.msk [vmem:[#allocation3] sm:$0xff] %vm840_vm3, %v3114_v22 }
 0x466   : > { %3212 = vst.msk [vmem:[#allocation3 + $0x18] sm:$0xff] %vm840_vm3, %v3120_v26  ;;  %3891 = vrot.lane.b32.xlu0 %v7032_v37, %s5481_s20 }
 0x467   : > { %3509 = vrot.lane.b32.xlu1 %v6993_v27, %s5479_s10 }
 0x468   : > { %v3118_v34 = vpop.permute.xlu0 %3117 }
 0x469   : > { %v3124_v21 = vpop.permute.xlu1 %3123  ;;  %3211 = vst.msk [vmem:[#allocation3 + $0x10] sm:$0xff] %vm840_vm3, %v3118_v34  ;;  %v4021_v34 = vld [vmem:[#allocation2 + $0xc1] sm:$0xff] }
 0x46a   : > { %3214 = vst.msk [vmem:[#allocation3 + $0x28] sm:$0xff] %vm840_vm3, %v3124_v21  ;;  %3319 = vrot.lane.b32.xlu0 %v7032_v37, %s5478_s9 }
 0x46b   : > { %4273 = vrot.lane.b32.xlu1 %v7200_v63, %s5483_s27 }
 0x46c   : > { %v3122_v10 = vpop.permute.xlu0 %3121 }
 0x46d   : > { %v3128_v43 = vpop.permute.xlu1 %3127  ;;  %3213 = vst.msk [vmem:[#allocation3 + $0x20] sm:$0xff] %vm840_vm3, %v3122_v10 }
 0x46e   : > { %3216 = vst.msk [vmem:[#allocation3 + $0x38] sm:$0xff] %vm840_vm3, %v3128_v43  ;;  %4083 = vrot.lane.b32.xlu0 %v6984_v42, %s5482_s21 }
 0x46f   : > { %3701 = vrot.lane.b32.xlu1 %v7200_v63, %s5480_s15 }
 0x470   : > { %v3126_v27 = vpop.permute.xlu0 %3125 }
 0x471   : > { %v3132_v55 = vpop.permute.xlu1 %3131  ;;  %3215 = vst.msk [vmem:[#allocation3 + $0x30] sm:$0xff] %vm840_vm3, %v3126_v27 }
 0x472   : > { %3218 = vst.msk [vmem:[#allocation3 + $0x48] sm:$0xff] %vm840_vm3, %v3132_v55  ;;  %3511 = vrot.lane.b32.xlu0 %v6984_v42, %s5479_s10 }
 0x473   : > { %3703 = vrot.lane.b32.xlu1 %v7194_v62, %s5480_s15 }
 0x474   : > { %v3130_v37 = vpop.permute.xlu0 %3129 }
 0x475   : > { %v3136_v1 = vpop.permute.xlu1 %3135  ;;  %3217 = vst.msk [vmem:[#allocation3 + $0x40] sm:$0xff] %vm840_vm3, %v3130_v37  ;;  %v4022_v37 = vld [vmem:[#allocation2 + $0xc9] sm:$0xff] }
 0x476   : > { %3220 = vst.msk [vmem:[#allocation3 + $0x58] sm:$0xff] %vm840_vm3, %v3136_v1  ;;  %4275 = vrot.lane.b32.xlu0 %v7194_v62, %s5483_s27 }
 0x477   : > { %3321 = vrot.lane.b32.xlu1 %v7109_v51, %s5478_s9 }
 0x478   : > { %v3134_v63 = vpop.permute.xlu0 %3133 }
 0x479   : > { %v3140_v2 = vpop.permute.xlu1 %3139  ;;  %3219 = vst.msk [vmem:[#allocation3 + $0x50] sm:$0xff] %vm840_vm3, %v3134_v63 }
 0x47a   : > { %3222 = vst.msk [vmem:[#allocation3 + $0x68] sm:$0xff] %vm840_vm3, %v3140_v2  ;;  %3893 = vrot.lane.b32.xlu0 %v7109_v51, %s5481_s20 }
 0x47b   : > { %4085 = vrot.lane.b32.xlu1 %v7010_v0, %s5482_s21 }
 0x47c   : > { %v3138_v42 = vpop.permute.xlu0 %3137 }
 0x47d   : > { %v3144_v48 = vpop.permute.xlu1 %3143  ;;  %3221 = vst.msk [vmem:[#allocation3 + $0x60] sm:$0xff] %vm840_vm3, %v3138_v42 }
 0x47e   : > { %3224 = vst.msk [vmem:[#allocation3 + $0x78] sm:$0xff] %vm840_vm3, %v3144_v48  ;;  %3895 = vrot.lane.b32.xlu0 %v7046_v50, %s5481_s20 }
 0x47f   : > { %3513 = vrot.lane.b32.xlu1 %v7010_v0, %s5479_s10 }
 0x480   : > { %v3142_v62 = vpop.permute.xlu0 %3141 }
 0x481   : > { %v3148_v47 = vpop.permute.xlu1 %3147  ;;  %3223 = vst.msk [vmem:[#allocation3 + $0x70] sm:$0xff] %vm840_vm3, %v3142_v62  ;;  %v4023_v62 = vld [vmem:[#allocation2 + $0xd9] sm:$0xff] }
 0x482   : > { %3226 = vst.msk [vmem:[#allocation3 + $0x88] sm:$0xff] %vm840_vm3, %v3148_v47  ;;  %3323 = vrot.lane.b32.xlu0 %v7046_v50, %s5478_s9 }
 0x483   : > { %4277 = vrot.lane.b32.xlu1 %v7208_v52, %s5483_s27 }
 0x484   : > { %v3146_v51 = vpop.permute.xlu0 %3145 }
 0x485   : > { %v3152_v59 = vpop.permute.xlu1 %3151  ;;  %3225 = vst.msk [vmem:[#allocation3 + $0x80] sm:$0xff] %vm840_vm3, %v3146_v51 }
 0x486   : > { %3228 = vst.msk [vmem:[#allocation3 + $0x98] sm:$0xff] %vm840_vm3, %v3152_v59  ;;  %4087 = vrot.lane.b32.xlu0 %v6997_v29, %s5482_s21 }
 0x487   : > { %3705 = vrot.lane.b32.xlu1 %v7208_v52, %s5480_s15 }
 0x488   : > { %v3150_v0 = vpop.permute.xlu0 %3149 }
 0x489   : > { %v3156_v39 = vpop.permute.xlu1 %3155  ;;  %3227 = vst.msk [vmem:[#allocation3 + $0x90] sm:$0xff] %vm840_vm3, %v3150_v0 }
 0x48a   : > { %3230 = vst.msk [vmem:[#allocation3 + $0xa8] sm:$0xff] %vm840_vm3, %v3156_v39  ;;  %3515 = vrot.lane.b32.xlu0 %v6997_v29, %s5479_s10 }
 0x48b   : > { %3707 = vrot.lane.b32.xlu1 %v7202_v58, %s5480_s15 }
 0x48c   : > { %v3154_v50 = vpop.permute.xlu0 %3153 }
 0x48d   : > { %v3160_v35 = vpop.permute.xlu1 %3159  ;;  %3229 = vst.msk [vmem:[#allocation3 + $0xa0] sm:$0xff] %vm840_vm3, %v3154_v50 }
 0x48e   : > { %3232 = vst.msk [vmem:[#allocation3 + $0xb8] sm:$0xff] %vm840_vm3, %v3160_v35  ;;  %4279 = vrot.lane.b32.xlu0 %v7202_v58, %s5483_s27  ;;  %v4024_v35 = vld [vmem:[#allocation2 + $0xe1] sm:$0xff] }
 0x48f   : > { %3325 = vrot.lane.b32.xlu1 %v7115_v19, %s5478_s9 }
 0x490   : > { %v3158_v52 = vpop.permute.xlu0 %3157 }
 0x491   : > { %v3164_v17 = vpop.permute.xlu1 %3163  ;;  %3231 = vst.msk [vmem:[#allocation3 + $0xb0] sm:$0xff] %vm840_vm3, %v3158_v52 }
 0x492   : > { %3234 = vst.msk [vmem:[#allocation3 + $0xc8] sm:$0xff] %vm840_vm3, %v3164_v17  ;;  %3897 = vrot.lane.b32.xlu0 %v7115_v19, %s5481_s20 }
 0x493   : > { %4089 = vrot.lane.b32.xlu1 %v7034_v30, %s5482_s21 }
 0x494   : > { %v3162_v29 = vpop.permute.xlu0 %3161 }
 0x495   : > { %v3308_v31 = vpop.permute.xlu1 %3307  ;;  %3233 = vst.msk [vmem:[#allocation3 + $0xc0] sm:$0xff] %vm840_vm3, %v3162_v29 }
 0x496   : > { %3402 = vst.msk [vmem:[#allocation3 + $0x8] sm:$0xff] %vm1033_vm5, %v3308_v31  ;;  %3899 = vrot.lane.b32.xlu0 %v7053_v14, %s5481_s20 }
 0x497   : > { %3517 = vrot.lane.b32.xlu1 %v7034_v30, %s5479_s10 }
 0x498   : > { %v3306_v58 = vpop.permute.xlu0 %3305 }
 0x499   : > { %v3500_v28 = vpop.permute.xlu1 %3499  ;;  %3401 = vst.msk [vmem:[#allocation3] sm:$0xff] %vm1033_vm5, %v3306_v58 }
 0x49a   : > { %3594 = vst.msk [vmem:[#allocation3 + $0x8] sm:$0xff] %vm1226_vm6, %v3500_v28  ;;  %3327 = vrot.lane.b32.xlu0 %v7053_v14, %s5478_s9 }
 0x49b   : > { %4281 = vrot.lane.b32.xlu1 %v7216_v8, %s5483_s27 }
 0x49c   : > { %v3498_v19 = vpop.permute.xlu0 %3497 }
 0x49d   : > { %v3692_v11 = vpop.permute.xlu1 %3691  ;;  %3593 = vst.msk [vmem:[#allocation3] sm:$0xff] %vm1226_vm6, %v3498_v19 }
 0x49e   : > { %3786 = vst.msk [vmem:[#allocation3 + $0x8] sm:$0xff] %vm1419_vm7, %v3692_v11  ;;  %4091 = vrot.lane.b32.xlu0 %v7012_v15, %s5482_s21  ;;  %v4025_v11 = vld [vmem:[#allocation2 + $0xf1] sm:$0xff] }
 0x49f   : > { %3709 = vrot.lane.b32.xlu1 %v7216_v8, %s5480_s15 }
 0x4a0   : > { %v3690_v30 = vpop.permute.xlu0 %3689 }
 0x4a1   : > { %v3310_v49 = vpop.permute.xlu1 %3309  ;;  %3785 = vst.msk [vmem:[#allocation3] sm:$0xff] %vm1419_vm7, %v3690_v30 }
 0x4a2   : > { %3403 = vst.msk [vmem:[#allocation3 + $0x10] sm:$0xff] %vm1033_vm5, %v3310_v49  ;;  %3519 = vrot.lane.b32.xlu0 %v7012_v15, %s5479_s10 }
 0x4a3   : > { %3711 = vrot.lane.b32.xlu1 %v7210_v9, %s5480_s15 }
 0x4a4   : > { %v3882_v14 = vpop.permute.xlu0 %3881 }
 0x4a5   : > { %v4074_v57 = vpop.permute.xlu1 %4073  ;;  %3977 = vst.msk [vmem:[#allocation3] sm:$0xff] %vm1613_vm8, %v3882_v14 }
 0x4a6   : > { %4283 = vrot.lane.b32.xlu0 %v7210_v9, %s5483_s27  ;;  %4169 = vst.msk [vmem:[#allocation3] sm:$0xff] %vm1806_vm9, %v4074_v57 }
 0x4a7   : > { %3329 = vrot.lane.b32.xlu1 %v7121_v45, %s5478_s9 }
 0x4a8   : > { %v3884_v8 = vpop.permute.xlu0 %3883 }
 0x4a9   : > { %v3502_v5 = vpop.permute.xlu1 %3501  ;;  %3978 = vst.msk [vmem:[#allocation3 + $0x8] sm:$0xff] %vm1613_vm8, %v3884_v8 }
 0x4aa   : > { %3595 = vst.msk [vmem:[#allocation3 + $0x10] sm:$0xff] %vm1226_vm6, %v3502_v5  ;;  %3901 = vrot.lane.b32.xlu0 %v7121_v45, %s5481_s20 }
 0x4ab   : > { %4093 = vrot.lane.b32.xlu1 %v7048_v38, %s5482_s21 }
 0x4ac   : > { %v3312_v15 = vpop.permute.xlu0 %3311 }
 0x4ad   : > { %v4266_v13 = vpop.permute.xlu1 %4265  ;;  %3404 = vst.msk [vmem:[#allocation3 + $0x18] sm:$0xff] %vm1033_vm5, %v3312_v15 }
 0x4ae   : > { %4361 = vst.msk [vmem:[#allocation3] sm:$0xff] %vm1999_vm10, %v4266_v13  ;;  %3903 = vrot.lane.b32.xlu0 %v7058_v12, %s5481_s20  ;;  %v4026_v13 = vld [vmem:[#allocation2 + $0xf9] sm:$0xff] }
 0x4af   : > { %3521 = vrot.lane.b32.xlu1 %v7048_v38, %s5479_s10 }
 0x4b0   : > { %v4076_v9 = vpop.permute.xlu0 %4075 }
 0x4b1   : > { %v3694_v41 = vpop.permute.xlu1 %3693  ;;  %4170 = vst.msk [vmem:[#allocation3 + $0x8] sm:$0xff] %vm1806_vm9, %v4076_v9 }
 0x4b2   : > { %3787 = vst.msk [vmem:[#allocation3 + $0x10] sm:$0xff] %vm1419_vm7, %v3694_v41  ;;  %3331 = vrot.lane.b32.xlu0 %v7058_v12, %s5478_s9 }
 0x4b3   : > { %4285 = vrot.lane.b32.xlu1 %v7224_v7, %s5483_s27 }
 0x4b4   : > { %v3504_v45 = vpop.permute.xlu0 %3503 }
 0x4b5   : > { %v3696_v61 = vpop.permute.xlu1 %3695  ;;  %v4393_v25 = vld [vmem:[#allocation3] sm:$0xff]  ;;  %3596 = vst.msk [vmem:[#allocation3 + $0x18] sm:$0xff] %vm1226_vm6, %v3504_v45 }
 0x4b6   : > { %5384 = vmatprep.mubr.msk.f32.mxu1 %vm2069_vm11, %v4393_v25  ;;  %4095 = vrot.lane.b32.xlu0 %v7036_v60, %s5482_s21  ;;  %3788 = vst.msk [vmem:[#allocation3 + $0x18] sm:$0xff] %vm1419_vm7, %v3696_v61 }
 0x4b7   : > { %3713 = vrot.lane.b32.xlu1 %v7224_v7, %s5480_s15 }
 0x4b8   : > { %v4268_v38 = vpop.permute.xlu0 %4267 }
 0x4b9   : > { %v3314_v12 = vpop.permute.xlu1 %3313  ;;  %4362 = vst.msk [vmem:[#allocation3 + $0x8] sm:$0xff] %vm1999_vm10, %v4268_v38 }
 0x4ba   : > { %3405 = vst.msk [vmem:[#allocation3 + $0x20] sm:$0xff] %vm1033_vm5, %v3314_v12  ;;  %3523 = vrot.lane.b32.xlu0 %v3446_v44, %s5479_s10  ;;  %v4027_v44 = vld [vmem:[#allocation2 + $0x109] sm:$0xff] }
 0x4bb   : > { %3715 = vrot.lane.b32.xlu1 %v7218_v24, %s5480_s15 }
 0x4bc   : > { %v3886_v46 = vpop.permute.xlu0 %3885 }
 0x4bd   : > { %v4078_v22 = vpop.permute.xlu1 %4077  ;;  %3979 = vst.msk [vmem:[#allocation3 + $0x10] sm:$0xff] %vm1613_vm8, %v3886_v46 }
 0x4be   : > { %4287 = vrot.lane.b32.xlu0 %v7218_v24, %s5483_s27  ;;  %4171 = vst.msk [vmem:[#allocation3 + $0x10] sm:$0xff] %vm1806_vm9, %v4078_v22 }
 0x4bf   : > { %3333 = vrot.lane.b32.xlu1 %v7127_v16, %s5478_s9 }
 0x4c0   : > { %v3888_v60 = vpop.permute.xlu0 %3887  ;;  %v4394_v7 = vld [vmem:[#allocation3 + $0x8] sm:$0xff] }
 0x4c1   : > { %v3506_v26 = vpop.permute.xlu1 %3505  ;;  %3980 = vst.msk [vmem:[#allocation3 + $0x18] sm:$0xff] %vm1613_vm8, %v3888_v60  ;;  %5385 = vmatmul.mubr.msk.f32.vlgmr.msra.gmra.mrb[0].mxu1 %vm2069_vm11, %v4394_v7 }
 0x4c2   : > { %3597 = vst.msk [vmem:[#allocation3 + $0x20] sm:$0xff] %vm1226_vm6, %v3506_v26  ;;  %3905 = vrot.lane.b32.xlu0 %v7127_v16, %s5481_s20 }
 0x4c3   : > { %4097 = vrot.lane.b32.xlu1 %v4021_v34, %s5482_s21 }
 0x4c4   : > { %v3316_v24 = vpop.permute.xlu0 %3315 }
 0x4c5   : > { %v4270_v21 = vpop.permute.xlu1 %4269  ;;  %3406 = vst.msk [vmem:[#allocation3 + $0x28] sm:$0xff] %vm1033_vm5, %v3316_v24 }
 0x4c6   : > { %4363 = vst.msk [vmem:[#allocation3 + $0x10] sm:$0xff] %vm1999_vm10, %v4270_v21  ;;  %3907 = vrot.lane.b32.xlu0 %v7066_v3, %s5481_s20  ;;  %v4028_v21 = vld [vmem:[#allocation2 + $0x111] sm:$0xff] }
 0x4c7   : > { %3525 = vrot.lane.b32.xlu1 %v4021_v34, %s5479_s10 }
 0x4c8   : > { %v4080_v10 = vpop.permute.xlu0 %4079 }
 0x4c9   : > { %v3698_v43 = vpop.permute.xlu1 %3697  ;;  %4172 = vst.msk [vmem:[#allocation3 + $0x18] sm:$0xff] %vm1806_vm9, %v4080_v10 }
 0x4ca   : > { %3789 = vst.msk [vmem:[#allocation3 + $0x20] sm:$0xff] %vm1419_vm7, %v3698_v43  ;;  %3335 = vrot.lane.b32.xlu0 %v7066_v3, %s5478_s9 }
 0x4cb   : > { %4289 = vrot.lane.b32.xlu1 %v7232_v6, %s5483_s27 }
 0x4cc   : > { %v3508_v16 = vpop.permute.xlu0 %3507 }
 0x4cd   : > { %v3700_v27 = vpop.permute.xlu1 %3699  ;;  %v4395_v55 = vld [vmem:[#allocation3 + $0x10] sm:$0xff]  ;;  %3598 = vst.msk [vmem:[#allocation3 + $0x28] sm:$0xff] %vm1226_vm6, %v3508_v16 }
 0x4ce   : > { %5387 = vmatprep.mubr.msk.f32.mxu1 %vm2069_vm11, %v4395_v55  ;;  %4099 = vrot.lane.b32.xlu0 %v4022_v37, %s5482_s21  ;;  %3790 = vst.msk [vmem:[#allocation3 + $0x28] sm:$0xff] %vm1419_vm7, %v3700_v27 }
 0x4cf   : > { %3717 = vrot.lane.b32.xlu1 %v7232_v6, %s5480_s15 }
 0x4d0   : > { %v4272_v1 = vpop.permute.xlu0 %4271 }
 0x4d1   : > { %v3318_v3 = vpop.permute.xlu1 %3317  ;;  %4364 = vst.msk [vmem:[#allocation3 + $0x18] sm:$0xff] %vm1999_vm10, %v4272_v1 }
 0x4d2   : > { %3407 = vst.msk [vmem:[#allocation3 + $0x30] sm:$0xff] %vm1033_vm5, %v3318_v3  ;;  %3527 = vrot.lane.b32.xlu0 %v4022_v37, %s5479_s10  ;;  %v4029_v3 = vld [vmem:[#allocation2 + $0x121] sm:$0xff] }
 0x4d3   : > { %3719 = vrot.lane.b32.xlu1 %v7226_v40, %s5480_s15 }
 0x4d4   : > { %v3890_v63 = vpop.permute.xlu0 %3889 }
 0x4d5   : > { %v4082_v2 = vpop.permute.xlu1 %4081  ;;  %3981 = vst.msk [vmem:[#allocation3 + $0x20] sm:$0xff] %vm1613_vm8, %v3890_v63 }
 0x4d6   : > { %4291 = vrot.lane.b32.xlu0 %v7226_v40, %s5483_s27  ;;  %4173 = vst.msk [vmem:[#allocation3 + $0x20] sm:$0xff] %vm1806_vm9, %v4082_v2 }
 0x4d7   : > { %3337 = vrot.lane.b32.xlu1 %v7134_v56, %s5478_s9 }
 0x4d8   : > { %v3892_v6 = vpop.permute.xlu0 %3891  ;;  %v4396_v42 = vld [vmem:[#allocation3 + $0x18] sm:$0xff] }
 0x4d9   : > { %v3510_v48 = vpop.permute.xlu1 %3509  ;;  %3982 = vst.msk [vmem:[#allocation3 + $0x28] sm:$0xff] %vm1613_vm8, %v3892_v6  ;;  %5388 = vmatmul.mubr.msk.f32.gmra.mrb[2].mxu1 %vm2069_vm11, %v4396_v42 }
 0x4da   : > { %3599 = vst.msk [vmem:[#allocation3 + $0x30] sm:$0xff] %vm1226_vm6, %v3510_v48  ;;  %3909 = vrot.lane.b32.xlu0 %v7134_v56, %s5481_s20  ;;  %v4215_v56 = vld [vmem:[#allocation2 + $0xda] sm:$0xff] }
 0x4db   : > { %4101 = vrot.lane.b32.xlu1 %v4023_v62, %s5482_s21 }
 0x4dc   : > { %v3320_v40 = vpop.permute.xlu0 %3319 }
 0x4dd   : > { %v4274_v47 = vpop.permute.xlu1 %4273  ;;  %3408 = vst.msk [vmem:[#allocation3 + $0x38] sm:$0xff] %vm1033_vm5, %v3320_v40 }
 0x4de   : > { %4365 = vst.msk [vmem:[#allocation3 + $0x20] sm:$0xff] %vm1999_vm10, %v4274_v47  ;;  %3911 = vrot.lane.b32.xlu0 %v7078_v33, %s5481_s20  ;;  %v4030_v47 = vld [vmem:[#allocation2 + $0x129] sm:$0xff] }
 0x4df   : > { %3529 = vrot.lane.b32.xlu1 %v4023_v62, %s5479_s10 }
 0x4e0   : > { %v4084_v51 = vpop.permute.xlu0 %4083 }
 0x4e1   : > { %v3702_v59 = vpop.permute.xlu1 %3701  ;;  %4174 = vst.msk [vmem:[#allocation3 + $0x28] sm:$0xff] %vm1806_vm9, %v4084_v51 }
 0x4e2   : > { %3791 = vst.msk [vmem:[#allocation3 + $0x30] sm:$0xff] %vm1419_vm7, %v3702_v59  ;;  %3339 = vrot.lane.b32.xlu0 %v7078_v33, %s5478_s9  ;;  %v3642_v33 = vld [vmem:[#allocation2 + $0xe2] sm:$0xff] }
 0x4e3   : > { %4293 = vrot.lane.b32.xlu1 %v4215_v56, %s5483_s27 }
 0x4e4   : > { %v3512_v0 = vpop.permute.xlu0 %3511 }
 0x4e5   : > { %v3704_v39 = vpop.permute.xlu1 %3703  ;;  %v4397_v50 = vld [vmem:[#allocation3 + $0x20] sm:$0xff]  ;;  %3600 = vst.msk [vmem:[#allocation3 + $0x38] sm:$0xff] %vm1226_vm6, %v3512_v0 }
 0x4e6   : > { %5390 = vmatprep.mubr.msk.f32.mxu1 %vm2069_vm11, %v4397_v50  ;;  %4103 = vrot.lane.b32.xlu0 %v4024_v35, %s5482_s21  ;;  %3792 = vst.msk [vmem:[#allocation3 + $0x38] sm:$0xff] %vm1419_vm7, %v3704_v39 }
 0x4e7   : > { %3721 = vrot.lane.b32.xlu1 %v4215_v56, %s5480_s15 }
 0x4e8   : > { %v4276_v52 = vpop.permute.xlu0 %4275 }
 0x4e9   : > { %v3322_v17 = vpop.permute.xlu1 %3321  ;;  %4366 = vst.msk [vmem:[#allocation3 + $0x28] sm:$0xff] %vm1999_vm10, %v4276_v52  ;;  %v4031_v52 = vld [vmem:[#allocation2 + $0x139] sm:$0xff] }
 0x4ea   : > { %3409 = vst.msk [vmem:[#allocation3 + $0x40] sm:$0xff] %vm1033_vm5, %v3322_v17  ;;  %3531 = vrot.lane.b32.xlu0 %v4024_v35, %s5479_s10 }
 0x4eb   : > { %3723 = vrot.lane.b32.xlu1 %v3642_v33, %s5480_s15 }
 0x4ec   : > { %v3894_v29 = vpop.permute.xlu0 %3893 }
 0x4ed   : > { %v4086_v31 = vpop.permute.xlu1 %4085  ;;  %3983 = vst.msk [vmem:[#allocation3 + $0x30] sm:$0xff] %vm1613_vm8, %v3894_v29  ;;  %v3840_v29 = vld [vmem:[#allocation2 + $0x140] sm:$0xff] }
 0x4ee   : > { %4295 = vrot.lane.b32.xlu0 %v3642_v33, %s5483_s27  ;;  %4175 = vst.msk [vmem:[#allocation3 + $0x30] sm:$0xff] %vm1806_vm9, %v4086_v31 }
 0x4ef   : > { %3341 = vrot.lane.b32.xlu1 %v7138_v53, %s5478_s9 }
 0x4f0   : > { %v3896_v58 = vpop.permute.xlu0 %3895  ;;  %v4398_v28 = vld [vmem:[#allocation3 + $0x28] sm:$0xff] }
 0x4f1   : > { %v3514_v19 = vpop.permute.xlu1 %3513  ;;  %3984 = vst.msk [vmem:[#allocation3 + $0x38] sm:$0xff] %vm1613_vm8, %v3896_v58  ;;  %5391 = vmatmul.mubr.msk.f32.gmra.mrb[4].mxu1 %vm2069_vm11, %v4398_v28 }
 0x4f2   : > { %3601 = vst.msk [vmem:[#allocation3 + $0x40] sm:$0xff] %vm1226_vm6, %v3514_v19  ;;  %3913 = vrot.lane.b32.xlu0 %v7138_v53, %s5481_s20  ;;  %v4217_v53 = vld [vmem:[#allocation2 + $0xf2] sm:$0xff] }
 0x4f3   : > { %4105 = vrot.lane.b32.xlu1 %v4025_v11, %s5482_s21 }
 0x4f4   : > { %v3324_v30 = vpop.permute.xlu0 %3323 }
 0x4f5   : > { %v4278_v49 = vpop.permute.xlu1 %4277  ;;  %3410 = vst.msk [vmem:[#allocation3 + $0x48] sm:$0xff] %vm1033_vm5, %v3324_v30  ;;  %v4032_v30 = vld [vmem:[#allocation2 + $0x141] sm:$0xff] }
 0x4f6   : > { %4367 = vst.msk [vmem:[#allocation3 + $0x30] sm:$0xff] %vm1999_vm10, %v4278_v49  ;;  %3915 = vrot.lane.b32.xlu0 %v7085_v36, %s5481_s20 }
 0x4f7   : > { %3533 = vrot.lane.b32.xlu1 %v4025_v11, %s5479_s10 }
 0x4f8   : > { %v4088_v14 = vpop.permute.xlu0 %4087 }
 0x4f9   : > { %v3706_v57 = vpop.permute.xlu1 %3705  ;;  %4176 = vst.msk [vmem:[#allocation3 + $0x38] sm:$0xff] %vm1806_vm9, %v4088_v14 }
 0x4fa   : > { %3793 = vst.msk [vmem:[#allocation3 + $0x40] sm:$0xff] %vm1419_vm7, %v3706_v57  ;;  %3343 = vrot.lane.b32.xlu0 %v7085_v36, %s5478_s9  ;;  %v3644_v36 = vld [vmem:[#allocation2 + $0xfa] sm:$0xff] }
 0x4fb   : > { %4297 = vrot.lane.b32.xlu1 %v4217_v53, %s5483_s27 }
 0x4fc   : > { %v3516_v8 = vpop.permute.xlu0 %3515 }
 0x4fd   : > { %v3708_v5 = vpop.permute.xlu1 %3707  ;;  %v4399_v15 = vld [vmem:[#allocation3 + $0x30] sm:$0xff]  ;;  %3602 = vst.msk [vmem:[#allocation3 + $0x48] sm:$0xff] %vm1226_vm6, %v3516_v8 }
 0x4fe   : > { %5393 = vmatprep.mubr.msk.f32.mxu1 %vm2069_vm11, %v4399_v15  ;;  %4107 = vrot.lane.b32.xlu0 %v4026_v13, %s5482_s21  ;;  %3794 = vst.msk [vmem:[#allocation3 + $0x48] sm:$0xff] %vm1419_vm7, %v3708_v5  ;;  %v4224_v8 = vld [vmem:[#allocation2 + $0x142] sm:$0xff]  ;;  %v3841_v5 = vld [vmem:[#allocation2 + $0x150] sm:$0xff] }
 0x4ff   : > { %3725 = vrot.lane.b32.xlu1 %v4217_v53, %s5480_s15 }
 0x500   : > { %v4280_v9 = vpop.permute.xlu0 %4279 }
 0x501   : > { %v3326_v41 = vpop.permute.xlu1 %3325  ;;  %4368 = vst.msk [vmem:[#allocation3 + $0x38] sm:$0xff] %vm1999_vm10, %v4280_v9 }
 0x502   : > { %3411 = vst.msk [vmem:[#allocation3 + $0x50] sm:$0xff] %vm1033_vm5, %v3326_v41  ;;  %3535 = vrot.lane.b32.xlu0 %v4026_v13, %s5479_s10 }
 0x503   : > { %3727 = vrot.lane.b32.xlu1 %v3644_v36, %s5480_s15 }
 0x504   : > { %v3898_v45 = vpop.permute.xlu0 %3897 }
 0x505   : > { %v4090_v61 = vpop.permute.xlu1 %4089  ;;  %3985 = vst.msk [vmem:[#allocation3 + $0x40] sm:$0xff] %vm1613_vm8, %v3898_v45  ;;  %v4033_v45 = vld [vmem:[#allocation2 + $0x151] sm:$0xff] }
 0x506   : > { %4299 = vrot.lane.b32.xlu0 %v3644_v36, %s5483_s27  ;;  %4177 = vst.msk [vmem:[#allocation3 + $0x40] sm:$0xff] %vm1806_vm9, %v4090_v61 }
 0x507   : > { %3345 = vrot.lane.b32.xlu1 %v7142_v54, %s5478_s9 }
 0x508   : > { %v3900_v25 = vpop.permute.xlu0 %3899  ;;  %v4400_v38 = vld [vmem:[#allocation3 + $0x38] sm:$0xff] }
 0x509   : > { %v3518_v12 = vpop.permute.xlu1 %3517  ;;  %3986 = vst.msk [vmem:[#allocation3 + $0x48] sm:$0xff] %vm1613_vm8, %v3900_v25  ;;  %5394 = vmatmul.mubr.msk.f32.gmra.mrb[6].mxu1 %vm2069_vm11, %v4400_v38  ;;  %v3842_v38 = vld [vmem:[#allocation2 + $0x158] sm:$0xff] }
 0x50a   : > { %3603 = vst.msk [vmem:[#allocation3 + $0x50] sm:$0xff] %vm1226_vm6, %v3518_v12  ;;  %3917 = vrot.lane.b32.xlu0 %v7142_v54, %s5481_s20  ;;  %v4219_v54 = vld [vmem:[#allocation2 + $0x10a] sm:$0xff] }
 0x50b   : > { %4109 = vrot.lane.b32.xlu1 %v4027_v44, %s5482_s21 }
 0x50c   : > { %v3328_v46 = vpop.permute.xlu0 %3327 }
 0x50d   : > { %v4282_v22 = vpop.permute.xlu1 %4281  ;;  %3412 = vst.msk [vmem:[#allocation3 + $0x58] sm:$0xff] %vm1033_vm5, %v3328_v46 }
 0x50e   : > { %4369 = vst.msk [vmem:[#allocation3 + $0x40] sm:$0xff] %vm1999_vm10, %v4282_v22  ;;  %3919 = vrot.lane.b32.xlu0 %v7087_v32, %s5481_s20  ;;  %v4225_v22 = vld [vmem:[#allocation2 + $0x152] sm:$0xff] }
 0x50f   : > { %3537 = vrot.lane.b32.xlu1 %v4027_v44, %s5479_s10 }
 0x510   : > { %v4092_v60 = vpop.permute.xlu0 %4091 }
 0x511   : > { %v3710_v7 = vpop.permute.xlu1 %3709  ;;  %4178 = vst.msk [vmem:[#allocation3 + $0x48] sm:$0xff] %vm1806_vm9, %v4092_v60 }
 0x512   : > { %3795 = vst.msk [vmem:[#allocation3 + $0x50] sm:$0xff] %vm1419_vm7, %v3710_v7  ;;  %3347 = vrot.lane.b32.xlu0 %v7087_v32, %s5478_s9  ;;  %v3646_v32 = vld [vmem:[#allocation2 + $0x112] sm:$0xff] }
 0x513   : > { %4301 = vrot.lane.b32.xlu1 %v4219_v54, %s5483_s27 }
 0x514   : > { %v3520_v26 = vpop.permute.xlu0 %3519 }
 0x515   : > { %v3712_v34 = vpop.permute.xlu1 %3711  ;;  %v4401_v24 = vld [vmem:[#allocation3 + $0x40] sm:$0xff]  ;;  %3604 = vst.msk [vmem:[#allocation3 + $0x58] sm:$0xff] %vm1226_vm6, %v3520_v26 }
 0x516   : > { %5396 = vmatprep.mubr.msk.f32.mxu1 %vm2069_vm11, %v4401_v24  ;;  %4111 = vrot.lane.b32.xlu0 %v4028_v21, %s5482_s21  ;;  %3796 = vst.msk [vmem:[#allocation3 + $0x58] sm:$0xff] %vm1419_vm7, %v3712_v34 }
 0x517   : > { %3729 = vrot.lane.b32.xlu1 %v4219_v54, %s5480_s15  ;;  %v4034_v54 = vld [vmem:[#allocation2 + $0x159] sm:$0xff] }
 0x518   : > { %v4284_v10 = vpop.permute.xlu0 %4283 }
 0x519   : > { %v3330_v43 = vpop.permute.xlu1 %3329  ;;  %4370 = vst.msk [vmem:[#allocation3 + $0x48] sm:$0xff] %vm1999_vm10, %v4284_v10 }
 0x51a   : > { %3413 = vst.msk [vmem:[#allocation3 + $0x60] sm:$0xff] %vm1033_vm5, %v3330_v43  ;;  %3539 = vrot.lane.b32.xlu0 %v4028_v21, %s5479_s10  ;;  %v4226_v43 = vld [vmem:[#allocation2 + $0x15a] sm:$0xff] }
 0x51b   : > { %3731 = vrot.lane.b32.xlu1 %v3646_v32, %s5480_s15 }
 0x51c   : > { %v3902_v16 = vpop.permute.xlu0 %3901 }
 0x51d   : > { %v4094_v27 = vpop.permute.xlu1 %4093  ;;  %3987 = vst.msk [vmem:[#allocation3 + $0x50] sm:$0xff] %vm1613_vm8, %v3902_v16 }
 0x51e   : > { %4303 = vrot.lane.b32.xlu0 %v3646_v32, %s5483_s27  ;;  %4179 = vst.msk [vmem:[#allocation3 + $0x50] sm:$0xff] %vm1806_vm9, %v4094_v27  ;;  %v3843_v32 = vld [vmem:[#allocation2 + $0x168] sm:$0xff] }
 0x51f   : > { %3349 = vrot.lane.b32.xlu1 %v7146_v4, %s5478_s9 }
 0x520   : > { %v3904_v55 = vpop.permute.xlu0 %3903  ;;  %v4402_v37 = vld [vmem:[#allocation3 + $0x48] sm:$0xff] }
 0x521   : > { %v3522_v1 = vpop.permute.xlu1 %3521  ;;  %3988 = vst.msk [vmem:[#allocation3 + $0x58] sm:$0xff] %vm1613_vm8, %v3904_v55  ;;  %5397 = vmatmul.mubr.msk.f32.gmra.mrb[8].mxu1 %vm2069_vm11, %v4402_v37 }
 0x522   : > { %3605 = vst.msk [vmem:[#allocation3 + $0x60] sm:$0xff] %vm1226_vm6, %v3522_v1  ;;  %3921 = vrot.lane.b32.xlu0 %v7146_v4, %s5481_s20  ;;  %v4221_v4 = vld [vmem:[#allocation2 + $0x122] sm:$0xff] }
 0x523   : > { %4113 = vrot.lane.b32.xlu1 %v4029_v3, %s5482_s21  ;;  %v4035_v1 = vld [vmem:[#allocation2 + $0x169] sm:$0xff] }
 0x524   : > { %v3332_v63 = vpop.permute.xlu0 %3331 }
 0x525   : > { %v4286_v2 = vpop.permute.xlu1 %4285  ;;  %3414 = vst.msk [vmem:[#allocation3 + $0x68] sm:$0xff] %vm1033_vm5, %v3332_v63 }
 0x526   : > { %4371 = vst.msk [vmem:[#allocation3 + $0x50] sm:$0xff] %vm1999_vm10, %v4286_v2  ;;  %3923 = vrot.lane.b32.xlu0 %v7096_v20, %s5481_s20 }
 0x527   : > { %3541 = vrot.lane.b32.xlu1 %v4029_v3, %s5479_s10 }
 0x528   : > { %v4096_v6 = vpop.permute.xlu0 %4095 }
 0x529   : > { %v3714_v42 = vpop.permute.xlu1 %3713  ;;  %4180 = vst.msk [vmem:[#allocation3 + $0x58] sm:$0xff] %vm1806_vm9, %v4096_v6  ;;  %v3844_v6 = vld [vmem:[#allocation2 + $0x170] sm:$0xff] }
 0x52a   : > { %3797 = vst.msk [vmem:[#allocation3 + $0x60] sm:$0xff] %vm1419_vm7, %v3714_v42  ;;  %3351 = vrot.lane.b32.xlu0 %v7096_v20, %s5478_s9  ;;  %v3648_v20 = vld [vmem:[#allocation2 + $0x12a] sm:$0xff] }
 0x52b   : > { %4305 = vrot.lane.b32.xlu1 %v4221_v4, %s5483_s27 }
 0x52c   : > { %v3524_v48 = vpop.permute.xlu0 %3523 }
 0x52d   : > { %v3716_v62 = vpop.permute.xlu1 %3715  ;;  %v4403_v40 = vld [vmem:[#allocation3 + $0x50] sm:$0xff]  ;;  %3606 = vst.msk [vmem:[#allocation3 + $0x68] sm:$0xff] %vm1226_vm6, %v3524_v48  ;;  %v4227_v48 = vld [vmem:[#allocation2 + $0x16a] sm:$0xff] }
 0x52e   : > { %5399 = vmatprep.mubr.msk.f32.mxu1 %vm2069_vm11, %v4403_v40  ;;  %4115 = vrot.lane.b32.xlu0 %v4030_v47, %s5482_s21  ;;  %3798 = vst.msk [vmem:[#allocation3 + $0x68] sm:$0xff] %vm1419_vm7, %v3716_v62 }
 0x52f   : > { %3733 = vrot.lane.b32.xlu1 %v4221_v4, %s5480_s15 }
 0x530   : > { %v4288_v51 = vpop.permute.xlu0 %4287 }
 0x531   : > { %v3334_v59 = vpop.permute.xlu1 %3333  ;;  %4372 = vst.msk [vmem:[#allocation3 + $0x58] sm:$0xff] %vm1999_vm10, %v4288_v51 }
 0x532   : > { %3415 = vst.msk [vmem:[#allocation3 + $0x70] sm:$0xff] %vm1033_vm5, %v3334_v59  ;;  %3543 = vrot.lane.b32.xlu0 %v4030_v47, %s5479_s10  ;;  %v4036_v47 = vld [vmem:[#allocation2 + $0x171] sm:$0xff] }
 0x533   : > { %3735 = vrot.lane.b32.xlu1 %v3648_v20, %s5480_s15 }
 0x534   : > { %v3906_v56 = vpop.permute.xlu0 %3905 }
 0x535   : > { %v4098_v0 = vpop.permute.xlu1 %4097  ;;  %3989 = vst.msk [vmem:[#allocation3 + $0x60] sm:$0xff] %vm1613_vm8, %v3906_v56 }
 0x536   : > { %4307 = vrot.lane.b32.xlu0 %v3648_v20, %s5483_s27  ;;  %4181 = vst.msk [vmem:[#allocation3 + $0x60] sm:$0xff] %vm1806_vm9, %v4098_v0 }
 0x537   : > { %3353 = vrot.lane.b32.xlu1 %v7152_v23, %s5478_s9 }
 0x538   : > { %v3908_v39 = vpop.permute.xlu0 %3907  ;;  %v4404_v50 = vld [vmem:[#allocation3 + $0x58] sm:$0xff] }
 0x539   : > { %v3526_v35 = vpop.permute.xlu1 %3525  ;;  %3990 = vst.msk [vmem:[#allocation3 + $0x68] sm:$0xff] %vm1613_vm8, %v3908_v39  ;;  %5400 = vmatmul.mubr.msk.f32.gmra.mrb[10].mxu1 %vm2069_vm11, %v4404_v50  ;;  %v4228_v39 = vld [vmem:[#allocation2 + $0x172] sm:$0xff]  ;;  %v3845_v50 = vld [vmem:[#allocation2 + $0x180] sm:$0xff] }
 0x53a   : > { %3607 = vst.msk [vmem:[#allocation3 + $0x70] sm:$0xff] %vm1226_vm6, %v3526_v35  ;;  %3925 = vrot.lane.b32.xlu0 %v7152_v23, %s5481_s20  ;;  %v4223_v23 = vld [vmem:[#allocation2 + $0x13a] sm:$0xff] }
 0x53b   : > { %4117 = vrot.lane.b32.xlu1 %v4031_v52, %s5482_s21 }
 0x53c   : > { %v3336_v17 = vpop.permute.xlu0 %3335 }
 0x53d   : > { %v4290_v33 = vpop.permute.xlu1 %4289  ;;  %3416 = vst.msk [vmem:[#allocation3 + $0x78] sm:$0xff] %vm1033_vm5, %v3336_v17 }
 0x53e   : > { %4373 = vst.msk [vmem:[#allocation3 + $0x60] sm:$0xff] %vm1999_vm10, %v4290_v33  ;;  %3927 = vrot.lane.b32.xlu0 %v3840_v29, %s5481_s20 }
 0x53f   : > { %3545 = vrot.lane.b32.xlu1 %v4031_v52, %s5479_s10 }
 0x540   : > { %v4100_v31 = vpop.permute.xlu0 %4099 }
 0x541   : > { %v3718_v58 = vpop.permute.xlu1 %3717  ;;  %4182 = vst.msk [vmem:[#allocation3 + $0x68] sm:$0xff] %vm1806_vm9, %v4100_v31  ;;  %v4037_v31 = vld [vmem:[#allocation2 + $0x181] sm:$0xff] }
 0x542   : > { %3799 = vst.msk [vmem:[#allocation3 + $0x70] sm:$0xff] %vm1419_vm7, %v3718_v58  ;;  %3355 = vrot.lane.b32.xlu0 %v3840_v29, %s5478_s9 }
 0x543   : > { %4309 = vrot.lane.b32.xlu1 %v4223_v23, %s5483_s27 }
 0x544   : > { %v3528_v28 = vpop.permute.xlu0 %3527 }
 0x545   : > { %v3720_v19 = vpop.permute.xlu1 %3719  ;;  %v4405_v11 = vld [vmem:[#allocation3 + $0x60] sm:$0xff]  ;;  %3608 = vst.msk [vmem:[#allocation3 + $0x78] sm:$0xff] %vm1226_vm6, %v3528_v28  ;;  %v3846_v28 = vld [vmem:[#allocation2 + $0x188] sm:$0xff] }
 0x546   : > { %5402 = vmatprep.mubr.msk.f32.mxu1 %vm2069_vm11, %v4405_v11  ;;  %4119 = vrot.lane.b32.xlu0 %v4032_v30, %s5482_s21  ;;  %3800 = vst.msk [vmem:[#allocation3 + $0x78] sm:$0xff] %vm1419_vm7, %v3720_v19 }
 0x547   : > { %3737 = vrot.lane.b32.xlu1 %v4223_v23, %s5480_s15 }
 0x548   : > { %v4292_v49 = vpop.permute.xlu0 %4291 }
 0x549   : > { %v3338_v14 = vpop.permute.xlu1 %3337  ;;  %4374 = vst.msk [vmem:[#allocation3 + $0x68] sm:$0xff] %vm1999_vm10, %v4292_v49 }
 0x54a   : > { %3417 = vst.msk [vmem:[#allocation3 + $0x80] sm:$0xff] %vm1033_vm5, %v3338_v14  ;;  %3547 = vrot.lane.b32.xlu0 %v4032_v30, %s5479_s10 }
 0x54b   : > { %3165 = vrot.lane.b32.xlu1 %v4223_v23, %s5477_s8 }
 0x54c   : > { %v3910_v57 = vpop.permute.xlu0 %3909 }
 0x54d   : > { %v4102_v53 = vpop.permute.xlu1 %4101  ;;  %3991 = vst.msk [vmem:[#allocation3 + $0x70] sm:$0xff] %vm1613_vm8, %v3910_v57 }
 0x54e   : > { %4311 = vrot.lane.b32.xlu0 %v4224_v8, %s5483_s27  ;;  %4183 = vst.msk [vmem:[#allocation3 + $0x70] sm:$0xff] %vm1806_vm9, %v4102_v53  ;;  %v4229_v53 = vld [vmem:[#allocation2 + $0x182] sm:$0xff] }
 0x54f   : > { %3929 = vrot.lane.b32.xlu1 %v3841_v5, %s5481_s20 }
 0x550   : > { %v3912_v15 = vpop.permute.xlu0 %3911  ;;  %v4406_v13 = vld [vmem:[#allocation3 + $0x68] sm:$0xff] }
 0x551   : > { %v3530_v9 = vpop.permute.xlu1 %3529  ;;  %3992 = vst.msk [vmem:[#allocation3 + $0x78] sm:$0xff] %vm1613_vm8, %v3912_v15  ;;  %5403 = vmatmul.mubr.msk.f32.gmra.mrb[12].mxu1 %vm2069_vm11, %v4406_v13 }
 0x552   : > { %3609 = vst.msk [vmem:[#allocation3 + $0x80] sm:$0xff] %vm1226_vm6, %v3530_v9  ;;  %3739 = vrot.lane.b32.xlu0 %v4224_v8, %s5480_s15 }
 0x553   : > { %3357 = vrot.lane.b32.xlu1 %v3841_v5, %s5478_s9 }
 0x554   : > { %v3340_v41 = vpop.permute.xlu0 %3339 }
 0x555   : > { %v4294_v36 = vpop.permute.xlu1 %4293  ;;  %3418 = vst.msk [vmem:[#allocation3 + $0x88] sm:$0xff] %vm1033_vm5, %v3340_v41 }
 0x556   : > { %4375 = vst.msk [vmem:[#allocation3 + $0x70] sm:$0xff] %vm1999_vm10, %v4294_v36  ;;  %3167 = vrot.lane.b32.xlu0 %v4224_v8, %s5477_s8 }
 0x557   : > { %4121 = vrot.lane.b32.xlu1 %v4033_v45, %s5482_s21 }
 0x558   : > { %v4104_v61 = vpop.permute.xlu0 %4103 }
 0x559   : > { %v3722_v25 = vpop.permute.xlu1 %3721  ;;  %4184 = vst.msk [vmem:[#allocation3 + $0x78] sm:$0xff] %vm1806_vm9, %v4104_v61  ;;  %v4038_v61 = vld [vmem:[#allocation2 + $0x189] sm:$0xff] }
 0x55a   : > { %3801 = vst.msk [vmem:[#allocation3 + $0x80] sm:$0xff] %vm1419_vm7, %v3722_v25  ;;  %3931 = vrot.lane.b32.xlu0 %v3842_v38, %s5481_s20 }
 0x55b   : > { %3549 = vrot.lane.b32.xlu1 %v4033_v45, %s5479_s10 }
 0x55c   : > { %v3532_v12 = vpop.permute.xlu0 %3531 }
 0x55d   : > { %v3724_v44 = vpop.permute.xlu1 %3723  ;;  %v4407_v46 = vld [vmem:[#allocation3 + $0x70] sm:$0xff]  ;;  %3610 = vst.msk [vmem:[#allocation3 + $0x88] sm:$0xff] %vm1226_vm6, %v3532_v12 }
 0x55e   : > { %5405 = vmatprep.mubr.msk.f32.mxu1 %vm2069_vm11, %v4407_v46  ;;  %3359 = vrot.lane.b32.xlu0 %v3842_v38, %s5478_s9  ;;  %3802 = vst.msk [vmem:[#allocation3 + $0x88] sm:$0xff] %vm1419_vm7, %v3724_v44  ;;  %v3656_v44 = vld [vmem:[#allocation2 + $0x18a] sm:$0xff] }
 0x55f   : > { %4313 = vrot.lane.b32.xlu1 %v4225_v22, %s5483_s27 }
 0x560   : > { %v4296_v60 = vpop.permute.xlu0 %4295 }
 0x561   : > { %v3342_v7 = vpop.permute.xlu1 %3341  ;;  %4376 = vst.msk [vmem:[#allocation3 + $0x78] sm:$0xff] %vm1999_vm10, %v4296_v60  ;;  %v3848_v60 = vld [vmem:[#allocation2 + $0x1a0] sm:$0xff] }
 0x562   : > { %3419 = vst.msk [vmem:[#allocation3 + $0x90] sm:$0xff] %vm1033_vm5, %v3342_v7  ;;  %4123 = vrot.lane.b32.xlu0 %v4034_v54, %s5482_s21 }
 0x563   : > { %3741 = vrot.lane.b32.xlu1 %v4225_v22, %s5480_s15 }
 0x564   : > { %v3914_v26 = vpop.permute.xlu0 %3913 }
 0x565   : > { %v4106_v34 = vpop.permute.xlu1 %4105  ;;  %3993 = vst.msk [vmem:[#allocation3 + $0x80] sm:$0xff] %vm1613_vm8, %v3914_v26 }
 0x566   : > { %3551 = vrot.lane.b32.xlu0 %v4034_v54, %s5479_s10  ;;  %4185 = vst.msk [vmem:[#allocation3 + $0x80] sm:$0xff] %vm1806_vm9, %v4106_v34  ;;  %v3847_v54 = vld [vmem:[#allocation2 + $0x198] sm:$0xff] }
 0x567   : > { %3169 = vrot.lane.b32.xlu1 %v4225_v22, %s5477_s8 }
 0x568   : > { %v3916_v24 = vpop.permute.xlu0 %3915  ;;  %v4408_v21 = vld [vmem:[#allocation3 + $0x78] sm:$0xff] }
 0x569   : > { %v3534_v10 = vpop.permute.xlu1 %3533  ;;  %3994 = vst.msk [vmem:[#allocation3 + $0x88] sm:$0xff] %vm1613_vm8, %v3916_v24  ;;  %5406 = vmatmul.mubr.msk.f32.gmra.mrb[14].mxu1 %vm2069_vm11, %v4408_v21  ;;  %v4040_v24 = vld [vmem:[#allocation2 + $0x1a1] sm:$0xff] }
 0x56a   : > { %3611 = vst.msk [vmem:[#allocation3 + $0x90] sm:$0xff] %vm1226_vm6, %v3534_v10  ;;  %4315 = vrot.lane.b32.xlu0 %v4226_v43, %s5483_s27  ;;  %v4039_v10 = vld [vmem:[#allocation2 + $0x199] sm:$0xff] }
 0x56b   : > { %3933 = vrot.lane.b32.xlu1 %v3843_v32, %s5481_s20 }
 0x56c   : > { %v3344_v16 = vpop.permute.xlu0 %3343 }
 0x56d   : > { %v4298_v27 = vpop.permute.xlu1 %4297  ;;  %3420 = vst.msk [vmem:[#allocation3 + $0x98] sm:$0xff] %vm1033_vm5, %v3344_v16 }
 0x56e   : > { %4377 = vst.msk [vmem:[#allocation3 + $0x80] sm:$0xff] %vm1999_vm10, %v4298_v27  ;;  %3743 = vrot.lane.b32.xlu0 %v4226_v43, %s5480_s15 }
 0x56f   : > { %3361 = vrot.lane.b32.xlu1 %v3843_v32, %s5478_s9  ;;  %v4232_v32 = vld [vmem:[#allocation2 + $0x1a2] sm:$0xff] }
 0x570   : > { %v4108_v55 = vpop.permute.xlu0 %4107 }
 0x571   : > { %v3726_v37 = vpop.permute.xlu1 %3725  ;;  %4186 = vst.msk [vmem:[#allocation3 + $0x88] sm:$0xff] %vm1806_vm9, %v4108_v55 }
 0x572   : > { %3803 = vst.msk [vmem:[#allocation3 + $0x90] sm:$0xff] %vm1419_vm7, %v3726_v37  ;;  %3171 = vrot.lane.b32.xlu0 %v4226_v43, %s5477_s8  ;;  %v4231_v37 = vld [vmem:[#allocation2 + $0x19a] sm:$0xff] }
 0x573   : > { %4125 = vrot.lane.b32.xlu1 %v4035_v1, %s5482_s21 }
 0x574   : > { %v3536_v3 = vpop.permute.xlu0 %3535 }
 0x575   : > { %v3728_v63 = vpop.permute.xlu1 %3727  ;;  %v4409_v2 = vld [vmem:[#allocation3 + $0x80] sm:$0xff]  ;;  %3612 = vst.msk [vmem:[#allocation3 + $0x98] sm:$0xff] %vm1226_vm6, %v3536_v3 }
 0x576   : > { %5408 = vmatprep.mubr.msk.f32.mxu1 %vm2069_vm11, %v4409_v2  ;;  %3935 = vrot.lane.b32.xlu0 %v3844_v6, %s5481_s20  ;;  %3804 = vst.msk [vmem:[#allocation3 + $0x98] sm:$0xff] %vm1419_vm7, %v3728_v63 }
 0x577   : > { %3553 = vrot.lane.b32.xlu1 %v4035_v1, %s5479_s10 }
 0x578   : > { %v4300_v42 = vpop.permute.xlu0 %4299 }
 0x579   : > { %v3346_v4 = vpop.permute.xlu1 %3345  ;;  %4378 = vst.msk [vmem:[#allocation3 + $0x88] sm:$0xff] %vm1999_vm10, %v4300_v42 }
 0x57a   : > { %3421 = vst.msk [vmem:[#allocation3 + $0xa0] sm:$0xff] %vm1033_vm5, %v3346_v4  ;;  %3363 = vrot.lane.b32.xlu0 %v3844_v6, %s5478_s9 }
 0x57b   : > { %4317 = vrot.lane.b32.xlu1 %v4227_v48, %s5483_s27 }
 0x57c   : > { %v3918_v62 = vpop.permute.xlu0 %3917 }
 0x57d   : > { %v4110_v40 = vpop.permute.xlu1 %4109  ;;  %3995 = vst.msk [vmem:[#allocation3 + $0x90] sm:$0xff] %vm1613_vm8, %v3918_v62 }
 0x57e   : > { %4127 = vrot.lane.b32.xlu0 %v4036_v47, %s5482_s21  ;;  %4187 = vst.msk [vmem:[#allocation3 + $0x90] sm:$0xff] %vm1806_vm9, %v4110_v40 }
 0x57f   : > { %3745 = vrot.lane.b32.xlu1 %v4227_v48, %s5480_s15 }
 0x580   : > { %v3920_v51 = vpop.permute.xlu0 %3919  ;;  %v4410_v59 = vld [vmem:[#allocation3 + $0x88] sm:$0xff] }
 0x581   : > { %v3538_v20 = vpop.permute.xlu1 %3537  ;;  %3996 = vst.msk [vmem:[#allocation3 + $0x98] sm:$0xff] %vm1613_vm8, %v3920_v51  ;;  %5409 = vmatmul.mubr.msk.f32.gmra.mrb[16].mxu1 %vm2069_vm11, %v4410_v59 }
 0x582   : > { %3613 = vst.msk [vmem:[#allocation3 + $0xa0] sm:$0xff] %vm1226_vm6, %v3538_v20  ;;  %3555 = vrot.lane.b32.xlu0 %v4036_v47, %s5479_s10 }
 0x583   : > { %3173 = vrot.lane.b32.xlu1 %v4227_v48, %s5477_s8 }
 0x584   : > { %v3348_v56 = vpop.permute.xlu0 %3347 }
 0x585   : > { %v4302_v0 = vpop.permute.xlu1 %4301  ;;  %3422 = vst.msk [vmem:[#allocation3 + $0xa8] sm:$0xff] %vm1033_vm5, %v3348_v56 }
 0x586   : > { %4379 = vst.msk [vmem:[#allocation3 + $0x90] sm:$0xff] %vm1999_vm10, %v4302_v0  ;;  %4319 = vrot.lane.b32.xlu0 %v4228_v39, %s5483_s27 }
 0x587   : > { %3937 = vrot.lane.b32.xlu1 %v3845_v50, %s5481_s20 }
 0x588   : > { %v4112_v35 = vpop.permute.xlu0 %4111 }
 0x589   : > { %v3730_v52 = vpop.permute.xlu1 %3729  ;;  %4188 = vst.msk [vmem:[#allocation3 + $0x98] sm:$0xff] %vm1806_vm9, %v4112_v35 }
 0x58a   : > { %3805 = vst.msk [vmem:[#allocation3 + $0xa0] sm:$0xff] %vm1419_vm7, %v3730_v52  ;;  %3747 = vrot.lane.b32.xlu0 %v4228_v39, %s5480_s15 }
 0x58b   : > { %3365 = vrot.lane.b32.xlu1 %v3845_v50, %s5478_s9 }
 0x58c   : > { %v3540_v17 = vpop.permute.xlu0 %3539 }
 0x58d   : > { %v3732_v33 = vpop.permute.xlu1 %3731  ;;  %v4411_v29 = vld [vmem:[#allocation3 + $0x90] sm:$0xff]  ;;  %3614 = vst.msk [vmem:[#allocation3 + $0xa8] sm:$0xff] %vm1226_vm6, %v3540_v17 }
 0x58e   : > { %5411 = vmatprep.mubr.msk.f32.mxu1 %vm2069_vm11, %v4411_v29  ;;  %3175 = vrot.lane.b32.xlu0 %v4228_v39, %s5477_s8  ;;  %3806 = vst.msk [vmem:[#allocation3 + $0xa8] sm:$0xff] %vm1419_vm7, %v3732_v33 }
 0x58f   : > { %4129 = vrot.lane.b32.xlu1 %v4037_v31, %s5482_s21 }
 0x590   : > { %v4304_v58 = vpop.permute.xlu0 %4303 }
 0x591   : > { %v3350_v23 = vpop.permute.xlu1 %3349  ;;  %4380 = vst.msk [vmem:[#allocation3 + $0x98] sm:$0xff] %vm1999_vm10, %v4304_v58 }
 0x592   : > { %3423 = vst.msk [vmem:[#allocation3 + $0xb0] sm:$0xff] %vm1033_vm5, %v3350_v23  ;;  %3939 = vrot.lane.b32.xlu0 %v3846_v28, %s5481_s20 }
 0x593   : > { %3557 = vrot.lane.b32.xlu1 %v4037_v31, %s5479_s10 }
 0x594   : > { %v7752_v19 = vpop.f32.mrb[0].mxu1  ;;  %v3922_v11 = vpop.permute.xlu0 %3921 }
 0x595   : > { %v4755_v30 = vsel %vm312_vm0, %v7752_v19, 0.0  ;;  %v4824_v49 = vmul.f32 %v7752_v19, %v7752_v19  ;;  %3997 = vst.msk [vmem:[#allocation3 + $0xa0] sm:$0xff] %vm1613_vm8, %v3922_v11  ;;  %v7759_v14 = vpop.f32.mrb[1].mxu1  ;;  %v4114_v57 = vpop.permute.xlu1 %4113 }
 0x596   : > { %v4754_v8 = vsel %vm312_vm0, %v7759_v14, 0.0  ;;  %v4823_v5 = vmul.f32 %v7759_v14, %v7759_v14  ;;  %3367 = vrot.lane.b32.xlu0 %v3846_v28, %s5478_s9  ;;  %4189 = vst.msk [vmem:[#allocation3 + $0xa0] sm:$0xff] %vm1806_vm9, %v4114_v57 }
 0x597   : > { %4321 = vrot.lane.b32.xlu1 %v4229_v53, %s5483_s27  ;;  %v4856_v15 = vsel %vm312_vm0, %v4824_v49, 0.0  ;;  %v4756_v13 = vadd.f32 %v4755_v30, %v4754_v8 }
 0x598   : > { %v4855_v9 = vsel %vm312_vm0, %v4823_v5, 0.0  ;;  %v3924_v41 = vpop.permute.xlu0 %3923  ;;  %v4412_v36 = vld [vmem:[#allocation3 + $0x98] sm:$0xff] }
 0x599   : > { %v4857_v45 = vadd.f32 %v4856_v15, %v4855_v9  ;;  %3998 = vst.msk [vmem:[#allocation3 + $0xa8] sm:$0xff] %vm1613_vm8, %v3924_v41  ;;  %5412 = vmatmul.mubr.msk.f32.gmra.mrb[18].mxu1 %vm2069_vm11, %v4412_v36  ;;  %v3542_v25 = vpop.permute.xlu1 %3541 }
 0x59a   : > { %4131 = vrot.lane.b32.xlu0 %v4038_v61, %s5482_s21  ;;  %3615 = vst.msk [vmem:[#allocation3 + $0xb0] sm:$0xff] %vm1226_vm6, %v3542_v25 }
 0x59b   : > { %3749 = vrot.lane.b32.xlu1 %v4229_v53, %s5480_s15 }
 0x59c   : > { %v3352_v38 = vpop.permute.xlu0 %3351 }
 0x59d   : > { %3424 = vst.msk [vmem:[#allocation3 + $0xb8] sm:$0xff] %vm1033_vm5, %v3352_v38  ;;  %v4306_v12 = vpop.permute.xlu1 %4305 }
 0x59e   : > { %3559 = vrot.lane.b32.xlu0 %v4038_v61, %s5479_s10  ;;  %4381 = vst.msk [vmem:[#allocation3 + $0xa0] sm:$0xff] %vm1999_vm10, %v4306_v12 }
 0x59f   : > { %3751 = vrot.lane.b32.xlu1 %v3656_v44, %s5480_s15 }
 0x5a0   : > { %v4116_v46 = vpop.permute.xlu0 %4115 }
 0x5a1   : > { %4190 = vst.msk [vmem:[#allocation3 + $0xa8] sm:$0xff] %vm1806_vm9, %v4116_v46  ;;  %v3734_v22 = vpop.permute.xlu1 %3733 }
 0x5a2   : > { %4323 = vrot.lane.b32.xlu0 %v3656_v44, %s5483_s27  ;;  %3807 = vst.msk [vmem:[#allocation3 + $0xb0] sm:$0xff] %vm1419_vm7, %v3734_v22 }
 0x5a3   : > { %3943 = vrot.lane.b32.xlu1 %v3848_v60, %s5481_s20 }
 0x5a4   : > { %v3544_v7 = vpop.permute.xlu0 %3543 }
 0x5a5   : > { %3616 = vst.msk [vmem:[#allocation3 + $0xb8] sm:$0xff] %vm1226_vm6, %v3544_v7  ;;  %v3736_v26 = vpop.permute.xlu1 %3735  ;;  %v4413_v34 = vld [vmem:[#allocation3 + $0xa0] sm:$0xff] }
 0x5a6   : > { %3941 = vrot.lane.b32.xlu0 %v3847_v54, %s5481_s20  ;;  %3808 = vst.msk [vmem:[#allocation3 + $0xb8] sm:$0xff] %vm1419_vm7, %v3736_v26  ;;  %5414 = vmatprep.mubr.msk.f32.mxu1 %vm2069_vm11, %v4413_v34 }
 0x5a7   : > { %4135 = vrot.lane.b32.xlu1 %v4040_v24, %s5482_s21 }
 0x5a8   : > { %v4308_v21 = vpop.permute.xlu0 %4307 }
 0x5a9   : > { %4382 = vst.msk [vmem:[#allocation3 + $0xa8] sm:$0xff] %vm1999_vm10, %v4308_v21  ;;  %v3354_v43 = vpop.permute.xlu1 %3353 }
 0x5aa   : > { %4133 = vrot.lane.b32.xlu0 %v4039_v10, %s5482_s21  ;;  %3425 = vst.msk [vmem:[#allocation3 + $0xc0] sm:$0xff] %vm1033_vm5, %v3354_v43 }
 0x5ab   : > { %4327 = vrot.lane.b32.xlu1 %v4232_v32, %s5483_s27 }
 0x5ac   : > { %v3926_v16 = vpop.permute.xlu0 %3925  ;;  %v7792_v27 = vpop.f32.mrb[2].mxu1 }
 0x5ad   : > { %3999 = vst.msk [vmem:[#allocation3 + $0xb0] sm:$0xff] %vm1613_vm8, %v3926_v16  ;;  %v7795_v55 = vpop.f32.mrb[3].mxu1  ;;  %v4118_v1 = vpop.permute.xlu1 %4117  ;;  %v4826_v3 = vmul.f32 %v7792_v27, %v7792_v27  ;;  %v4759_v42 = vsel %vm312_vm0, %v7792_v27, 0.0 }
 0x5ae   : > { %v4757_v63 = vsel %vm312_vm0, %v7795_v55, 0.0  ;;  %v4825_v2 = vmul.f32 %v7795_v55, %v7795_v55  ;;  %4325 = vrot.lane.b32.xlu0 %v4231_v37, %s5483_s27  ;;  %4191 = vst.msk [vmem:[#allocation3 + $0xb0] sm:$0xff] %vm1806_vm9, %v4118_v1  ;;  %s8162_s27 = scalar_lea.vmem %s8262_s7, %s5240_s26 }
 0x5af   : > { %v4758_v6 = vadd.f32 %v4757_v63, %v4756_v13  ;;  %v4860_v59 = vsel %vm312_vm0, %v4826_v3, 0.0 }
 0x5b0   : > { %v4858_v4 = vsel %vm312_vm0, %v4825_v2, 0.0  ;;  %v3928_v48 = vpop.permute.xlu0 %3927  ;;  %v4414_v62 = vld [vmem:[#allocation3 + $0xa8] sm:$0xff] }
 0x5b1   : > { %v4859_v40 = vadd.f32 %v4858_v4, %v4857_v45  ;;  %4000 = vst.msk [vmem:[#allocation3 + $0xb8] sm:$0xff] %vm1613_vm8, %v3928_v48  ;;  %5415 = vmatmul.mubr.msk.f32.gmra.mrb[20].mxu1 %vm2069_vm11, %v4414_v62  ;;  %v3546_v47 = vpop.permute.xlu1 %3545  ;;  %v4760_v51 = vadd.f32 %v4759_v42, %v4758_v6 }
 0x5b2   : > { %3617 = vst.msk [vmem:[#allocation3 + $0xc0] sm:$0xff] %vm1226_vm6, %v3546_v47 }
 0x5b3   : > { %v4861_v20 = vadd.f32 %v4860_v59, %v4859_v40 }
 0x5b4   : > { %v3356_v56 = vpop.permute.xlu0 %3355 }
 0x5b5   : > { %3426 = vst.msk [vmem:[#allocation3 + $0xc8] sm:$0xff] %vm1033_vm5, %v3356_v56  ;;  %v4310_v0 = vpop.permute.xlu1 %4309 }
 0x5b6   : > { %4383 = vst.msk [vmem:[#allocation3 + $0xb0] sm:$0xff] %vm1999_vm10, %v4310_v0 }
 0x5b8   : > { %v4120_v39 = vpop.permute.xlu0 %4119 }
 0x5b9   : > { %4192 = vst.msk [vmem:[#allocation3 + $0xb8] sm:$0xff] %vm1806_vm9, %v4120_v39  ;;  %v3738_v50 = vpop.permute.xlu1 %3737 }
 0x5ba   : > { %3809 = vst.msk [vmem:[#allocation3 + $0xc0] sm:$0xff] %vm1419_vm7, %v3738_v50 }
 0x5bc   : > { %v3548_v35 = vpop.permute.xlu0 %3547 }
 0x5bd   : > { %3618 = vst.msk [vmem:[#allocation3 + $0xc8] sm:$0xff] %vm1226_vm6, %v3548_v35  ;;  %v3166_v52 = vpop.permute.xlu1 %3165  ;;  %v4415_v17 = vld [vmem:[#allocation3 + $0xb0] sm:$0xff] }
 0x5be   : > { %3235 = vst.msk [vmem:[#allocation3 + $0xd0] sm:$0xff] %vm840_vm3, %v3166_v52  ;;  %5417 = vmatprep.mubr.msk.f32.mxu1 %vm2069_vm11, %v4415_v17 }
 0x5c0   : > { %v4312_v33 = vpop.permute.xlu0 %4311 }
 0x5c1   : > { %4384 = vst.msk [vmem:[#allocation3 + $0xb8] sm:$0xff] %vm1999_vm10, %v4312_v33  ;;  %v3930_v29 = vpop.permute.xlu1 %3929 }
 0x5c2   : > { %4001 = vst.msk [vmem:[#allocation3 + $0xc0] sm:$0xff] %vm1613_vm8, %v3930_v29 }
 0x5c4   : > { %v3740_v31 = vpop.permute.xlu0 %3739  ;;  %v7821_v58 = vpop.f32.mrb[4].mxu1 }
 0x5c5   : > { %3810 = vst.msk [vmem:[#allocation3 + $0xc8] sm:$0xff] %vm1419_vm7, %v3740_v31  ;;  %v7824_v23 = vpop.f32.mrb[5].mxu1  ;;  %v3358_v28 = vpop.permute.xlu1 %3357  ;;  %v4828_v11 = vmul.f32 %v7821_v58, %v7821_v58  ;;  %v4763_v53 = vsel %vm312_vm0, %v7821_v58, 0.0 }
 0x5c6   : > { %v4761_v30 = vsel %vm312_vm0, %v7824_v23, 0.0  ;;  %v4827_v49 = vmul.f32 %v7824_v23, %v7824_v23  ;;  %3427 = vst.msk [vmem:[#allocation3 + $0xd0] sm:$0xff] %vm1033_vm5, %v3358_v28 }
 0x5c7   : > { %v4762_v57 = vadd.f32 %v4761_v30, %v4760_v51  ;;  %v4864_v36 = vsel %vm312_vm0, %v4828_v11, 0.0 }
 0x5c8   : > { %v4862_v8 = vsel %vm312_vm0, %v4827_v49, 0.0  ;;  %v3168_v5 = vpop.permute.xlu0 %3167  ;;  %v4416_v15 = vld [vmem:[#allocation3 + $0xb8] sm:$0xff] }
 0x5c9   : > { %v4863_v13 = vadd.f32 %v4862_v8, %v4861_v20  ;;  %3236 = vst.msk [vmem:[#allocation3 + $0xd8] sm:$0xff] %vm840_vm3, %v3168_v5  ;;  %5418 = vmatmul.mubr.msk.f32.gmra.mrb[22].mxu1 %vm2069_vm11, %v4416_v15  ;;  %v4122_v9 = vpop.permute.xlu1 %4121  ;;  %v4764_v41 = vadd.f32 %v4763_v53, %v4762_v57 }
 0x5ca   : > { %4193 = vst.msk [vmem:[#allocation3 + $0xc0] sm:$0xff] %vm1806_vm9, %v4122_v9 }
 0x5cb   : > { %v4865_v45 = vadd.f32 %v4864_v36, %v4863_v13 }
 0x5cc   : > { %v3932_v61 = vpop.permute.xlu0 %3931 }
 0x5cd   : > { %4002 = vst.msk [vmem:[#allocation3 + $0xc8] sm:$0xff] %vm1613_vm8, %v3932_v61  ;;  %v3550_v25 = vpop.permute.xlu1 %3549 }
 0x5ce   : > { %3619 = vst.msk [vmem:[#allocation3 + $0xd0] sm:$0xff] %vm1226_vm6, %v3550_v25 }
 0x5d0   : > { %v3360_v38 = vpop.permute.xlu0 %3359 }
 0x5d1   : > { %3428 = vst.msk [vmem:[#allocation3 + $0xd8] sm:$0xff] %vm1033_vm5, %v3360_v38  ;;  %v4314_v12 = vpop.permute.xlu1 %4313 }
 0x5d2   : > { %4385 = vst.msk [vmem:[#allocation3 + $0xc0] sm:$0xff] %vm1999_vm10, %v4314_v12 }
 0x5d4   : > { %v4124_v44 = vpop.permute.xlu0 %4123 }
 0x5d5   : > { %4194 = vst.msk [vmem:[#allocation3 + $0xc8] sm:$0xff] %vm1806_vm9, %v4124_v44  ;;  %v3742_v46 = vpop.permute.xlu1 %3741 }
 0x5d6   : > { %3811 = vst.msk [vmem:[#allocation3 + $0xd0] sm:$0xff] %vm1419_vm7, %v3742_v46 }
 0x5d8   : > { %v3552_v22 = vpop.permute.xlu0 %3551 }
 0x5d9   : > { %3620 = vst.msk [vmem:[#allocation3 + $0xd8] sm:$0xff] %vm1226_vm6, %v3552_v22  ;;  %v3170_v60 = vpop.permute.xlu1 %3169  ;;  %v4417_v7 = vld [vmem:[#allocation3 + $0xc0] sm:$0xff] }
 0x5da   : > { %3237 = vst.msk [vmem:[#allocation3 + $0xe0] sm:$0xff] %vm840_vm3, %v3170_v60  ;;  %5420 = vmatprep.mubr.msk.f32.mxu1 %vm2069_vm11, %v4417_v7 }
 0x5dc   : > { %v4316_v54 = vpop.permute.xlu0 %4315  ;;  %v7849_v26 = vpop.f32.mrb[6].mxu1 }
 0x5dd   : > { %4386 = vst.msk [vmem:[#allocation3 + $0xc8] sm:$0xff] %vm1999_vm10, %v4316_v54  ;;  %v7852_v34 = vpop.f32.mrb[7].mxu1  ;;  %v3934_v24 = vpop.permute.xlu1 %3933  ;;  %v4830_v21 = vmul.f32 %v7849_v26, %v7849_v26  ;;  %v4767_v16 = vsel %vm312_vm0, %v7849_v26, 0.0 }
 0x5de   : > { %v4765_v10 = vsel %vm312_vm0, %v7852_v34, 0.0  ;;  %v4829_v43 = vmul.f32 %v7852_v34, %v7852_v34  ;;  %4003 = vst.msk [vmem:[#allocation3 + $0xd0] sm:$0xff] %vm1613_vm8, %v3934_v24 }
 0x5df   : > { %v4766_v32 = vadd.f32 %v4765_v10, %v4764_v41  ;;  %v4868_v6 = vsel %vm312_vm0, %v4830_v21, 0.0 }
 0x5e0   : > { %v4866_v37 = vsel %vm312_vm0, %v4829_v43, 0.0  ;;  %v3744_v1 = vpop.permute.xlu0 %3743 }
 0x5e1   : > { %v4867_v3 = vadd.f32 %v4866_v37, %v4865_v45  ;;  %3812 = vst.msk [vmem:[#allocation3 + $0xd8] sm:$0xff] %vm1419_vm7, %v3744_v1  ;;  %v3362_v63 = vpop.permute.xlu1 %3361  ;;  %v4768_v2 = vadd.f32 %v4767_v16, %v4766_v32 }
 0x5e2   : > { %3429 = vst.msk [vmem:[#allocation3 + $0xe0] sm:$0xff] %vm1033_vm5, %v3362_v63 }
 0x5e3   : > { %v4869_v42 = vadd.f32 %v4868_v6, %v4867_v3 }
 0x5e4   : > { %v3172_v4 = vpop.permute.xlu0 %3171  ;;  %v4418_v48 = vld [vmem:[#allocation3 + $0xc8] sm:$0xff] }
 0x5e5   : > { %3238 = vst.msk [vmem:[#allocation3 + $0xe8] sm:$0xff] %vm840_vm3, %v3172_v4  ;;  %5421 = vmatmul.mubr.msk.f32.gmra.mrb[24].mxu1 %vm2069_vm11, %v4418_v48  ;;  %v4126_v62 = vpop.permute.xlu1 %4125 }
 0x5e6   : > { %4195 = vst.msk [vmem:[#allocation3 + $0xd0] sm:$0xff] %vm1806_vm9, %v4126_v62 }
 0x5e8   : > { %v3936_v40 = vpop.permute.xlu0 %3935 }
 0x5e9   : > { %4004 = vst.msk [vmem:[#allocation3 + $0xd8] sm:$0xff] %vm1613_vm8, %v3936_v40  ;;  %v3554_v47 = vpop.permute.xlu1 %3553 }
 0x5ea   : > { %3621 = vst.msk [vmem:[#allocation3 + $0xe0] sm:$0xff] %vm1226_vm6, %v3554_v47 }
 0x5ec   : > { %v3364_v51 = vpop.permute.xlu0 %3363 }
 0x5ed   : > { %3430 = vst.msk [vmem:[#allocation3 + $0xe8] sm:$0xff] %vm1033_vm5, %v3364_v51  ;;  %v4318_v59 = vpop.permute.xlu1 %4317 }
 0x5ee   : > { %4387 = vst.msk [vmem:[#allocation3 + $0xd0] sm:$0xff] %vm1999_vm10, %v4318_v59 }
 0x5f0   : > { %v4128_v20 = vpop.permute.xlu0 %4127 }
 0x5f1   : > { %4196 = vst.msk [vmem:[#allocation3 + $0xd8] sm:$0xff] %vm1806_vm9, %v4128_v20  ;;  %v3746_v56 = vpop.permute.xlu1 %3745 }
 0x5f2   : > { %3813 = vst.msk [vmem:[#allocation3 + $0xe0] sm:$0xff] %vm1419_vm7, %v3746_v56 }
 0x5f4   : > { %v3556_v0 = vpop.permute.xlu0 %3555  ;;  %v7876_v39 = vpop.f32.mrb[8].mxu1 }
 0x5f5   : > { %3622 = vst.msk [vmem:[#allocation3 + $0xe8] sm:$0xff] %vm1226_vm6, %v3556_v0  ;;  %v7879_v50 = vpop.f32.mrb[9].mxu1  ;;  %v3174_v35 = vpop.permute.xlu1 %3173  ;;  %v4419_v52 = vld [vmem:[#allocation3 + $0xd0] sm:$0xff]  ;;  %v4832_v17 = vmul.f32 %v7876_v39, %v7876_v39  ;;  %v4771_v28 = vsel %vm312_vm0, %v7876_v39, 0.0 }
 0x5f6   : > { %v4769_v33 = vsel %vm312_vm0, %v7879_v50, 0.0  ;;  %v4831_v29 = vmul.f32 %v7879_v50, %v7879_v50  ;;  %3239 = vst.msk [vmem:[#allocation3 + $0xf0] sm:$0xff] %vm840_vm3, %v3174_v35  ;;  %5423 = vmatprep.mubr.msk.f32.mxu1 %vm2069_vm11, %v4419_v52 }
 0x5f7   : > { %v4770_v31 = vadd.f32 %v4769_v33, %v4768_v2  ;;  %v4872_v8 = vsel %vm312_vm0, %v4832_v17, 0.0 }
 0x5f8   : > { %v4870_v11 = vsel %vm312_vm0, %v4831_v29, 0.0  ;;  %v4320_v30 = vpop.permute.xlu0 %4319 }
 0x5f9   : > { %v4871_v49 = vadd.f32 %v4870_v11, %v4869_v42  ;;  %4388 = vst.msk [vmem:[#allocation3 + $0xd8] sm:$0xff] %vm1999_vm10, %v4320_v30  ;;  %v3938_v57 = vpop.permute.xlu1 %3937  ;;  %v4772_v53 = vadd.f32 %v4771_v28, %v4770_v31 }
 0x5fa   : > { %4005 = vst.msk [vmem:[#allocation3 + $0xe0] sm:$0xff] %vm1613_vm8, %v3938_v57 }
 0x5fb   : > { %v4873_v5 = vadd.f32 %v4872_v8, %v4871_v49 }
 0x5fc   : > { %v3748_v15 = vpop.permute.xlu0 %3747 }
 0x5fd   : > { %3814 = vst.msk [vmem:[#allocation3 + $0xe8] sm:$0xff] %vm1419_vm7, %v3748_v15  ;;  %v3366_v13 = vpop.permute.xlu1 %3365 }
 0x5fe   : > { %3431 = vst.msk [vmem:[#allocation3 + $0xf0] sm:$0xff] %vm1033_vm5, %v3366_v13 }
 0x600   : > { %v3176_v9 = vpop.permute.xlu0 %3175  ;;  %v4420_v41 = vld [vmem:[#allocation3 + $0xd8] sm:$0xff] }
 0x601   : > { %3240 = vst.msk [vmem:[#allocation3 + $0xf8] sm:$0xff] %vm840_vm3, %v3176_v9  ;;  %5424 = vmatmul.mubr.msk.f32.gmra.mrb[26].mxu1 %vm2069_vm11, %v4420_v41  ;;  %v4130_v36 = vpop.permute.xlu1 %4129 }
 0x602   : > { %4197 = vst.msk [vmem:[#allocation3 + $0xe0] sm:$0xff] %vm1806_vm9, %v4130_v36 }
 0x604   : > { %v3940_v45 = vpop.permute.xlu0 %3939 }
 0x605   : > { %4006 = vst.msk [vmem:[#allocation3 + $0xe8] sm:$0xff] %vm1613_vm8, %v3940_v45  ;;  %v3558_v61 = vpop.permute.xlu1 %3557 }
 0x606   : > { %3623 = vst.msk [vmem:[#allocation3 + $0xf0] sm:$0xff] %vm1226_vm6, %v3558_v61 }
 0x608   : > { %v3368_v25 = vpop.permute.xlu0 %3367 }
 0x609   : > { %3432 = vst.msk [vmem:[#allocation3 + $0xf8] sm:$0xff] %vm1033_vm5, %v3368_v25  ;;  %v4322_v38 = vpop.permute.xlu1 %4321 }
 0x60a   : > { %4389 = vst.msk [vmem:[#allocation3 + $0xe0] sm:$0xff] %vm1999_vm10, %v4322_v38 }
 0x60c   : > { %v4132_v12 = vpop.permute.xlu0 %4131  ;;  %v7904_v44 = vpop.f32.mrb[10].mxu1 }
 0x60d   : > { %4198 = vst.msk [vmem:[#allocation3 + $0xe8] sm:$0xff] %vm1806_vm9, %v4132_v12  ;;  %v7907_v46 = vpop.f32.mrb[11].mxu1  ;;  %v3750_v22 = vpop.permute.xlu1 %3749  ;;  %v4834_v60 = vmul.f32 %v7904_v44, %v7904_v44  ;;  %v4775_v21 = vsel %vm312_vm0, %v7904_v44, 0.0 }
 0x60e   : > { %v4773_v7 = vsel %vm312_vm0, %v7907_v46, 0.0  ;;  %v4833_v54 = vmul.f32 %v7907_v46, %v7907_v46  ;;  %3815 = vst.msk [vmem:[#allocation3 + $0xf0] sm:$0xff] %vm1419_vm7, %v3750_v22 }
 0x60f   : > { %v4774_v24 = vadd.f32 %v4773_v7, %v4772_v53  ;;  %v4876_v3 = vsel %vm312_vm0, %v4834_v60, 0.0 }
 0x610   : > { %v4874_v10 = vsel %vm312_vm0, %v4833_v54, 0.0  ;;  %v3560_v43 = vpop.permute.xlu0 %3559 }
 0x611   : > { %v4875_v32 = vadd.f32 %v4874_v10, %v4873_v5  ;;  %3624 = vst.msk [vmem:[#allocation3 + $0xf8] sm:$0xff] %vm1226_vm6, %v3560_v43  ;;  %v3752_v16 = vpop.permute.xlu1 %3751  ;;  %v4421_v37 = vld [vmem:[#allocation3 + $0xe0] sm:$0xff]  ;;  %v4776_v1 = vadd.f32 %v4775_v21, %v4774_v24 }
 0x612   : > { %3816 = vst.msk [vmem:[#allocation3 + $0xf8] sm:$0xff] %vm1419_vm7, %v3752_v16  ;;  %5426 = vmatprep.mubr.msk.f32.mxu1 %vm2069_vm11, %v4421_v37 }
 0x613   : > { %v4877_v63 = vadd.f32 %v4876_v3, %v4875_v32 }
 0x614   : > { %v4324_v2 = vpop.permute.xlu0 %4323 }
 0x615   : > { %4390 = vst.msk [vmem:[#allocation3 + $0xe8] sm:$0xff] %vm1999_vm10, %v4324_v2  ;;  %v3944_v6 = vpop.permute.xlu1 %3943 }
 0x616   : > { %4008 = vst.msk [vmem:[#allocation3 + $0xf8] sm:$0xff] %vm1613_vm8, %v3944_v6 }
 0x618   : > { %v3942_v42 = vpop.permute.xlu0 %3941 }
 0x619   : > { %4007 = vst.msk [vmem:[#allocation3 + $0xf0] sm:$0xff] %vm1613_vm8, %v3942_v42  ;;  %v4136_v4 = vpop.permute.xlu1 %4135 }
 0x61a   : > { %4200 = vst.msk [vmem:[#allocation3 + $0xf8] sm:$0xff] %vm1806_vm9, %v4136_v4 }
 0x61c   : > { %v4134_v48 = vpop.permute.xlu0 %4133  ;;  %v4422_v62 = vld [vmem:[#allocation3 + $0xe8] sm:$0xff] }
 0x61d   : > { %4199 = vst.msk [vmem:[#allocation3 + $0xf0] sm:$0xff] %vm1806_vm9, %v4134_v48  ;;  %5427 = vmatmul.mubr.msk.f32.gmra.mrb[28].mxu1 %vm2069_vm11, %v4422_v62  ;;  %v4328_v40 = vpop.permute.xlu1 %4327 }
 0x61e   : > { %4392 = vst.msk [vmem:[#allocation3 + $0xf8] sm:$0xff] %vm1999_vm10, %v4328_v40 }
 0x620   : > { %v4326_v47 = vpop.permute.xlu0 %4325 }
 0x621   : > { %4391 = vst.msk [vmem:[#allocation3 + $0xf0] sm:$0xff] %vm1999_vm10, %v4326_v47 }
 0x624   : > { %v7931_v51 = vpop.f32.mrb[12].mxu1 }
 0x625   : > { %v7933_v59 = vpop.f32.mrb[13].mxu1  ;;  %v4836_v20 = vmul.f32 %v7931_v51, %v7931_v51  ;;  %v4424_v52 = vld [vmem:[#allocation3 + $0xf8] sm:$0xff]  ;;  %v4779_v17 = vsel %vm312_vm0, %v7931_v51, 0.0 }
 0x626   : > { %v4777_v56 = vsel %vm312_vm0, %v7933_v59, 0.0  ;;  %v4835_v0 = vmul.f32 %v7933_v59, %v7933_v59 }
 0x627   : > { %v4778_v35 = vadd.f32 %v4777_v56, %v4776_v1  ;;  %v4880_v11 = vsel %vm312_vm0, %v4836_v20, 0.0 }
 0x628   : > { %v4878_v33 = vsel %vm312_vm0, %v4835_v0, 0.0  ;;  %v4423_v29 = vld [vmem:[#allocation3 + $0xf0] sm:$0xff] }
 0x629   : > { %v4879_v31 = vadd.f32 %v4878_v33, %v4877_v63  ;;  %5429 = vmatprep.mubr.msk.f32.mxu1 %vm2069_vm11, %v4423_v29  ;;  %v4780_v28 = vadd.f32 %v4779_v17, %v4778_v35 }
 0x62a   : > { %5430 = vmatmul.mubr.msk.f32.gmra.mrb[30].mxu1 %vm2069_vm11, %v4424_v52 }
 0x62b   : > { %v4881_v30 = vadd.f32 %v4880_v11, %v4879_v31 }
 0x63c   : > { %v7947_v49 = vpop.f32.mrb[14].mxu1 }
 0x63d   : > { %v7949_v57 = vpop.f32.mrb[15].mxu1  ;;  %v4838_v53 = vmul.f32 %v7947_v49, %v7947_v49  ;;  %v4783_v13 = vsel %vm312_vm0, %v7947_v49, 0.0 }
 0x63e   : > { %v4781_v8 = vsel %vm312_vm0, %v7949_v57, 0.0  ;;  %v4837_v5 = vmul.f32 %v7949_v57, %v7949_v57 }
 0x63f   : > { %v4782_v15 = vadd.f32 %v4781_v8, %v4780_v28  ;;  %v4884_v45 = vsel %vm312_vm0, %v4838_v53, 0.0 }
 0x640   : > { %v4882_v9 = vsel %vm312_vm0, %v4837_v5, 0.0 }
 0x641   : > { %v4883_v41 = vadd.f32 %v4882_v9, %v4881_v30  ;;  %v4784_v36 = vadd.f32 %v4783_v13, %v4782_v15 }
 0x643   : > { %v4885_v61 = vadd.f32 %v4884_v45, %v4883_v41 }
 0x654   : > { %v7961_v25 = vpop.f32.mrb[16].mxu1 }
 0x655   : > { %v7963_v38 = vpop.f32.mrb[17].mxu1  ;;  %v4840_v12 = vmul.f32 %v7961_v25, %v7961_v25  ;;  %v4787_v54 = vsel %vm312_vm0, %v7961_v25, 0.0 }
 0x656   : > { %v4785_v22 = vsel %vm312_vm0, %v7963_v38, 0.0  ;;  %v4839_v60 = vmul.f32 %v7963_v38, %v7963_v38 }
 0x657   : > { %v4786_v7 = vadd.f32 %v4785_v22, %v4784_v36  ;;  %v4888_v43 = vsel %vm312_vm0, %v4840_v12, 0.0 }
 0x658   : > { %v4886_v24 = vsel %vm312_vm0, %v4839_v60, 0.0 }
 0x659   : > { %v4887_v21 = vadd.f32 %v4886_v24, %v4885_v61  ;;  %v4788_v10 = vadd.f32 %v4787_v54, %v4786_v7 }
 0x65b   : > { %v4889_v32 = vadd.f32 %v4888_v43, %v4887_v21 }
 0x66c   : > { %v7975_v16 = vpop.f32.mrb[18].mxu1 }
 0x66d   : > { %v7977_v37 = vpop.f32.mrb[19].mxu1  ;;  %v4842_v1 = vmul.f32 %v7975_v16, %v7975_v16  ;;  %v4791_v6 = vsel %vm312_vm0, %v7975_v16, 0.0 }
 0x66e   : > { %v4789_v3 = vsel %vm312_vm0, %v7977_v37, 0.0  ;;  %v4841_v63 = vmul.f32 %v7977_v37, %v7977_v37 }
 0x66f   : > { %v4790_v2 = vadd.f32 %v4789_v3, %v4788_v10  ;;  %v4892_v62 = vsel %vm312_vm0, %v4842_v1, 0.0 }
 0x670   : > { %v4890_v42 = vsel %vm312_vm0, %v4841_v63, 0.0 }
 0x671   : > { %v4891_v4 = vadd.f32 %v4890_v42, %v4889_v32  ;;  %v4792_v48 = vadd.f32 %v4791_v6, %v4790_v2 }
 0x673   : > { %v4893_v40 = vadd.f32 %v4892_v62, %v4891_v4 }
 0x684   : > { %v7989_v47 = vpop.f32.mrb[20].mxu1 }
 0x685   : > { %v7991_v20 = vpop.f32.mrb[21].mxu1  ;;  %v4844_v56 = vmul.f32 %v7989_v47, %v7989_v47  ;;  %v4795_v17 = vsel %vm312_vm0, %v7989_v47, 0.0 }
 0x686   : > { %v4793_v0 = vsel %vm312_vm0, %v7991_v20, 0.0  ;;  %v4843_v35 = vmul.f32 %v7991_v20, %v7991_v20 }
 0x687   : > { %v4794_v52 = vadd.f32 %v4793_v0, %v4792_v48  ;;  %v4896_v28 = vsel %vm312_vm0, %v4844_v56, 0.0 }
 0x688   : > { %v4894_v33 = vsel %vm312_vm0, %v4843_v35, 0.0 }
 0x689   : > { %v4895_v29 = vadd.f32 %v4894_v33, %v4893_v40  ;;  %v4796_v31 = vadd.f32 %v4795_v17, %v4794_v52 }
 0x68b   : > { %v4897_v11 = vadd.f32 %v4896_v28, %v4895_v29 }
 0x69c   : > { %v8003_v30 = vpop.f32.mrb[22].mxu1 }
 0x69d   : > { %v8005_v53 = vpop.f32.mrb[23].mxu1  ;;  %v4846_v8 = vmul.f32 %v8003_v30, %v8003_v30  ;;  %v4799_v9 = vsel %vm312_vm0, %v8003_v30, 0.0 }
 0x69e   : > { %v4797_v5 = vsel %vm312_vm0, %v8005_v53, 0.0  ;;  %v4845_v15 = vmul.f32 %v8005_v53, %v8005_v53 }
 0x69f   : > { %v4798_v13 = vadd.f32 %v4797_v5, %v4796_v31  ;;  %v4900_v61 = vsel %vm312_vm0, %v4846_v8, 0.0 }
 0x6a0   : > { %v4898_v41 = vsel %vm312_vm0, %v4845_v15, 0.0 }
 0x6a1   : > { %v4899_v36 = vadd.f32 %v4898_v41, %v4897_v11  ;;  %v4800_v45 = vadd.f32 %v4799_v9, %v4798_v13 }
 0x6a3   : > { %v4901_v12 = vadd.f32 %v4900_v61, %v4899_v36 }
 0x6b8   : > { %v8017_v22 = vpop.f32.mrb[24].mxu1 }
 0x6b9   : > { %v8019_v60 = vpop.f32.mrb[25].mxu1  ;;  %v4848_v7 = vmul.f32 %v8017_v22, %v8017_v22  ;;  %v4803_v10 = vsel %vm312_vm0, %v8017_v22, 0.0 }
 0x6ba   : > { %v4801_v54 = vsel %vm312_vm0, %v8019_v60, 0.0  ;;  %v4847_v24 = vmul.f32 %v8019_v60, %v8019_v60 }
 0x6bb   : > { %v4802_v21 = vadd.f32 %v4801_v54, %v4800_v45  ;;  %v4904_v3 = vsel %vm312_vm0, %v4848_v7, 0.0 }
 0x6bc   : > { %v4902_v43 = vsel %vm312_vm0, %v4847_v24, 0.0 }
 0x6bd   : > { %v4903_v32 = vadd.f32 %v4902_v43, %v4901_v12  ;;  %v4804_v1 = vadd.f32 %v4803_v10, %v4802_v21 }
 0x6bf   : > { %v4905_v63 = vadd.f32 %v4904_v3, %v4903_v32 }
 0x6d4   : > { %v8031_v2 = vpop.f32.mrb[26].mxu1 }
 0x6d5   : > { %v8033_v6 = vpop.f32.mrb[27].mxu1  ;;  %v4850_v42 = vmul.f32 %v8031_v2, %v8031_v2  ;;  %v4807_v40 = vsel %vm312_vm0, %v8031_v2, 0.0 }
 0x6d6   : > { %v4805_v4 = vsel %vm312_vm0, %v8033_v6, 0.0  ;;  %v4849_v48 = vmul.f32 %v8033_v6, %v8033_v6 }
 0x6d7   : > { %v4806_v62 = vadd.f32 %v4805_v4, %v4804_v1  ;;  %v4908_v52 = vsel %vm312_vm0, %v4850_v42, 0.0 }
 0x6d8   : > { %v4906_v56 = vsel %vm312_vm0, %v4849_v48, 0.0 }
 0x6d9   : > { %v4907_v0 = vadd.f32 %v4906_v56, %v4905_v63  ;;  %v4808_v35 = vadd.f32 %v4807_v40, %v4806_v62 }
 0x6db   : > { %v4909_v17 = vadd.f32 %v4908_v52, %v4907_v0 }
 0x6f0   : > { %v8045_v33 = vpop.f32.mrb[28].mxu1 }
 0x6f1   : > { %v8047_v29 = vpop.f32.mrb[29].mxu1  ;;  %v4852_v31 = vmul.f32 %v8045_v33, %v8045_v33  ;;  %v4811_v5 = vsel %vm312_vm0, %v8045_v33, 0.0 }
 0x6f2   : > { %v4809_v28 = vsel %vm312_vm0, %v8047_v29, 0.0  ;;  %v4851_v11 = vmul.f32 %v8047_v29, %v8047_v29 }
 0x6f3   : > { %v4810_v8 = vadd.f32 %v4809_v28, %v4808_v35  ;;  %v4912_v41 = vsel %vm312_vm0, %v4852_v31, 0.0 }
 0x6f4   : > { %v4910_v15 = vsel %vm312_vm0, %v4851_v11, 0.0 }
 0x6f5   : > { %v4911_v13 = vadd.f32 %v4910_v15, %v4909_v17  ;;  %v4812_v9 = vadd.f32 %v4811_v5, %v4810_v8 }
 0x6f7   : > { %v4913_v36 = vadd.f32 %v4912_v41, %v4911_v13 }
 0x6fd   : > { %v8059_v45 = vpop.f32.mrb[30].mxu1 }
 0x6fe   : > { %v8061_v61 = vpop.f32.mrb[31].mxu1  ;;  %v4854_v12 = vmul.f32 %v8059_v45, %v8059_v45  ;;  %v4815_v21 = vsel %vm312_vm0, %v8059_v45, 0.0 }
 0x6ff   : > { %v4813_v7 = vsel %vm312_vm0, %v8061_v61, 0.0  ;;  %v4853_v54 = vmul.f32 %v8061_v61, %v8061_v61 }
 0x700   : > { %v4814_v24 = vadd.f32 %v4813_v7, %v4812_v9  ;;  %v4916_v1 = vsel %vm312_vm0, %v4854_v12, 0.0  ;;  %v4929_v9 = vld [vmem:[%s8260_s5] sm:$0x1] }
 0x701   : > { %v4914_v10 = vsel %vm312_vm0, %v4853_v54, 0.0  ;;  %v4933_v12 = vld [vmem:[%s8261_s6] sm:$0x1] }
 0x702   : > { %v4816_v43 = vadd.f32 %v4815_v21, %v4814_v24  ;;  %v4915_v32 = vadd.f32 %v4914_v10, %v4913_v36 }
 0x704   : > { %v4817_v3 = vrot.slane %v4816_v43, 4  ;;  %v4917_v63 = vadd.f32 %v4916_v1, %v4915_v32 }
 0x706   : > { %v4818_v42 = vadd.f32 %v4817_v3, %v4816_v43  ;;  %v4918_v4 = vrot.slane %v4917_v63, 4 }
 0x708   : > { %v4819_v48 = vrot.slane %v4818_v42, 2  ;;  %v4919_v62 = vadd.f32 %v4918_v4, %v4917_v63 }
 0x70a   : > { %v4820_v40 = vadd.f32 %v4819_v48, %v4818_v42  ;;  %v4920_v56 = vrot.slane %v4919_v62, 2 }
 0x70c   : > { %v4821_v0 = vrot.slane %v4820_v40, 1  ;;  %v4921_v35 = vadd.f32 %v4920_v56, %v4919_v62 }
 0x70e   : > { %v4822_v52 = vadd.f32 %v4821_v0, %v4820_v40  ;;  %v4922_v17 = vrot.slane %v4921_v35, 1 }
 0x710   : > { %v4923_v31 = vadd.f32 %v4922_v17, %v4921_v35  ;;  %v4924_v28 = vmul.f32 0.00390625, %v4822_v52 }
 0x712   : > { %v4925_v11 = vmul.f32 0.00390625, %v4923_v31  ;;  %v4926_v8 = vmul.f32 %v4924_v28, %v4924_v28 }
 0x714   : > { %v4927_v5 = vsub.f32 %v4925_v11, %v4926_v8 }
 0x716   : > { %v4928_v15 = vmax.f32 %v4927_v5, 0.0 }
 0x718   : > { %v4930_v13 = vadd.f32 1e-05, %v4928_v15 }
 0x71a   : > { %5466 = vrsqrt.f32 %v4930_v13 }
 0x724   : > { %v5467_v41 = vpop.eup %5466 }
 0x725   : > { %v4932_v36 = vmul.f32 %v5467_v41, %v4929_v9 }
 0x727   : > { %v4934_v7 = vmul.f32 %v4932_v36, %v4924_v28  ;;  %v4940_v54 = vrot.slane %v4932_v36, %v6800_v18 }
 0x729   : > { %v4935_v24 = vsub.f32 %v4933_v12, %v4934_v7  ;;  %v4942_v21 = vmul.f32 %v4940_v54, %v7759_v14  ;;  %v4943_v10 = vmul.f32 %v7752_v19, %v4940_v54  ;;  %v4944_v43 = vmul.f32 %v4940_v54, %v7795_v55 }
 0x72a   : > { %v4945_v32 = vmul.f32 %v7792_v27, %v4940_v54  ;;  %v4946_v1 = vmul.f32 %v4940_v54, %v7824_v23  ;;  %v4947_v3 = vmul.f32 %v7821_v58, %v4940_v54  ;;  %v4948_v63 = vmul.f32 %v4940_v54, %v7852_v34 }
 0x72b   : > { %v4949_v42 = vmul.f32 %v7849_v26, %v4940_v54  ;;  %v4950_v4 = vmul.f32 %v4940_v54, %v7879_v50  ;;  %v4951_v48 = vmul.f32 %v7876_v39, %v4940_v54  ;;  %v4952_v14 = vmul.f32 %v4940_v54, %v7907_v46 }
 0x72c   : > { %v4953_v19 = vmul.f32 %v7904_v44, %v4940_v54  ;;  %v4954_v55 = vmul.f32 %v4940_v54, %v7933_v59  ;;  %v4955_v27 = vmul.f32 %v7931_v51, %v4940_v54  ;;  %v4956_v23 = vmul.f32 %v4940_v54, %v7949_v57 }
 0x72d   : > { %v4957_v58 = vmul.f32 %v7947_v49, %v4940_v54  ;;  %v4958_v34 = vmul.f32 %v4940_v54, %v7963_v38  ;;  %v4959_v26 = vmul.f32 %v7961_v25, %v4940_v54  ;;  %v4960_v50 = vmul.f32 %v4940_v54, %v7977_v37 }
 0x72e   : > { %v4961_v39 = vmul.f32 %v7975_v16, %v4940_v54  ;;  %v4962_v46 = vmul.f32 %v4940_v54, %v7991_v20  ;;  %v4963_v44 = vmul.f32 %v7989_v47, %v4940_v54  ;;  %v4964_v59 = vmul.f32 %v4940_v54, %v8005_v53 }
 0x72f   : > { %v4965_v51 = vmul.f32 %v8003_v30, %v4940_v54  ;;  %v4966_v57 = vmul.f32 %v4940_v54, %v8019_v60  ;;  %v4967_v49 = vmul.f32 %v8017_v22, %v4940_v54  ;;  %v4968_v38 = vmul.f32 %v4940_v54, %v8033_v6 }
 0x730   : > { %v4969_v25 = vmul.f32 %v8031_v2, %v4940_v54  ;;  %v4970_v37 = vmul.f32 %v4940_v54, %v8047_v29  ;;  %v4971_v16 = vmul.f32 %v8045_v33, %v4940_v54  ;;  %v4972_v20 = vmul.f32 %v4940_v54, %v8061_v61 }
 0x731   : > { %v4973_v47 = vmul.f32 %v8059_v45, %v4940_v54  ;;  %v4978_v53 = vrot.slane %v4935_v24, %v6800_v18 }
 0x733   : > { %v4980_v62 = vadd.f32 %v4978_v53, %v4942_v21  ;;  %v4981_v30 = vadd.f32 %v4978_v53, %v4943_v10  ;;  %v4982_v40 = vadd.f32 %v4978_v53, %v4944_v43  ;;  %v4983_v60 = vadd.f32 %v4978_v53, %v4945_v32  ;;  %v8327_v10 = vld [vmem:[#allocation5_spill] sm:$0xff]  ;;  %v8328_v32 = vld [vmem:[#allocation7_spill] sm:$0xff] }
 0x734   : > { %v4984_v56 = vadd.f32 %v4978_v53, %v4946_v1  ;;  %v4985_v22 = vadd.f32 %v4978_v53, %v4947_v3  ;;  %v4986_v0 = vadd.f32 %v4978_v53, %v4948_v63  ;;  %v4987_v6 = vadd.f32 %v4978_v53, %v4949_v42  ;;  %v8329_v3 = vld [vmem:[#allocation4_spill] sm:$0xff]  ;;  %v8330_v42 = vld [vmem:[#allocation6_spill] sm:$0xff] }
 0x735   : > { %v4988_v35 = vadd.f32 %v4978_v53, %v4950_v4  ;;  %v4989_v2 = vadd.f32 %v4978_v53, %v4951_v48  ;;  %v4990_v52 = vadd.f32 %v4978_v53, %v4952_v14  ;;  %v4991_v29 = vadd.f32 %v4978_v53, %v4953_v19  ;;  %v8331_v48 = vld [vmem:[#allocation8_spill] sm:$0xff]  ;;  %v8332_v19 = vld [vmem:[#allocation9_spill] sm:$0xff] }
 0x736   : > { %v4992_v17 = vadd.f32 %v4978_v53, %v4954_v55  ;;  %v4993_v33 = vadd.f32 %v4978_v53, %v4955_v27  ;;  %v4994_v31 = vadd.f32 %v4978_v53, %v4956_v23  ;;  %v4995_v61 = vadd.f32 %v4978_v53, %v4957_v58  ;;  %v8333_v27 = vld [vmem:[#allocation10_spill] sm:$0xff]  ;;  %v8334_v58 = vld [vmem:[#allocation11_spill] sm:$0xff] }
 0x737   : > { %v4996_v28 = vadd.f32 %v4978_v53, %v4958_v34  ;;  %v4997_v45 = vadd.f32 %v4978_v53, %v4959_v26  ;;  %v4998_v11 = vadd.f32 %v4978_v53, %v4960_v50  ;;  %v4999_v18 = vadd.f32 %v4978_v53, %v4961_v39  ;;  %v8335_v26 = vld [vmem:[#allocation12_spill] sm:$0xff]  ;;  %v8336_v39 = vld [vmem:[#allocation13_spill] sm:$0xff] }
 0x738   : > { %v5000_v8 = vadd.f32 %v4978_v53, %v4962_v46  ;;  %v5001_v5 = vadd.f32 %v4978_v53, %v4963_v44  ;;  %v5002_v15 = vadd.f32 %v4978_v53, %v4964_v59  ;;  %v5003_v13 = vadd.f32 %v4978_v53, %v4965_v51  ;;  %v8337_v44 = vld [vmem:[#allocation14_spill] sm:$0xff]  ;;  %v8338_v51 = vld [vmem:[#allocation15_spill] sm:$0xff] }
 0x739   : > { %v5004_v9 = vadd.f32 %v4978_v53, %v4966_v57  ;;  %v5005_v41 = vadd.f32 %v4978_v53, %v4967_v49  ;;  %v5006_v36 = vadd.f32 %v4978_v53, %v4968_v38  ;;  %v5007_v12 = vadd.f32 %v4978_v53, %v4969_v25  ;;  %v8339_v49 = vld [vmem:[#allocation16_spill] sm:$0xff]  ;;  %v8340_v25 = vld [vmem:[#allocation17_spill] sm:$0xff] }
 0x73a   : > { %v5008_v7 = vadd.f32 %v4978_v53, %v4970_v37  ;;  %v5009_v54 = vadd.f32 %v4978_v53, %v4971_v16  ;;  %v5010_v24 = vadd.f32 %v4978_v53, %v4972_v20  ;;  %v5011_v21 = vadd.f32 %v4978_v53, %v4973_v47  ;;  %v8341_v16 = vld [vmem:[#allocation18_spill] sm:$0xff]  ;;  %v8342_v47 = vld [vmem:[#allocation19_spill] sm:$0xff] }
 0x73b   : > { %v5012_v43 = vadd.f32 %v4980_v62, %v8327_v10  ;;  %v5013_v1 = vadd.f32 %v4981_v30, %v8328_v32  ;;  %v5014_v63 = vadd.f32 %v4982_v40, %v8329_v3  ;;  %v5015_v4 = vadd.f32 %v4983_v60, %v8330_v42  ;;  %v8343_v62 = vld [vmem:[#allocation20_spill] sm:$0xff]  ;;  %v8344_v40 = vld [vmem:[#allocation21_spill] sm:$0xff]  ;;  %v8358_v42 = vld [vmem:[#allocation35_spill] sm:$0xff] }
 0x73c   : > { %v5016_v14 = vadd.f32 %v4984_v56, %v8331_v48  ;;  %v5017_v55 = vadd.f32 %v4985_v22, %v8332_v19  ;;  %v5018_v23 = vadd.f32 %v4986_v0, %v8333_v27  ;;  %v5019_v34 = vadd.f32 %v4987_v6, %v8334_v58  ;;  %v8345_v56 = vld [vmem:[#allocation22_spill] sm:$0xff]  ;;  %v8346_v0 = vld [vmem:[#allocation23_spill] sm:$0xff] }
 0x73d   : > { %v5020_v50 = vadd.f32 %v4988_v35, %v8335_v26  ;;  %v5021_v46 = vadd.f32 %v4989_v2, %v8336_v39  ;;  %v5022_v59 = vadd.f32 %v4990_v52, %v8337_v44  ;;  %v5023_v57 = vadd.f32 %v4991_v29, %v8338_v51  ;;  %v8347_v35 = vld [vmem:[#allocation24_spill] sm:$0xff]  ;;  %v8348_v52 = vld [vmem:[#allocation25_spill] sm:$0xff] }
 0x73e   : > { %v5024_v38 = vadd.f32 %v4992_v17, %v8339_v49  ;;  %v5025_v37 = vadd.f32 %v4993_v33, %v8340_v25  ;;  %v5026_v20 = vadd.f32 %v4994_v31, %v8341_v16  ;;  %v5027_v53 = vadd.f32 %v4995_v61, %v8342_v47  ;;  %v8349_v17 = vld [vmem:[#allocation26_spill] sm:$0xff]  ;;  %v8350_v31 = vld [vmem:[#allocation27_spill] sm:$0xff]  ;;  %v8351_v61 = vld [vmem:[#allocation28_spill] sm:$0xff] }
 0x73f   : > { %v5028_v30 = vadd.f32 %v4996_v28, %v8343_v62  ;;  %v5029_v60 = vadd.f32 %v4997_v45, %v8344_v40  ;;  %v5030_v22 = vadd.f32 %v4998_v11, %v8345_v56  ;;  %v5031_v6 = vadd.f32 %v4999_v18, %v8346_v0  ;;  %v8352_v45 = vld [vmem:[#allocation29_spill] sm:$0xff]  ;;  %v8353_v11 = vld [vmem:[#allocation30_spill] sm:$0xff] }
 0x740   : > { %v8134_v2 = vadd.f32 %v5000_v8, %v8347_v35  ;;  %v8137_v29 = vadd.f32 %v5001_v5, %v8348_v52  ;;  %v8140_v33 = vadd.f32 %v5002_v15, %v8349_v17  ;;  %v8143_v10 = vadd.f32 %v5003_v13, %v8350_v31  ;;  %v8354_v8 = vld [vmem:[#allocation31_spill] sm:$0xff]  ;;  %v8355_v5 = vld [vmem:[#allocation32_spill] sm:$0xff]  ;;  %v8356_v13 = vld [vmem:[#allocation33_spill] sm:$0xff] }
 0x741   : > { %v8146_v28 = vadd.f32 %v5004_v9, %v8351_v61  ;;  %v8149_v32 = vadd.f32 %v5005_v41, %v8352_v45  ;;  %v8152_v18 = vadd.f32 %v5006_v36, %v8353_v11  ;;  %v8155_v3 = vadd.f32 %v5007_v12, %v8354_v8  ;;  %v8357_v41 = vld [vmem:[#allocation34_spill] sm:$0xff] }
 0x742   : > { %v8165_v15 = vadd.f32 %v5008_v7, %v8355_v5  ;;  %v8168_v9 = vadd.f32 %v5009_v54, %v8356_v13  ;;  %v8171_v36 = vadd.f32 %v5010_v24, %v8357_v41  ;;  %v8174_v12 = vadd.f32 %v5011_v21, %v8358_v42 }
 0x743   : > { %v5044_v48 = vmax.f32 %v5012_v43, 0.0  ;;  %v5045_v19 = vmax.f32 %v5013_v1, 0.0  ;;  %v5046_v27 = vmax.f32 %v5014_v63, 0.0  ;;  %v5047_v58 = vmax.f32 %v5015_v4, 0.0 }
 0x744   : > { %v5048_v26 = vmax.f32 %v5016_v14, 0.0  ;;  %v5049_v7 = vmax.f32 %v5017_v55, 0.0  ;;  %v5050_v39 = vmax.f32 %v5018_v23, 0.0  ;;  %v5051_v54 = vmax.f32 %v5019_v34, 0.0 }
 0x745   : > { %v5052_v44 = vmax.f32 %v5020_v50, 0.0  ;;  %v5053_v24 = vmax.f32 %v5021_v46, 0.0  ;;  %v5054_v51 = vmax.f32 %v5022_v59, 0.0  ;;  %v5055_v49 = vmax.f32 %v5023_v57, 0.0  ;;  %5076 = vst.msk [vmem:[%s8162_s27] sm:$0xff] %vm312_vm0, %v5044_v48  ;;  %5077 = vst.msk [vmem:[%s8162_s27 + $0x8] sm:$0xff] %vm312_vm0, %v5045_v19 }
 0x746   : > { %5078 = vst.msk [vmem:[%s8162_s27 + $0x10] sm:$0xff] %vm312_vm0, %v5046_v27  ;;  %5079 = vst.msk [vmem:[%s8162_s27 + $0x18] sm:$0xff] %vm312_vm0, %v5047_v58  ;;  %v5056_v21 = vmax.f32 %v5024_v38, 0.0  ;;  %v5057_v43 = vmax.f32 %v5025_v37, 0.0  ;;  %v5058_v1 = vmax.f32 %v5026_v20, 0.0  ;;  %v5059_v63 = vmax.f32 %v5027_v53, 0.0 }
 0x747   : > { %5080 = vst.msk [vmem:[%s8162_s27 + $0x20] sm:$0xff] %vm312_vm0, %v5048_v26  ;;  %5081 = vst.msk [vmem:[%s8162_s27 + $0x28] sm:$0xff] %vm312_vm0, %v5049_v7  ;;  %v5060_v4 = vmax.f32 %v5028_v30, 0.0  ;;  %v5061_v14 = vmax.f32 %v5029_v60, 0.0  ;;  %v5062_v55 = vmax.f32 %v5030_v22, 0.0  ;;  %v5063_v23 = vmax.f32 %v5031_v6, 0.0 }
 0x748   : > { %5082 = vst.msk [vmem:[%s8162_s27 + $0x30] sm:$0xff] %vm312_vm0, %v5050_v39  ;;  %5083 = vst.msk [vmem:[%s8162_s27 + $0x38] sm:$0xff] %vm312_vm0, %v5051_v54  ;;  %v5064_v34 = vmax.f32 %v8134_v2, 0.0  ;;  %v5065_v50 = vmax.f32 %v8137_v29, 0.0  ;;  %v5066_v46 = vmax.f32 %v8140_v33, 0.0  ;;  %v5067_v59 = vmax.f32 %v8143_v10, 0.0 }
 0x749   : > { %5084 = vst.msk [vmem:[%s8162_s27 + $0x40] sm:$0xff] %vm312_vm0, %v5052_v44  ;;  %5085 = vst.msk [vmem:[%s8162_s27 + $0x48] sm:$0xff] %vm312_vm0, %v5053_v24  ;;  %v5068_v57 = vmax.f32 %v8146_v28, 0.0  ;;  %v5069_v38 = vmax.f32 %v8149_v32, 0.0  ;;  %v5070_v25 = vmax.f32 %v8152_v18, 0.0  ;;  %v5071_v37 = vmax.f32 %v8155_v3, 0.0 }
 0x74a   : > { %5086 = vst.msk [vmem:[%s8162_s27 + $0x50] sm:$0xff] %vm312_vm0, %v5054_v51  ;;  %5087 = vst.msk [vmem:[%s8162_s27 + $0x58] sm:$0xff] %vm312_vm0, %v5055_v49  ;;  %v5072_v16 = vmax.f32 %v8165_v15, 0.0  ;;  %v5073_v20 = vmax.f32 %v8168_v9, 0.0  ;;  %v5074_v47 = vmax.f32 %v8171_v36, 0.0  ;;  %v5075_v53 = vmax.f32 %v8174_v12, 0.0 }
 0x74b   : > { %5088 = vst.msk [vmem:[%s8162_s27 + $0x60] sm:$0xff] %vm312_vm0, %v5056_v21  ;;  %5089 = vst.msk [vmem:[%s8162_s27 + $0x68] sm:$0xff] %vm312_vm0, %v5057_v43 }
 0x74c   : > { %5090 = vst.msk [vmem:[%s8162_s27 + $0x70] sm:$0xff] %vm312_vm0, %v5058_v1  ;;  %5091 = vst.msk [vmem:[%s8162_s27 + $0x78] sm:$0xff] %vm312_vm0, %v5059_v63 }
 0x74d   : > { %5092 = vst.msk [vmem:[%s8162_s27 + $0x80] sm:$0xff] %vm312_vm0, %v5060_v4  ;;  %5093 = vst.msk [vmem:[%s8162_s27 + $0x88] sm:$0xff] %vm312_vm0, %v5061_v14 }
 0x74e   : > { %5094 = vst.msk [vmem:[%s8162_s27 + $0x90] sm:$0xff] %vm312_vm0, %v5062_v55  ;;  %5095 = vst.msk [vmem:[%s8162_s27 + $0x98] sm:$0xff] %vm312_vm0, %v5063_v23 }
 0x74f   : > { %5096 = vst.msk [vmem:[%s8162_s27 + $0xa0] sm:$0xff] %vm312_vm0, %v5064_v34  ;;  %5097 = vst.msk [vmem:[%s8162_s27 + $0xa8] sm:$0xff] %vm312_vm0, %v5065_v50 }
 0x750   : > { %5098 = vst.msk [vmem:[%s8162_s27 + $0xb0] sm:$0xff] %vm312_vm0, %v5066_v46  ;;  %5099 = vst.msk [vmem:[%s8162_s27 + $0xb8] sm:$0xff] %vm312_vm0, %v5067_v59 }
 0x751   : > { %5100 = vst.msk [vmem:[%s8162_s27 + $0xc0] sm:$0xff] %vm312_vm0, %v5068_v57  ;;  %5101 = vst.msk [vmem:[%s8162_s27 + $0xc8] sm:$0xff] %vm312_vm0, %v5069_v38 }
 0x752   : > { %5102 = vst.msk [vmem:[%s8162_s27 + $0xd0] sm:$0xff] %vm312_vm0, %v5070_v25  ;;  %5103 = vst.msk [vmem:[%s8162_s27 + $0xd8] sm:$0xff] %vm312_vm0, %v5071_v37 }
 0x753   : > { %5104 = vst.msk [vmem:[%s8162_s27 + $0xe0] sm:$0xff] %vm312_vm0, %v5072_v16  ;;  %5105 = vst.msk [vmem:[%s8162_s27 + $0xe8] sm:$0xff] %vm312_vm0, %v5073_v20 }
 0x754   : > { %5106 = vst.msk [vmem:[%s8162_s27 + $0xf0] sm:$0xff] %vm312_vm0, %v5074_v47  ;;  %5107 = vst.msk [vmem:[%s8162_s27 + $0xf8] sm:$0xff] %vm312_vm0, %v5075_v53 }
 0x755 PF: > { %s17_s24 = sadd.s32 1, %s5474_s24  }
 0x756   : > { %p14_p4 = scmp.ge.s32.totalorder %s17_s24, 4  }
 0x758   :  { %16 = sbr.rel (!%p14_p4) target bundleno = 1 (0x1), region = 81 }

</bundles_post_ra>
